<compile_context>
chip_gen: v6e
topology: v6e:2x2x1
jax: 0.10.0
libtpu: 0.0.40
codegen_flags: <defaults>
</compile_context>

<pallas_src>
import functools

import jax
import jax.numpy as jnp
from jax.experimental import pallas as pl
from jax.experimental.pallas import tpu as pltpu


# Original-batch rows processed per grid step.  With the packed layout this is
# ~0.5 KiB of VMEM per row (x tile + hidden temporaries + output, incl. double
# buffering), so 16384 rows ~= 10 MiB: comfortably inside every generation's
# scoped VMEM.  v6e/v7x can push block_rows to 32K-64K (stay < 32 MiB).
_BLOCK_ROWS_DEFAULT = 16384
_VMEM_LIMIT_BYTES = 32 * 1024 * 1024  # <= physical VMEM on v5e/v6e/v7x


def _round_up(n, m):
    return (n + m - 1) // m * m


def _cdiv(a, b):
    return (a + b - 1) // b


def _mlp_potential_kernel(x_ref, w1_ref, b1_ref, w2_ref, b2_ref,
                          w3_ref, b3_ref, o_ref):
    hp = jax.lax.Precision.HIGHEST
    # Layer 1 (packed): (tm_p, P*dim) @ (P*dim, P*H1) + (1, P*H1) -> ReLU
    h = jnp.dot(x_ref[...], w1_ref[...],
                preferred_element_type=jnp.float32, precision=hp) + b1_ref[...]
    h = jnp.maximum(h, 0.0)
    # Layer 2 (packed): (tm_p, P*H1) @ (P*H1, P*H2) + (1, P*H2) -> ReLU
    h = jnp.dot(h, w2_ref[...],
                preferred_element_type=jnp.float32, precision=hp) + b2_ref[...]
    h = jnp.maximum(h, 0.0)
    # Output layer: per-sample scalar via a (P*H2, P) block-diagonal selector
    # matmul -> (tm_p, P), i.e. P scalars per lane row (denser store).
    # TODO(synk): a further in-kernel (tm_p, P) -> (tm_p*P/128, 128) relayout
    # would make the stores fully unmasked; omitted for lowering robustness.
    o = jnp.dot(h, w3_ref[...],
                preferred_element_type=jnp.float32, precision=hp) + b3_ref[...]
    o_ref[...] = o.astype(o_ref.dtype)


@functools.partial(jax.jit, static_argnames=("block_rows",))
def mlp_potential(x, w1, b1, w2, b2, w3, b3, *, block_rows=_BLOCK_ROWS_DEFAULT):
    """Equivalent of MLPPotential.forward: mlp(x).squeeze(-1).

    Weights are stored transposed vs PyTorch, i.e. (in_features, out_features).
    """
    B, dim = x.shape
    H1 = w1.shape[1]
    H2 = w2.shape[1]

    # Row-packing factor: fold P consecutive samples into one lane-dense row.
    P = 128 // dim if (dim <= 128 and 128 % dim == 0) else 1
    L = P * dim

    # Minimal batch padding:
    #  * to a multiple of max(8, P) so the packed reshape / sublane rule hold
    #  * tiny batches are padded to 8*P rows so every block fits inside the
    #    packed array (only the trailing block may be partial).
    # TODO(synk): the jnp.pad copy triggers only when B % max(8, P) != 0; a
    # separate tail kernel could avoid even that copy for huge ragged batches.
    pad_to = max(8, P)
    Bp = max(_round_up(B, pad_to), 8 * P)
    if Bp != B:
        x = jnp.pad(x, ((0, Bp - B), (0, 0)))

    rows_p = Bp // P                    # packed rows
    xp = x.reshape(rows_p, L)           # free, contiguous reshape in HBM

    # Block-diagonal packed weights (built once per call; a few hundred KiB).
    eye = jnp.eye(P, dtype=w1.dtype)
    w1p = jnp.kron(eye, w1)                         # (L, P*H1)
    b1p = jnp.tile(b1.reshape(1, H1), (1, P))       # (1, P*H1)
    w2p = jnp.kron(eye, w2)                         # (P*H1, P*H2)
    b2p = jnp.tile(b2.reshape(1, H2), (1, P))       # (1, P*H2)
    w3p = jnp.kron(eye, w3.reshape(H2, 1))          # (P*H2, P) selector
    b3p = jnp.tile(b3.reshape(1, 1), (1, P))        # (1, P)

    # Packed batch tile: multiple of 8 sublanes, capped so there are >= 2 grid
    # steps whenever possible (dual-TensorCore sharding on v7x), and never
    # larger than the packed batch.
    tm_p = max(8, _round_up(_cdiv(block_rows, P), 8))
    tm_p = min(tm_p, max(8, _round_up(_cdiv(rows_p, 2), 8)))
    grid = (_cdiv(rows_p, tm_p),)       # trailing block may be partial

    const = lambda i: (0, 0)            # weights/biases: resident every step
    # TODO(synk): pipeline_mode=pl.Buffered(1) on the grid-invariant weight
    # specs would halve their (tiny, <1 MiB here) double-buffered footprint.

    out = pl.pallas_call(
        _mlp_potential_kernel,
        out_shape=jax.ShapeDtypeStruct((rows_p, P), jnp.float32),
        grid_spec=pltpu.PrefetchScalarGridSpec(
            num_scalar_prefetch=0,
            grid=grid,
            in_specs=[
                pl.BlockSpec((tm_p, L), lambda i: (i, 0)),   # streamed x tile
                pl.BlockSpec((L, P * H1), const),            # w1 packed
                pl.BlockSpec((1, P * H1), const),            # b1 packed
                pl.BlockSpec((P * H1, P * H2), const),       # w2 packed
                pl.BlockSpec((1, P * H2), const),            # b2 packed
                pl.BlockSpec((P * H2, P), const),            # w3 selector
                pl.BlockSpec((1, P), const),                 # b3
            ],
            out_specs=pl.BlockSpec((tm_p, P), lambda i: (i, 0)),
        ),
        compiler_params=pltpu.CompilerParams(
            # Batch tiles are independent -> megacore sharding on v7x,
            # harmless on v5e/v6e.
            dimension_semantics=("parallel",),
            vmem_limit_bytes=_VMEM_LIMIT_BYTES,
        ),
    )(xp, w1p, b1p, w2p, b2p, w3p, b3p)

    # Row-major unpack restores the original sample order; drop padding.
    # torch: self.mlp(x).squeeze(-1)
    return out.reshape(Bp)[:B]
    # TODO(synk): optional bf16 streaming of x (f32 accumulate) is a ~2x HBM
    # bandwidth win (largest on v5e) but changes numerics vs the f32 reference,
    # so it is left as an accuracy-policy switch rather than enabled here.


def xavier_uniform(key, fan_in, fan_out):
    # matches torch.nn.init.xavier_uniform_ (gain=1), stored as (in, out)
    bound = jnp.sqrt(6.0 / (fan_in + fan_out))
    return jax.random.uniform(key, (fan_in, fan_out), jnp.float32,
                              minval=-bound, maxval=bound)


def make_params(key, dim, hidden_dims):
    dims = [dim] + list(hidden_dims) + [1]
    params = []
    for i in range(len(dims) - 1):
        key, sub = jax.random.split(key)
        w = xavier_uniform(sub, dims[i], dims[i + 1])
        b = jnp.zeros((1, dims[i + 1]), jnp.float32)  # bias zeroed, as in __init__
        params += [w, b]
    return params


def reference(x, w1, b1, w2, b2, w3, b3):
    hp = jax.lax.Precision.HIGHEST
    h = jnp.maximum(jnp.dot(x, w1, precision=hp) + b1, 0.0)
    h = jnp.maximum(jnp.dot(h, w2, precision=hp) + b2, 0.0)
    return (jnp.dot(h, w3, precision=hp) + b3.reshape(1, 1))[:, 0]


if __name__ == "__main__":
    dim = 16
    hidden_dims = (32, 32)

    key = jax.random.PRNGKey(0)
    kp, kx1, kx2, kx3 = jax.random.split(key, 4)
    params = make_params(kp, dim, hidden_dims)

    # 1) Tiny batch (single packed tile; internal pad of the small batch).
    B1 = 8
    x1 = jax.random.normal(kx1, (B1, dim), jnp.float32)
    o1 = mlp_potential(x1, *params)
    jax.block_until_ready(o1)
    r1 = reference(x1, *params)
    assert o1.shape == (B1,)
    assert jnp.allclose(o1, r1, atol=1e-5, rtol=1e-4)

    # 2) Ragged batch + small tile: exercises the B%8 pad, a multi-step grid
    #    and a partial trailing block (OOB rows dropped on writeback).
    B2 = 100
    x2 = jax.random.normal(kx2, (B2, dim), jnp.float32)
    o2 = mlp_potential(x2, *params, block_rows=64)
    jax.block_until_ready(o2)
    r2 = reference(x2, *params)
    assert o2.shape == (B2,)
    assert jnp.allclose(o2, r2, atol=1e-5, rtol=1e-4)

    # 3) Larger batch with the default tile: exactly 2 parallel grid steps
    #    (dual-TensorCore split on v7x), no padding, no partial blocks.
    B3 = 4096
    x3 = jax.random.normal(kx3, (B3, dim), jnp.float32)
    o3 = mlp_potential(x3, *params)
    jax.block_until_ready(o3)
    r3 = reference(x3, *params)
    assert o3.shape == (B3,)
    assert jnp.allclose(o3, r3, atol=1e-5, rtol=1e-4)

    print("KERNEL_OK")
</pallas_src>

<mosaic_0001>
module attributes {stable_mosaic.version = 11 : i64} {
  func.func @_mlp_potential_kernel(%arg0: i32, %arg1: memref<8x128xf32, #tpu.memory_space<vmem>>, %arg2: memref<128x256xf32, #tpu.memory_space<vmem>>, %arg3: memref<1x256xf32, #tpu.memory_space<vmem>>, %arg4: memref<256x256xf32, #tpu.memory_space<vmem>>, %arg5: memref<1x256xf32, #tpu.memory_space<vmem>>, %arg6: memref<256x8xf32, #tpu.memory_space<vmem>>, %arg7: memref<1x8xf32, #tpu.memory_space<vmem>>, %arg8: memref<8x8xf32, #tpu.memory_space<vmem>>) attributes {dimension_semantics = [#tpu.dimension_semantics<parallel>], iteration_bounds = array<i64: 1>, scalar_prefetch = 0 : i64, scratch_operands = 0 : i64, tpu.core_type = #tpu.core_type<tc>, window_params = [{transform_indices = @transform_0, window_bounds = array<i64: 8, 128>}, {pipeline_mode = #tpu.pipeline_mode<synchronous>, transform_indices = @transform_1, window_bounds = array<i64: 128, 256>}, {pipeline_mode = #tpu.pipeline_mode<synchronous>, transform_indices = @transform_2, window_bounds = array<i64: 1, 256>}, {pipeline_mode = #tpu.pipeline_mode<synchronous>, transform_indices = @transform_3, window_bounds = array<i64: 256, 256>}, {pipeline_mode = #tpu.pipeline_mode<synchronous>, transform_indices = @transform_4, window_bounds = array<i64: 1, 256>}, {pipeline_mode = #tpu.pipeline_mode<synchronous>, transform_indices = @transform_5, window_bounds = array<i64: 256, 8>}, {pipeline_mode = #tpu.pipeline_mode<synchronous>, transform_indices = @transform_6, window_bounds = array<i64: 1, 8>}, {transform_indices = @transform_7, window_bounds = array<i64: 8, 8>}]} {
    %c0 = arith.constant 0 : index
    %c0_0 = arith.constant 0 : index
    %0 = vector.load %arg1[%c0, %c0_0] : memref<8x128xf32, #tpu.memory_space<vmem>>, vector<8x128xf32>
    %c0_1 = arith.constant 0 : index
    %c0_2 = arith.constant 0 : index
    %1 = vector.load %arg2[%c0_1, %c0_2] : memref<128x256xf32, #tpu.memory_space<vmem>>, vector<128x256xf32>
    %cst = arith.constant dense<0.000000e+00> : vector<8x256xf32>
    %2 = tpu.matmul %0, %1, %cst {dimension_numbers = #tpu.dot_dimension_numbers<[1], [0], [0], [1], [0, 0, 1, 1], [], []>, precision = #tpu.contract_precision<fp32>} : vector<8x128xf32>, vector<128x256xf32>, vector<8x256xf32> -> vector<8x256xf32>
    %c0_3 = arith.constant 0 : index
    %c0_4 = arith.constant 0 : index
    %3 = vector.load %arg3[%c0_3, %c0_4] : memref<1x256xf32, #tpu.memory_space<vmem>>, vector<1x256xf32>
    %4 = vector.broadcast %3 : vector<1x256xf32> to vector<8x256xf32>
    %5 = arith.addf %2, %4 : vector<8x256xf32>
    %cst_5 = arith.constant 0.000000e+00 : f32
    %6 = vector.broadcast %cst_5 : f32 to vector<8x256xf32>
    %7 = arith.maximumf %5, %6 : vector<8x256xf32>
    %c0_6 = arith.constant 0 : index
    %c0_7 = arith.constant 0 : index
    %8 = vector.load %arg4[%c0_6, %c0_7] : memref<256x256xf32, #tpu.memory_space<vmem>>, vector<256x256xf32>
    %cst_8 = arith.constant dense<0.000000e+00> : vector<8x256xf32>
    %9 = tpu.matmul %7, %8, %cst_8 {dimension_numbers = #tpu.dot_dimension_numbers<[1], [0], [0], [1], [0, 0, 1, 1], [], []>, precision = #tpu.contract_precision<fp32>} : vector<8x256xf32>, vector<256x256xf32>, vector<8x256xf32> -> vector<8x256xf32>
    %c0_9 = arith.constant 0 : index
    %c0_10 = arith.constant 0 : index
    %10 = vector.load %arg5[%c0_9, %c0_10] : memref<1x256xf32, #tpu.memory_space<vmem>>, vector<1x256xf32>
    %11 = vector.broadcast %10 : vector<1x256xf32> to vector<8x256xf32>
    %12 = arith.addf %9, %11 : vector<8x256xf32>
    %cst_11 = arith.constant 0.000000e+00 : f32
    %13 = vector.broadcast %cst_11 : f32 to vector<8x256xf32>
    %14 = arith.maximumf %12, %13 : vector<8x256xf32>
    %c0_12 = arith.constant 0 : index
    %c0_13 = arith.constant 0 : index
    %15 = vector.load %arg6[%c0_12, %c0_13] : memref<256x8xf32, #tpu.memory_space<vmem>>, vector<256x8xf32>
    %cst_14 = arith.constant dense<0.000000e+00> : vector<8x8xf32>
    %16 = tpu.matmul %14, %15, %cst_14 {dimension_numbers = #tpu.dot_dimension_numbers<[1], [0], [0], [1], [0, 0, 1, 1], [], []>, precision = #tpu.contract_precision<fp32>} : vector<8x256xf32>, vector<256x8xf32>, vector<8x8xf32> -> vector<8x8xf32>
    %c0_15 = arith.constant 0 : index
    %c0_16 = arith.constant 0 : index
    %17 = vector.load %arg7[%c0_15, %c0_16] : memref<1x8xf32, #tpu.memory_space<vmem>>, vector<1x8xf32>
    %18 = vector.broadcast %17 : vector<1x8xf32> to vector<8x8xf32>
    %19 = arith.addf %16, %18 : vector<8x8xf32>
    %c0_17 = arith.constant 0 : index
    %c0_18 = arith.constant 0 : index
    %20 = vector.load %arg8[%c0_17, %c0_18] : memref<8x8xf32, #tpu.memory_space<vmem>>, vector<8x8xf32>
    tpu.vector_store %arg8[%c0_17, %c0_18], %19 {strides = array<i32>} : memref<8x8xf32, #tpu.memory_space<vmem>>, vector<8x8xf32>,
    return
  }
  func.func @transform_0(%arg0: i32) -> (i32, i32) {
    %c0_i32 = arith.constant 0 : i32
    %c0_i32_0 = arith.constant 0 : i32
    return %arg0, %c0_i32 : i32, i32
  }
  func.func @transform_1(%arg0: i32) -> (i32, i32) {
    %c0_i32 = arith.constant 0 : i32
    %c0_i32_0 = arith.constant 0 : i32
    %c0_i32_1 = arith.constant 0 : i32
    return %c0_i32, %c0_i32_0 : i32, i32
  }
  func.func @transform_2(%arg0: i32) -> (i32, i32) {
    %c0_i32 = arith.constant 0 : i32
    %c0_i32_0 = arith.constant 0 : i32
    %c0_i32_1 = arith.constant 0 : i32
    return %c0_i32, %c0_i32_0 : i32, i32
  }
  func.func @transform_3(%arg0: i32) -> (i32, i32) {
    %c0_i32 = arith.constant 0 : i32
    %c0_i32_0 = arith.constant 0 : i32
    %c0_i32_1 = arith.constant 0 : i32
    return %c0_i32, %c0_i32_0 : i32, i32
  }
  func.func @transform_4(%arg0: i32) -> (i32, i32) {
    %c0_i32 = arith.constant 0 : i32
    %c0_i32_0 = arith.constant 0 : i32
    %c0_i32_1 = arith.constant 0 : i32
    return %c0_i32, %c0_i32_0 : i32, i32
  }
  func.func @transform_5(%arg0: i32) -> (i32, i32) {
    %c0_i32 = arith.constant 0 : i32
    %c0_i32_0 = arith.constant 0 : i32
    %c0_i32_1 = arith.constant 0 : i32
    return %c0_i32, %c0_i32_0 : i32, i32
  }
  func.func @transform_6(%arg0: i32) -> (i32, i32) {
    %c0_i32 = arith.constant 0 : i32
    %c0_i32_0 = arith.constant 0 : i32
    %c0_i32_1 = arith.constant 0 : i32
    return %c0_i32, %c0_i32_0 : i32, i32
  }
  func.func @transform_7(%arg0: i32) -> (i32, i32) {
    %c0_i32 = arith.constant 0 : i32
    %c0_i32_0 = arith.constant 0 : i32
    return %arg0, %c0_i32 : i32, i32
  }
}

</mosaic_0001>

<bundles_post_ra>
// kernel: mlp_potential.1
= control target key start
LH: loop header
LB: loop body
LE: loop exit
PB: predicated region body
PF: predicated region fallthrough
CT: control target
= control target key end

     0   :  { %v5958_v3 = vmov 0.0   ;;  %vm3191_vm0 = vcmask 64512   ;;  %s5936_s1 = inlined_call_operand.vmem [shape: f32[128,256], index: 1, kind: input, shape index: {}]   ;;  %s5937_s0 = inlined_call_operand.vmem [shape: f32[8,128], index: 0, kind: input, shape index: {}]   ;;  %s5938_s3 = inlined_call_operand.vmem [shape: f32[256,256], index: 3, kind: input, shape index: {}]   ;;  %s5939_s2 = inlined_call_operand.vmem [shape: f32[1,256], index: 2, kind: input, shape index: {}]   ;;  %s5940_s5 = inlined_call_operand.vmem [shape: f32[256,8], index: 5, kind: input, shape index: {}]   ;;  %s5941_s4 = inlined_call_operand.vmem [shape: f32[1,256], index: 4, kind: input, shape index: {}]   ;;  %s5942_s6 = inlined_call_operand.vmem [shape: f32[1,8], index: 6, kind: input, shape index: {}]   ;;  %s5943_s7 = inlined_call_operand.vmem [shape: f32[8,8], index: 7, kind: output, shape index: {}]  }
   0x1   :  { %v58_v0 = vld [vmem:[%s5936_s1 + $0xf8] sm:$0xff]  ;;  %v57_v1 = vld [vmem:[%s5936_s1 + $0xf0] sm:$0xff]  ;;  %v56_v2 = vld [vmem:[%s5936_s1 + $0xe8] sm:$0xff]  ;;  %167 = vmatprep.mubr.f32.mxu0 %v5958_v3  ;;  %403 = vmatprep.mubr.f32.mxu1 %v5958_v3 }
   0x2   :  { %v3461_v4 = vand.u32 4294901760, %v58_v0  ;;  %v3463_v5 = vand.u32 4294901760, %v57_v1  ;;  %v3465_v6 = vand.u32 4294901760, %v56_v2  ;;  %v55_v7 = vld [vmem:[%s5936_s1 + $0xe0] sm:$0xff]  ;;  %v54_v8 = vld [vmem:[%s5936_s1 + $0xd8] sm:$0xff]  ;;  %v53_v9 = vld [vmem:[%s5936_s1 + $0xd0] sm:$0xff] }
   0x3   :  { %v3476_v10 = vand.u32 4294901760, %v55_v7  ;;  %v3478_v11 = vand.u32 4294901760, %v54_v8  ;;  %v3480_v12 = vand.u32 4294901760, %v53_v9  ;;  %v52_v13 = vld [vmem:[%s5936_s1 + $0xc8] sm:$0xff]  ;;  %v51_v14 = vld [vmem:[%s5936_s1 + $0xc0] sm:$0xff]  ;;  %v50_v15 = vld [vmem:[%s5936_s1 + $0xb8] sm:$0xff] }
   0x4   :  { %72 = vmatprep.subr.mxu0 %v3461_v4  ;;  %v3492_v16 = vand.u32 4294901760, %v52_v13  ;;  %v3494_v17 = vand.u32 4294901760, %v51_v14  ;;  %v3496_v18 = vand.u32 4294901760, %v50_v15  ;;  %v3499_v19 = vsub.f32 %v58_v0, %v3461_v4  ;;  %v3504_v20 = vld [vmem:[%s5936_s1 + $0xb0] sm:$0xff]  ;;  %v3509_v21 = vld [vmem:[%s5936_s1 + $0xa8] sm:$0xff]  ;;  %v3514_v22 = vld [vmem:[%s5936_s1 + $0xa0] sm:$0xff] }
   0x5   :  { %74 = vmatpush1.msra.mxu0 %v3463_v5  ;;  %v3518_v23 = vand.u32 4294901760, %v3504_v20  ;;  %v3521_v24 = vsub.f32 %v57_v1, %v3463_v5  ;;  %v3524_v25 = vand.u32 4294901760, %v3509_v21  ;;  %v3527_v26 = vsub.f32 %v56_v2, %v3465_v6  ;;  %v3532_v27 = vld [vmem:[%s5936_s1 + $0x98] sm:$0xff]  ;;  %v3537_v28 = vld [vmem:[%s5936_s1 + $0x90] sm:$0xff]  ;;  %v3542_v29 = vld [vmem:[%s5936_s1 + $0x88] sm:$0xff] }
   0x6   :  { %76 = vmatprep.subr.mxu0 %v3465_v6  ;;  %v5957_v30 = vand.u32 4294901760, %v3499_v19  ;;  %v3547_v31 = vand.u32 4294901760, %v3514_v22  ;;  %v3550_v32 = vsub.f32 %v55_v7, %v3476_v10  ;;  %v3553_v33 = vand.u32 4294901760, %v3532_v27  ;;  %v3567_v38 = vld [vmem:[%s5936_s1 + $0x80] sm:$0xff]  ;;  %v3594_v47 = vld [vmem:[%s5936_s1 + $0x78] sm:$0xff]  ;;  %v3607_v52 = vld [vmem:[%s5936_s1 + $0x70] sm:$0xff] }
   0x7   :  { %78 = vmatpush1.msra.mxu0 %v3476_v10  ;;  %v5955_v34 = vand.u32 4294901760, %v3521_v24  ;;  %v5954_v35 = vand.u32 4294901760, %v3527_v26  ;;  %v3559_v36 = vsub.f32 %v54_v8, %v3478_v11  ;;  %v3562_v37 = vand.u32 4294901760, %v3537_v28  ;;  %v3617_v57 = vld [vmem:[%s5936_s1 + $0x68] sm:$0xff]  ;;  %v3632_v62 = vld [vmem:[%s5936_s1 + $0x60] sm:$0xff]  ;;  %v3647_v7 = vld [vmem:[%s5936_s1 + $0x58] sm:$0xff] }
   0x8   :  { %6317 = vst [vmem:[#allocation2_spill] sm:$0xff] %v3553_v33  ;;  %80 = vmatprep.subr.mxu0 %v3478_v11  ;;  %v182_v39 = vsub.f32 %v3499_v19, %v5957_v30  ;;  %v5952_v40 = vand.u32 4294901760, %v3550_v32  ;;  %v3575_v41 = vsub.f32 %v53_v9, %v3480_v12  ;;  %v3578_v42 = vand.u32 4294901760, %v3542_v29  ;;  %v3783_v30 = vld [vmem:[%s5936_s1 + $0x18] sm:$0xff] }
   0x9   :  { %6318 = vst [vmem:[#allocation3_spill] sm:$0xff] %v3562_v37  ;;  %82 = vmatpush1.msra.mxu0 %v3480_v12  ;;  %v188_v43 = vsub.f32 %v3521_v24, %v5955_v34  ;;  %v194_v44 = vsub.f32 %v3527_v26, %v5954_v35  ;;  %v5950_v45 = vand.u32 4294901760, %v3559_v36  ;;  %v3589_v46 = vsub.f32 %v52_v13, %v3492_v16 }
   0xa   :  { %6319 = vst [vmem:[#allocation4_spill] sm:$0xff] %v3578_v42  ;;  %84 = vmatprep.subr.mxu0 %v3492_v16  ;;  %v183_v48 = vand.u32 4294901760, %v182_v39  ;;  %v200_v49 = vsub.f32 %v3550_v32, %v5952_v40  ;;  %v5949_v50 = vand.u32 4294901760, %v3575_v41  ;;  %v3602_v51 = vand.u32 4294901760, %v3567_v38  ;;  %v3756_v40 = vld [vmem:[%s5936_s1 + $0x28] sm:$0xff] }
   0xb   :  { %86 = vmatpush1.msra.mxu0 %v3494_v17  ;;  %v189_v53 = vand.u32 4294901760, %v188_v43  ;;  %v195_v54 = vand.u32 4294901760, %v194_v44  ;;  %v206_v55 = vsub.f32 %v3559_v36, %v5950_v45  ;;  %v5947_v56 = vand.u32 4294901760, %v3589_v46  ;;  %v3740_v45 = vld [vmem:[%s5936_s1 + $0x30] sm:$0xff] }
   0xc   :  { %6320 = vst [vmem:[#allocation5_spill] sm:$0xff] %v3602_v51  ;;  %88 = vmatprep.subr.mxu0 %v3496_v18  ;;  %184 = vmatprep.subr.mxu1 %v183_v48  ;;  %v201_v58 = vand.u32 4294901760, %v200_v49  ;;  %v212_v59 = vsub.f32 %v3575_v41, %v5949_v50  ;;  %v3624_v60 = vsub.f32 %v51_v14, %v3494_v17  ;;  %v3627_v61 = vand.u32 4294901760, %v3594_v47 }
   0xd   :  { %90 = vmatpush1.msra.mxu0 %v3518_v23  ;;  %190 = vmatpush1.msra.mxu1 %v189_v53  ;;  %v207_v63 = vand.u32 4294901760, %v206_v55  ;;  %v218_v0 = vsub.f32 %v3589_v46, %v5947_v56  ;;  %v3639_v1 = vsub.f32 %v50_v15, %v3496_v18  ;;  %v3642_v2 = vand.u32 4294901760, %v3607_v52  ;;  %v3661_v15 = vld [vmem:[%s5936_s1 + $0x50] sm:$0xff] }
   0xe   :  { %6321 = vst [vmem:[#allocation6_spill] sm:$0xff] %v3627_v61  ;;  %92 = vmatprep.subr.mxu0 %v3524_v25  ;;  %196 = vmatprep.subr.mxu1 %v195_v54  ;;  %v213_v8 = vand.u32 4294901760, %v212_v59  ;;  %v5945_v9 = vand.u32 4294901760, %v3624_v60  ;;  %v3653_v13 = vsub.f32 %v3504_v20, %v3518_v23  ;;  %v3656_v14 = vand.u32 4294901760, %v3617_v57 }
   0xf   :  { %6322 = vst [vmem:[#allocation7_spill] sm:$0xff] %v3642_v2  ;;  %94 = vmatpush1.msra.mxu0 %v3547_v31  ;;  %202 = vmatpush1.msra.mxu1 %v201_v58  ;;  %v219_v39 = vand.u32 4294901760, %v218_v0  ;;  %v5944_v43 = vand.u32 4294901760, %v3639_v1  ;;  %v3667_v44 = vsub.f32 %v3509_v21, %v3524_v25  ;;  %v3670_v20 = vand.u32 4294901760, %v3632_v62  ;;  %v3687_v21 = vld [vmem:[%s5936_s1 + $0x48] sm:$0xff] }
  0x10   :  { %6323 = vst [vmem:[#allocation8_spill] sm:$0xff] %v3656_v14  ;;  %96 = vmatprep.subr.mxu0 %v3553_v33  ;;  %208 = vmatprep.subr.mxu1 %v207_v63  ;;  %v224_v48 = vsub.f32 %v3624_v60, %v5945_v9  ;;  %v5946_v49 = vand.u32 4294901760, %v3653_v13  ;;  %v3679_v53 = vsub.f32 %v3514_v22, %v3547_v31  ;;  %v3682_v54 = vand.u32 4294901760, %v3647_v7 }
  0x11   :  { %6324 = vst [vmem:[#allocation9_spill] sm:$0xff] %v3670_v20  ;;  %98 = vmatpush1.msra.mxu0 %v3562_v37  ;;  %214 = vmatpush1.msra.mxu1 %v213_v8  ;;  %v230_v55 = vsub.f32 %v3639_v1, %v5944_v43  ;;  %v5948_v58 = vand.u32 4294901760, %v3667_v44  ;;  %v3696_v22 = vsub.f32 %v3532_v27, %v3553_v33  ;;  %v3699_v59 = vand.u32 4294901760, %v3661_v15  ;;  %v3713_v27 = vld [vmem:[%s5936_s1 + $0x40] sm:$0xff] }
  0x12   :  { %6325 = vst [vmem:[#allocation10_spill] sm:$0xff] %v3682_v54  ;;  %100 = vmatprep.subr.mxu0 %v3578_v42  ;;  %220 = vmatprep.subr.mxu1 %v219_v39  ;;  %v225_v63 = vand.u32 4294901760, %v224_v48  ;;  %v236_v0 = vsub.f32 %v3653_v13, %v5946_v49  ;;  %v5951_v8 = vand.u32 4294901760, %v3679_v53  ;;  %v3708_v43 = vsub.f32 %v3537_v28, %v3562_v37  ;;  %v3726_v28 = vld [vmem:[%s5936_s1 + $0x38] sm:$0xff] }
  0x13   :  { %6326 = vst [vmem:[#allocation11_spill] sm:$0xff] %v3699_v59  ;;  %102 = vmatpush1.msra.mxu0 %v3602_v51  ;;  %v231_v9 = vand.u32 4294901760, %v230_v55  ;;  %v242_v39 = vsub.f32 %v3667_v44, %v5948_v58  ;;  %v5953_v48 = vand.u32 4294901760, %v3696_v22  ;;  %v3721_v49 = vand.u32 4294901760, %v3687_v21 }
  0x14   :  { %226 = vmatpush1.msra.mxu1 %v225_v63  ;;  %104 = vmatprep.subr.mxu0 %v3627_v61  ;;  %v237_v56 = vand.u32 4294901760, %v236_v0  ;;  %v248_v55 = vsub.f32 %v3679_v53, %v5951_v8  ;;  %v5956_v58 = vand.u32 4294901760, %v3708_v43  ;;  %v3735_v50 = vsub.f32 %v3542_v29, %v3578_v42 }
  0x15   :  { %6327 = vst [vmem:[#allocation12_spill] sm:$0xff] %v3721_v49  ;;  %232 = vmatprep.subr.mxu1 %v231_v9  ;;  %106 = vmatpush1.msra.mxu0 %v3642_v2  ;;  %v243_v63 = vand.u32 4294901760, %v242_v39  ;;  %v254_v0 = vsub.f32 %v3696_v22, %v5953_v48  ;;  %v3747_v8 = vand.u32 4294901760, %v3713_v27  ;;  %v3751_v29 = vsub.f32 %v3567_v38, %v3602_v51  ;;  %v3769_v38 = vld [vmem:[%s5936_s1 + $0x20] sm:$0xff] }
  0x16   :  { %238 = vmatpush1.msra.mxu1 %v237_v56  ;;  %108 = vmatprep.subr.mxu0 %v3656_v14  ;;  %v249_v9 = vand.u32 4294901760, %v248_v55  ;;  %v260_v39 = vsub.f32 %v3708_v43, %v5956_v58  ;;  %v5962_v48 = vand.u32 4294901760, %v3735_v50  ;;  %v3764_v35 = vand.u32 4294901760, %v3726_v28 }
  0x17   :  { %6328 = vst [vmem:[#allocation13_spill] sm:$0xff] %v3747_v8  ;;  %244 = vmatprep.subr.mxu1 %v243_v63  ;;  %110 = vmatpush1.msra.mxu0 %v3670_v20  ;;  %v255_v56 = vand.u32 4294901760, %v254_v0  ;;  %v5963_v55 = vand.u32 4294901760, %v3751_v29  ;;  %v3775_v34 = vsub.f32 %v3594_v47, %v3627_v61  ;;  %v3778_v58 = vand.u32 4294901760, %v3740_v45 }
  0x18   :  { %250 = vmatpush1.msra.mxu1 %v249_v9  ;;  %112 = vmatprep.subr.mxu0 %v3682_v54  ;;  %v261_v63 = vand.u32 4294901760, %v260_v39  ;;  %v266_v0 = vsub.f32 %v3735_v50, %v5962_v48  ;;  %v3791_v47 = vsub.f32 %v3607_v52, %v3642_v2  ;;  %v3794_v3 = vand.u32 4294901760, %v3756_v40  ;;  %v3811_v52 = vld [vmem:[%s5936_s1 + $0x10] sm:$0xff] }
  0x19   :  { %6329 = vst [vmem:[#allocation14_spill] sm:$0xff] %v3778_v58  ;;  %256 = vmatprep.subr.mxu1 %v255_v56  ;;  %114 = vmatpush1.msra.mxu0 %v3699_v59  ;;  %v272_v9 = vsub.f32 %v3751_v29, %v5963_v55  ;;  %v3803_v61 = vsub.f32 %v3617_v57, %v3656_v14  ;;  %v3806_v48 = vand.u32 4294901760, %v3769_v38  ;;  %v3820_v57 = vand.u32 4294901760, %v3783_v30  ;;  %v3825_v14 = vld [vmem:[%s5936_s1 + $0x8] sm:$0xff] }
  0x1a   :  { %6330 = vst [vmem:[#allocation15_spill] sm:$0xff] %v3794_v3  ;;  %262 = vmatpush1.msra.mxu1 %v261_v63  ;;  %116 = vmatprep.subr.mxu0 %v3721_v49  ;;  %v267_v56 = vand.u32 4294901760, %v266_v0  ;;  %v3817_v39 = vsub.f32 %v3632_v62, %v3670_v20  ;;  %v6332_v2 = vand.u32 4294901760, %v3775_v34  ;;  %v3834_v62 = vsub.f32 %v3647_v7, %v3682_v54  ;;  %v3851_v7 = vld [vmem:[%s5936_s1] sm:$0xff] }
  0x1b   :  { %6331 = vst [vmem:[#allocation16_spill] sm:$0xff] %v3806_v48  ;;  %118 = vmatpush1.msra.mxu0 %v3747_v8  ;;  %v273_v63 = vand.u32 4294901760, %v272_v9  ;;  %v5980_v55 = vand.u32 4294901760, %v3803_v61  ;;  %v6334_v20 = vand.u32 4294901760, %v3791_v47  ;;  %v3842_v9 = vand.u32 4294901760, %v3811_v52 }
  0x1c   :  { %v278_v0 = vsub.f32 %v3775_v34, %v6332_v2  ;;  %6333 = vst [vmem:[#allocation17_spill] sm:$0xff] %v3834_v62  ;;  %268 = vmatprep.subr.mxu1 %v267_v56  ;;  %120 = vmatprep.subr.mxu0 %v3764_v35  ;;  %v3846_v2 = vsub.f32 %v3661_v15, %v3699_v59  ;;  %v3859_v54 = vand.u32 4294901760, %v3825_v14  ;;  %v6336_v59 = vand.u32 4294901760, %v3817_v39 }
  0x1d   :  { %v284_v51 = vsub.f32 %v3791_v47, %v6334_v20  ;;  %6335 = vst [vmem:[#allocation18_spill] sm:$0xff] %v3842_v9  ;;  %274 = vmatpush1.msra.mxu1 %v273_v63  ;;  %122 = vmatpush1.msra.mxu0 %v3778_v58  ;;  %v290_v20 = vsub.f32 %v3803_v61, %v5980_v55  ;;  %v26_v55 = vld [vmem:[%s5937_s0] sm:$0xff] }
  0x1e   :  { %v279_v56 = vand.u32 4294901760, %v278_v0  ;;  %124 = vmatprep.subr.mxu0 %v3794_v3  ;;  %v296_v37 = vsub.f32 %v3817_v39, %v6336_v59  ;;  %v3868_v0 = vsub.f32 %v3687_v21, %v3721_v49  ;;  %v3878_v59 = vand.u32 4294901760, %v3851_v7 }
  0x1f   :  { %v285_v15 = vand.u32 4294901760, %v284_v51  ;;  %v291_v42 = vand.u32 4294901760, %v290_v20  ;;  %126 = vmatpush1.msra.mxu0 %v3806_v48  ;;  %v6337_v51 = vand.u32 4294901760, %v3834_v62  ;;  %v3882_v63 = vsub.f32 %v3713_v27, %v3747_v8 }
  0x20   :  { %280 = vmatprep.subr.mxu1 %v279_v56  ;;  %v297_v21 = vand.u32 4294901760, %v296_v37  ;;  %128 = vmatprep.subr.mxu0 %v3820_v57  ;;  %v6338_v56 = vand.u32 4294901760, %v3846_v2  ;;  %v5987_v49 = vand.u32 4294901760, %v3868_v0  ;;  %v3899_v37 = vsub.f32 %v3740_v45, %v3778_v58 }
  0x21   :  { %v302_v33 = vsub.f32 %v3834_v62, %v6337_v51  ;;  %286 = vmatpush1.msra.mxu1 %v285_v15  ;;  %v3891_v51 = vsub.f32 %v3726_v28, %v3764_v35  ;;  %130 = vmatpush1.msra.mxu0 %v3842_v9  ;;  %v5990_v27 = vand.u32 4294901760, %v3882_v63  ;;  %v3895_v15 = vand.u32 4294901760, %v26_v55 }
  0x22   :  { %v308_v20 = vsub.f32 %v3846_v2, %v6338_v56  ;;  %292 = vmatprep.subr.mxu1 %v291_v42  ;;  %132 = vmatprep.subr.mxu0 %v3859_v54  ;;  %v314_v28 = vsub.f32 %v3868_v0, %v5987_v49  ;;  %v3908_v42 = vsub.f32 %v3756_v40, %v3794_v3 }
  0x23   :  { %v303_v62 = vand.u32 4294901760, %v302_v33  ;;  %6339 = vst [vmem:[#allocation19_spill] sm:$0xff] %v3895_v15  ;;  %298 = vmatpush1.msra.mxu1 %v297_v21  ;;  %134 = vmatpush1.msra.mxu0 %v3878_v59  ;;  %v320_v45 = vsub.f32 %v3882_v63, %v5990_v27  ;;  %v3915_v21 = vsub.f32 %v26_v55, %v3895_v15  ;;  %v6340_v40 = vand.u32 4294901760, %v3891_v51 }
  0x24   :  { %v309_v56 = vand.u32 4294901760, %v308_v20  ;;  %v3920_v49 = vsub.f32 %v3769_v38, %v3806_v48  ;;  %v315_v33 = vand.u32 4294901760, %v314_v28  ;;  %413 = vmatprep.subr.mxu0 %v3499_v19  ;;  %v5995_v3 = vand.u32 4294901760, %v3908_v42 }
  0x25   :  { %304 = vmatprep.subr.mxu1 %v303_v62  ;;  %v326_v62 = vsub.f32 %v3891_v51, %v6340_v40  ;;  %v3929_v55 = vsub.f32 %v3783_v30, %v3820_v57  ;;  %v321_v27 = vand.u32 4294901760, %v320_v45  ;;  %v5996_v20 = vand.u32 4294901760, %v3915_v21 }
  0x26   :  { %310 = vmatpush1.msra.mxu1 %v309_v56  ;;  %v6341_v38 = vand.u32 4294901760, %v3899_v37  ;;  %v5999_v28 = vand.u32 4294901760, %v3920_v49  ;;  %v338_v40 = vsub.f32 %v3908_v42, %v5995_v3  ;;  %v3942_v30 = vsub.f32 %v3811_v52, %v3842_v9 }
  0x27   :  { %316 = vmatprep.subr.mxu1 %v315_v33  ;;  %v327_v48 = vand.u32 4294901760, %v326_v62  ;;  %v6003_v58 = vand.u32 4294901760, %v3929_v55  ;;  %v171_v45 = vsub.f32 %v3915_v21, %v5996_v20  ;;  %v3952_v62 = vsub.f32 %v3825_v14, %v3859_v54 }
  0x28   :  { %v332_v56 = vsub.f32 %v3899_v37, %v6341_v38  ;;  %6342 = vst [vmem:[#allocation20_spill] sm:$0xff] %v3942_v30  ;;  %322 = vmatpush1.msra.mxu1 %v321_v27  ;;  %v344_v33 = vsub.f32 %v3920_v49, %v5999_v28  ;;  %v339_v3 = vand.u32 4294901760, %v338_v40  ;;  %v6002_v27 = vand.u32 4294901760, %v3942_v30 }
  0x29   :  { %328 = vmatprep.subr.mxu1 %v327_v48  ;;  %v350_v52 = vsub.f32 %v3929_v55, %v6003_v58  ;;  %v3960_v20 = vsub.f32 %v3851_v7, %v3878_v59  ;;  %v6001_v28 = vand.u32 4294901760, %v3952_v62  ;;  %v6357_v58 = vand.u32 4294901760, %v3499_v19 }
  0x2a   :  { %v333_v38 = vand.u32 4294901760, %v332_v56  ;;  %v172_v56 = vand.u32 4294901760, %v171_v45  ;;  %v345_v9 = vand.u32 4294901760, %v344_v33  ;;  %v356_v48 = vsub.f32 %v3942_v30, %v6002_v27  ;;  %v6356_v27 = vld [vmem:[#allocation12_spill] sm:$0xff] }
  0x2b   :  { %6343 = vst [vmem:[#allocation21_spill] sm:$0xff] %v3960_v20  ;;  %v351_v14 = vand.u32 4294901760, %v350_v52  ;;  %v6000_v40 = vand.u32 4294901760, %v3960_v20  ;;  %v362_v7 = vsub.f32 %v3952_v62, %v6001_v28  ;;  %v6344_v33 = vmov 0.0   ;;  %v6345_v52 = vld [vmem:[#allocation2_spill] sm:$0xff]  ;;  %v6355_v28 = vld [vmem:[#allocation11_spill] sm:$0xff] }
  0x2c   :  { %334 = vmatpush1.msra.mxu1 %v333_v38  ;;  %173 = vmatmul.mubr.f32.vlgmr.msra.gmra.mxu0 %v172_v56  ;;  %v357_v45 = vand.u32 4294901760, %v356_v48  ;;  %v6346_v56 = vld [vmem:[#allocation17_spill] sm:$0xff]  ;;  %v6348_v48 = vld [vmem:[#allocation4_spill] sm:$0xff]  ;;  %v6364_v19 = vand.u32 4294901760, %v3559_v36 }
  0x2d   :  { %340 = vmatprep.subr.mxu1 %v339_v3  ;;  %416 = vmatpush1.msra.mxu0 %v3521_v24  ;;  %v368_v3 = vsub.f32 %v3960_v20, %v6000_v40  ;;  %v363_v38 = vand.u32 4294901760, %v362_v7  ;;  %v6349_v7 = vld [vmem:[#allocation5_spill] sm:$0xff]  ;;  %v6354_v40 = vld [vmem:[#allocation10_spill] sm:$0xff] }
  0x2e   :  { %346 = vmatpush1.msra.mxu1 %v345_v9  ;;  %419 = vmatprep.subr.mxu0 %v3527_v26 }
  0x2f   :  { %352 = vmatprep.subr.mxu1 %v351_v14  ;;  %539 = vmatprep.mubr.f32.mxu0 %v6344_v33  ;;  %v369_v9 = vand.u32 4294901760, %v368_v3  ;;  %v6347_v14 = vld [vmem:[#allocation3_spill] sm:$0xff] }
  0x30   :  { %422 = vmatpush1.msra.mxu0 %v3550_v32  ;;  %358 = vmatpush1.msra.mxu1 %v357_v45  ;;  %v6350_v45 = vld [vmem:[#allocation6_spill] sm:$0xff]  ;;  %v6351_v3 = vld [vmem:[#allocation7_spill] sm:$0xff] }
  0x31   :  { %425 = vmatprep.subr.mxu0 %v3559_v36  ;;  %364 = vmatprep.subr.mxu1 %v363_v38  ;;  %v6352_v38 = vld [vmem:[#allocation8_spill] sm:$0xff]  ;;  %v6369_v36 = vand.u32 4294901760, %v3915_v21 }
  0x32   :  { %428 = vmatpush1.msra.mxu0 %v3575_v41  ;;  %370 = vmatpush1.msra.mxu1 %v369_v9  ;;  %v6353_v9 = vld [vmem:[#allocation9_spill] sm:$0xff] }
  0x33   :  { %431 = vmatprep.subr.mxu0 %v3589_v46  ;;  %405 = vmatmul.mubr.f32.vlgmr.msra.gmra.mxu1 %v3895_v15  ;;  %v6358_v15 = vld [vmem:[#allocation14_spill] sm:$0xff] }
  0x34   :  { %434 = vmatpush1.msra.mxu0 %v3624_v60  ;;  %549 = vmatprep.subr.mxu1 %v3461_v4 }
  0x35   :  { %437 = vmatprep.subr.mxu0 %v3639_v1  ;;  %551 = vmatpush1.msra.mxu1 %v3463_v5 }
  0x36   :  { %440 = vmatpush1.msra.mxu0 %v3653_v13  ;;  %553 = vmatprep.subr.mxu1 %v3465_v6 }
  0x37   :  { %443 = vmatprep.subr.mxu0 %v3667_v44  ;;  %555 = vmatpush1.msra.mxu1 %v3476_v10 }
  0x38   :  { %446 = vmatpush1.msra.mxu0 %v3679_v53  ;;  %557 = vmatprep.subr.mxu1 %v3478_v11 }
  0x39   :  { %449 = vmatprep.subr.mxu0 %v3696_v22  ;;  %559 = vmatpush1.msra.mxu1 %v3480_v12 }
  0x3a   :  { %452 = vmatpush1.msra.mxu0 %v3708_v43  ;;  %561 = vmatprep.subr.mxu1 %v3492_v16 }
  0x3b   :  { %455 = vmatprep.subr.mxu0 %v3735_v50  ;;  %563 = vmatpush1.msra.mxu1 %v3494_v17 }
  0x3c   :  { %458 = vmatpush1.msra.mxu0 %v3751_v29  ;;  %565 = vmatprep.subr.mxu1 %v3496_v18 }
  0x3d   :  { %461 = vmatprep.subr.mxu0 %v3775_v34  ;;  %567 = vmatpush1.msra.mxu1 %v3518_v23 }
  0x3e   :  { %464 = vmatpush1.msra.mxu0 %v3791_v47  ;;  %569 = vmatprep.subr.mxu1 %v3524_v25 }
  0x3f   :  { %467 = vmatprep.subr.mxu0 %v3803_v61  ;;  %571 = vmatpush1.msra.mxu1 %v3547_v31 }
  0x40   :  { %470 = vmatpush1.msra.mxu0 %v3817_v39  ;;  %573 = vmatprep.subr.mxu1 %v6345_v52 }
  0x41   :  { %473 = vmatprep.subr.mxu0 %v6346_v56  ;;  %575 = vmatpush1.msra.mxu1 %v6347_v14 }
  0x42   :  { %476 = vmatpush1.msra.mxu0 %v3846_v2  ;;  %577 = vmatprep.subr.mxu1 %v6348_v48 }
  0x43   :  { %479 = vmatprep.subr.mxu0 %v3868_v0  ;;  %579 = vmatpush1.msra.mxu1 %v6349_v7 }
  0x44   :  { %482 = vmatpush1.msra.mxu0 %v3882_v63  ;;  %581 = vmatprep.subr.mxu1 %v6350_v45 }
  0x45   :  { %485 = vmatprep.subr.mxu0 %v3891_v51  ;;  %583 = vmatpush1.msra.mxu1 %v6351_v3 }
  0x46   :  { %488 = vmatpush1.msra.mxu0 %v3899_v37  ;;  %585 = vmatprep.subr.mxu1 %v6352_v38 }
  0x47   :  { %491 = vmatprep.subr.mxu0 %v3908_v42  ;;  %587 = vmatpush1.msra.mxu1 %v6353_v9 }
  0x48   :  { %494 = vmatpush1.msra.mxu0 %v3920_v49  ;;  %589 = vmatprep.subr.mxu1 %v6354_v40 }
  0x49   :  { %497 = vmatprep.subr.mxu0 %v3929_v55  ;;  %591 = vmatpush1.msra.mxu1 %v6355_v28  ;;  %v6359_v28 = vand.u32 4294901760, %v3521_v24  ;;  %v6366_v24 = vand.u32 4294901760, %v3575_v41  ;;  %v6371_v41 = vand.u32 4294901760, %v3653_v13  ;;  %v6390_v13 = vand.u32 4294901760, %v3929_v55 }
  0x4a   :  { %500 = vmatpush1.msra.mxu0 %v3942_v30  ;;  %593 = vmatprep.subr.mxu1 %v6356_v27  ;;  %v6360_v30 = vld [vmem:[#allocation15_spill] sm:$0xff]  ;;  %v6361_v27 = vand.u32 4294901760, %v3527_v26  ;;  %v6367_v26 = vand.u32 4294901760, %v3589_v46  ;;  %v6372_v46 = vand.u32 4294901760, %v3667_v44 }
  0x4b   :  { %503 = vmatprep.subr.mxu0 %v3952_v62  ;;  %595 = vmatpush1.msra.mxu1 %v3747_v8  ;;  %v6362_v8 = vld [vmem:[#allocation16_spill] sm:$0xff] }
  0x4c   :  { %506 = vmatpush1.msra.mxu0 %v3960_v20  ;;  %597 = vmatprep.subr.mxu1 %v3764_v35  ;;  %v6363_v20 = vand.u32 4294901760, %v3550_v32  ;;  %v6368_v32 = vand.u32 4294901760, %v3624_v60  ;;  %v6373_v60 = vand.u32 4294901760, %v3679_v53  ;;  %v6393_v53 = vld [vmem:[#allocation11_spill] sm:$0xff] }
  0x4d   :  { %542 = vmatmul.mubr.f32.vlgmr.msra.gmra.mxu0 %v3915_v21  ;;  %657 = vmatprep.subr.mxu0 %v6357_v58  ;;  %v6365_v58 = vld [vmem:[#allocation18_spill] sm:$0xff] }
  0x4e   :  { %599 = vmatpush1.msra.mxu1 %v6358_v15  ;;  %661 = vmatpush1.msra.mxu0 %v6359_v28 }
  0x4f   :  { %601 = vmatprep.subr.mxu1 %v6360_v30  ;;  %665 = vmatprep.subr.mxu0 %v6361_v27 }
  0x50   :  { %603 = vmatpush1.msra.mxu1 %v6362_v8  ;;  %669 = vmatpush1.msra.mxu0 %v6363_v20  ;;  %v6370_v20 = vand.u32 4294901760, %v3639_v1  ;;  %v6374_v1 = vand.u32 4294901760, %v3696_v22  ;;  %v6394_v22 = vand.u32 4294901760, %v3952_v62  ;;  %v952_v62 = vld [vmem:[%s5938_s3 + $0xc0] sm:$0xff] }
  0x51   :  { %605 = vmatprep.subr.mxu1 %v3820_v57  ;;  %673 = vmatprep.subr.mxu0 %v6364_v19 }
  0x52   :  { %607 = vmatpush1.msra.mxu1 %v6365_v58  ;;  %677 = vmatpush1.msra.mxu0 %v6366_v24 }
  0x53   :  { %609 = vmatprep.subr.mxu1 %v3859_v54  ;;  %681 = vmatprep.subr.mxu0 %v6367_v26 }
  0x54   :  { %611 = vmatpush1.msra.mxu1 %v3878_v59  ;;  %644 = vmatprep.mubr.f32.mxu1 %v6344_v33 }
  0x55   :  { %685 = vmatpush1.msra.mxu0 %v6368_v32  ;;  %648 = vmatmul.mubr.f32.vlgmr.msra.gmra.mxu1 %v6369_v36 }
  0x56   :  { %689 = vmatprep.subr.mxu0 %v6370_v20  ;;  %823 = vmatprep.subr.mxu1 %v3461_v4  ;;  %v6375_v4 = vand.u32 4294901760, %v3708_v43  ;;  %v6391_v43 = vld [vmem:[#allocation20_spill] sm:$0xff] }
  0x57   :  { %693 = vmatpush1.msra.mxu0 %v6371_v41  ;;  %825 = vmatpush1.msra.mxu1 %v3463_v5  ;;  %v6376_v5 = vand.u32 4294901760, %v3735_v50  ;;  %v6388_v50 = vand.u32 4294901760, %v3908_v42  ;;  %v6392_v44 = vand.u32 4294901760, %v6391_v43  ;;  %v953_v42 = vld [vmem:[%s5938_s3 + $0xc8] sm:$0xff] }
  0x58   :  { %697 = vmatprep.subr.mxu0 %v6372_v46  ;;  %827 = vmatprep.subr.mxu1 %v3465_v6  ;;  %v6377_v6 = vand.u32 4294901760, %v3751_v29  ;;  %v6395_v29 = vld [vmem:[#allocation12_spill] sm:$0xff]  ;;  %v951_v46 = vld [vmem:[%s5938_s3 + $0xb8] sm:$0xff] }
  0x59   :  { %701 = vmatpush1.msra.mxu0 %v6373_v60  ;;  %829 = vmatpush1.msra.mxu1 %v3476_v10  ;;  %v6378_v10 = vand.u32 4294901760, %v3775_v34  ;;  %v6387_v34 = vand.u32 4294901760, %v3899_v37  ;;  %v954_v37 = vld [vmem:[%s5938_s3 + $0xd0] sm:$0xff] }
  0x5a   :  { %705 = vmatprep.subr.mxu0 %v6374_v1  ;;  %831 = vmatprep.subr.mxu1 %v3478_v11  ;;  %v6379_v11 = vand.u32 4294901760, %v3791_v47  ;;  %v6396_v47 = vld [vmem:[#allocation21_spill] sm:$0xff]  ;;  %v4176_v28 = vand.u32 4294901760, %v954_v37 }
  0x5b   :  { %709 = vmatpush1.msra.mxu0 %v6375_v4  ;;  %833 = vmatpush1.msra.mxu1 %v3480_v12  ;;  %v6380_v12 = vand.u32 4294901760, %v3803_v61  ;;  %v6389_v61 = vand.u32 4294901760, %v3920_v49  ;;  %v6397_v49 = vand.u32 4294901760, %v6396_v47 }
  0x5c   :  { %713 = vmatprep.subr.mxu0 %v6376_v5  ;;  %835 = vmatprep.subr.mxu1 %v3492_v16  ;;  %v6381_v16 = vand.u32 4294901760, %v3817_v39  ;;  %v6398_v39 = vld [vmem:[#allocation13_spill] sm:$0xff] }
  0x5d   :  { %717 = vmatpush1.msra.mxu0 %v6377_v6  ;;  %837 = vmatpush1.msra.mxu1 %v3494_v17  ;;  %v6382_v17 = vand.u32 4294901760, %v6346_v56  ;;  %v950_v6 = vld [vmem:[%s5938_s3 + $0xb0] sm:$0xff] }
  0x5e   :  { %721 = vmatprep.subr.mxu0 %v6378_v10  ;;  %839 = vmatprep.subr.mxu1 %v3496_v18  ;;  %v6383_v18 = vand.u32 4294901760, %v3846_v2  ;;  %v6399_v2 = vld [vmem:[#allocation19_spill] sm:$0xff]  ;;  %v4269_v43 = vand.u32 4294901760, %v950_v6 }
  0x5f   :  { %725 = vmatpush1.msra.mxu0 %v6379_v11  ;;  %841 = vmatpush1.msra.mxu1 %v3518_v23  ;;  %v6384_v23 = vand.u32 4294901760, %v3868_v0  ;;  %v958_v0 = vld [vmem:[%s5938_s3 + $0xf0] sm:$0xff]  ;;  %v949_v10 = vld [vmem:[%s5938_s3 + $0xa8] sm:$0xff]  ;;  %v948_v11 = vld [vmem:[%s5938_s3 + $0xa0] sm:$0xff] }
  0x60   :  { %729 = vmatprep.subr.mxu0 %v6380_v12  ;;  %843 = vmatprep.subr.mxu1 %v3524_v25  ;;  %v6385_v25 = vand.u32 4294901760, %v3882_v63  ;;  %v959_v63 = vld [vmem:[%s5938_s3 + $0xf8] sm:$0xff] }
  0x61   :  { %733 = vmatpush1.msra.mxu0 %v6381_v16  ;;  %845 = vmatpush1.msra.mxu1 %v3547_v31  ;;  %v6386_v31 = vand.u32 4294901760, %v3891_v51 }
  0x62   :  { %737 = vmatprep.subr.mxu0 %v6382_v17  ;;  %847 = vmatprep.subr.mxu1 %v6345_v52  ;;  %v4193_v52 = vand.u32 4294901760, %v952_v62 }
  0x63   :  { %741 = vmatpush1.msra.mxu0 %v6383_v18  ;;  %849 = vmatpush1.msra.mxu1 %v6347_v14 }
  0x64   :  { %745 = vmatprep.subr.mxu0 %v6384_v23  ;;  %851 = vmatprep.subr.mxu1 %v6348_v48  ;;  %v4201_v48 = vsub.f32 %v954_v37, %v4176_v28  ;;  %v947_v23 = vld [vmem:[%s5938_s3 + $0x98] sm:$0xff] }
  0x65   :  { %749 = vmatpush1.msra.mxu0 %v6385_v25  ;;  %853 = vmatpush1.msra.mxu1 %v6349_v7  ;;  %v946_v25 = vld [vmem:[%s5938_s3 + $0x90] sm:$0xff] }
  0x66   :  { %753 = vmatprep.subr.mxu0 %v6386_v31  ;;  %855 = vmatprep.subr.mxu1 %v6350_v45  ;;  %v6019_v24 = vand.u32 4294901760, %v4201_v48  ;;  %v945_v31 = vld [vmem:[%s5938_s3 + $0x88] sm:$0xff]  ;;  %v4280_v47 = vand.u32 4294901760, %v946_v25 }
  0x67   :  { %757 = vmatpush1.msra.mxu0 %v6387_v34  ;;  %857 = vmatpush1.msra.mxu1 %v6351_v3 }
  0x68   :  { %761 = vmatprep.subr.mxu0 %v6388_v50  ;;  %859 = vmatprep.subr.mxu1 %v6352_v38  ;;  %v1182_v4 = vsub.f32 %v4201_v48, %v6019_v24 }
  0x69   :  { %765 = vmatpush1.msra.mxu0 %v6389_v61  ;;  %861 = vmatpush1.msra.mxu1 %v6353_v9  ;;  %v4211_v9 = vsub.f32 %v952_v62, %v4193_v52  ;;  %v4267_v61 = vand.u32 4294901760, %v951_v46 }
  0x6a   :  { %769 = vmatprep.subr.mxu0 %v6390_v13  ;;  %863 = vmatprep.subr.mxu1 %v6354_v40  ;;  %v1183_v50 = vand.u32 4294901760, %v1182_v4 }
  0x6b   :  { %773 = vmatpush1.msra.mxu0 %v6392_v44  ;;  %865 = vmatpush1.msra.mxu1 %v6393_v53  ;;  %v6017_v41 = vand.u32 4294901760, %v4211_v9  ;;  %v4271_v44 = vand.u32 4294901760, %v949_v10  ;;  %v4273_v53 = vand.u32 4294901760, %v948_v11 }
  0x6c   :  { %777 = vmatprep.subr.mxu0 %v6394_v22  ;;  %867 = vmatprep.subr.mxu1 %v6395_v29  ;;  %v4276_v22 = vsub.f32 %v951_v46, %v4267_v61  ;;  %v4278_v29 = vand.u32 4294901760, %v947_v23 }
  0x6d   :  { %781 = vmatpush1.msra.mxu0 %v6397_v49  ;;  %814 = vmatprep.mubr.f32.mxu0 %v6344_v33  ;;  %v1194_v18 = vsub.f32 %v4211_v9, %v6017_v41  ;;  %v4282_v49 = vand.u32 4294901760, %v945_v31 }
  0x6e   :  { %869 = vmatpush1.msra.mxu1 %v6398_v39  ;;  %816 = vmatmul.mubr.f32.vlgmr.msra.gmra.mxu0 %v6399_v2 }
  0x6f   :  { %871 = vmatprep.subr.mxu1 %v3764_v35  ;;  %918 = vmatprep.mubr.f32.mxu1 %v6344_v33  ;;  %v4144_v35 = vand.u32 4294901760, %v959_v63  ;;  %v1195_v39 = vand.u32 4294901760, %v1194_v18  ;;  %v4303_v37 = vsub.f32 %v945_v31, %v4282_v49  ;;  %v940_v31 = vld [vmem:[%s5938_s3 + $0x60] sm:$0xff] }
  0x70   :  { %873 = vmatpush1.msra.mxu1 %v6358_v15  ;;  %v955_v15 = vld [vmem:[%s5938_s3 + $0xd8] sm:$0xff] }
  0x71   :  { %875 = vmatprep.subr.mxu1 %v6360_v30  ;;  %6400 = vst [vmem:[#allocation2_spill] sm:$0xff] %v4144_v35  ;;  %v4172_v21 = vsub.f32 %v959_v63, %v4144_v35  ;;  %v4174_v55 = vand.u32 4294901760, %v955_v15  ;;  %v4178_v30 = vand.u32 4294901760, %v953_v42  ;;  %1005 = vmatprep.subr.mxu0 %v4144_v35  ;;  %v4289_v63 = vsub.f32 %v949_v10, %v4271_v44 }
  0x72   :  { %877 = vmatpush1.msra.mxu1 %v6362_v8  ;;  %v957_v8 = vld [vmem:[%s5938_s3 + $0xe8] sm:$0xff] }
  0x73   :  { %879 = vmatprep.subr.mxu1 %v3820_v57  ;;  %v4156_v57 = vand.u32 4294901760, %v958_v0  ;;  %v4158_v51 = vand.u32 4294901760, %v957_v8  ;;  %6401 = vst [vmem:[#allocation17_spill] sm:$0xff] %v4172_v21  ;;  %v6030_v56 = vand.u32 4294901760, %v4172_v21  ;;  %v4198_v14 = vsub.f32 %v955_v15, %v4174_v55 }
  0x74   :  { %881 = vmatpush1.msra.mxu1 %v6365_v58  ;;  %v4204_v7 = vsub.f32 %v953_v42, %v4178_v30  ;;  %v4300_v15 = vsub.f32 %v946_v25, %v4280_v47  ;;  %v944_v42 = vld [vmem:[%s5938_s3 + $0x80] sm:$0xff]  ;;  %v941_v25 = vld [vmem:[%s5938_s3 + $0x68] sm:$0xff] }
  0x75   :  { %883 = vmatprep.subr.mxu1 %v3859_v54  ;;  %v956_v54 = vld [vmem:[%s5938_s3 + $0xe0] sm:$0xff]  ;;  %v4185_v27 = vsub.f32 %v958_v0, %v4156_v57  ;;  %v4188_v40 = vsub.f32 %v957_v8, %v4158_v51  ;;  %1007 = vmatpush1.msra.mxu0 %v4156_v57  ;;  %v1152_v19 = vsub.f32 %v4172_v21, %v6030_v56  ;;  %v6021_v58 = vand.u32 4294901760, %v4198_v14 }
  0x76   :  { %885 = vmatpush1.msra.mxu1 %v3878_v59  ;;  %v4160_v59 = vand.u32 4294901760, %v956_v54  ;;  %1009 = vmatprep.subr.mxu0 %v4158_v51  ;;  %v6018_v26 = vand.u32 4294901760, %v4204_v7  ;;  %v4292_v0 = vsub.f32 %v948_v11, %v4273_v53  ;;  %v6016_v8 = vand.u32 4294901760, %v4276_v22  ;;  %v943_v11 = vld [vmem:[%s5938_s3 + $0x78] sm:$0xff] }
  0x77   :  { %920 = vmatmul.mubr.f32.vlgmr.msra.gmra.mxu1 %v6399_v2  ;;  %v6028_v45 = vand.u32 4294901760, %v4185_v27  ;;  %v6026_v3 = vand.u32 4294901760, %v4188_v40  ;;  %v1153_v60 = vand.u32 4294901760, %v1152_v19  ;;  %v1176_v1 = vsub.f32 %v4198_v14, %v6021_v58 }
  0x78   :  { %v4191_v33 = vsub.f32 %v956_v54, %v4160_v59  ;;  %1011 = vmatpush1.msra.mxu0 %v4160_v59  ;;  %v1188_v5 = vsub.f32 %v4204_v7, %v6018_v26  ;;  %v4286_v2 = vsub.f32 %v950_v6, %v4269_v43  ;;  %v4297_v54 = vsub.f32 %v947_v23, %v4278_v29  ;;  %v942_v23 = vld [vmem:[%s5938_s3 + $0x70] sm:$0xff] }
  0x79   :  { %1013 = vmatprep.subr.mxu0 %v4174_v55  ;;  %v1158_v32 = vsub.f32 %v4185_v27, %v6028_v45  ;;  %v1164_v36 = vsub.f32 %v4188_v40, %v6026_v3  ;;  %1154 = vmatprep.subr.mxu1 %v1153_v60  ;;  %v1177_v34 = vand.u32 4294901760, %v1176_v1  ;;  %v6013_v19 = vand.u32 4294901760, %v4289_v63  ;;  %v933_v3 = vld [vmem:[%s5938_s3 + $0x28] sm:$0xff] }
  0x7a   :  { %v6022_v38 = vand.u32 4294901760, %v4191_v33  ;;  %1015 = vmatpush1.msra.mxu0 %v4176_v28  ;;  %v1189_v13 = vand.u32 4294901760, %v1188_v5  ;;  %v6015_v62 = vand.u32 4294901760, %v4286_v2  ;;  %v6011_v46 = vand.u32 4294901760, %v4297_v54 }
  0x7b   :  { %1017 = vmatprep.subr.mxu0 %v4178_v30  ;;  %v1159_v12 = vand.u32 4294901760, %v1158_v32  ;;  %v1165_v16 = vand.u32 4294901760, %v1164_v36  ;;  %v6012_v32 = vand.u32 4294901760, %v4292_v0  ;;  %v4312_v36 = vand.u32 4294901760, %v944_v42 }
  0x7c   :  { %v1170_v20 = vsub.f32 %v4191_v33, %v6022_v38  ;;  %1019 = vmatpush1.msra.mxu0 %v4193_v52  ;;  %v6010_v60 = vand.u32 4294901760, %v4300_v15  ;;  %v6009_v1 = vand.u32 4294901760, %v4303_v37  ;;  %v1206_v4 = vsub.f32 %v4286_v2, %v6015_v62  ;;  %v935_v38 = vld [vmem:[%s5938_s3 + $0x38] sm:$0xff] }
  0x7d   :  { %1160 = vmatpush1.msra.mxu1 %v1159_v12  ;;  %1021 = vmatprep.subr.mxu0 %v4267_v61  ;;  %v1212_v5 = vsub.f32 %v4289_v63, %v6013_v19  ;;  %v1218_v6 = vsub.f32 %v4292_v0, %v6012_v32  ;;  %v4332_v10 = vsub.f32 %v944_v42, %v4312_v36  ;;  %v939_v42 = vld [vmem:[%s5938_s3 + $0x58] sm:$0xff]  ;;  %v4372_v32 = vand.u32 4294901760, %v941_v25 }
  0x7e   :  { %v1171_v17 = vand.u32 4294901760, %v1170_v20  ;;  %1166 = vmatprep.subr.mxu1 %v1165_v16  ;;  %1023 = vmatpush1.msra.mxu0 %v4269_v43  ;;  %v1200_v20 = vsub.f32 %v4276_v22, %v6016_v8  ;;  %v1224_v16 = vsub.f32 %v4297_v54, %v6011_v46  ;;  %v1236_v18 = vsub.f32 %v4303_v37, %v6009_v1 }
  0x7f   :  { %1025 = vmatprep.subr.mxu0 %v4271_v44  ;;  %6402 = vst [vmem:[#allocation3_spill] sm:$0xff] %v4332_v10  ;;  %v4361_v46 = vand.u32 4294901760, %v943_v11 }
  0x80   :  { %1172 = vmatpush1.msra.mxu1 %v1171_v17  ;;  %1027 = vmatpush1.msra.mxu0 %v4273_v53  ;;  %v1201_v12 = vand.u32 4294901760, %v1200_v20  ;;  %v1230_v17 = vsub.f32 %v4300_v15, %v6010_v60  ;;  %v1225_v20 = vand.u32 4294901760, %v1224_v16  ;;  %v1237_v60 = vand.u32 4294901760, %v1236_v18  ;;  %v937_v16 = vld [vmem:[%s5938_s3 + $0x48] sm:$0xff] }
  0x81   :  { %1178 = vmatprep.subr.mxu1 %v1177_v34  ;;  %1029 = vmatprep.subr.mxu0 %v4278_v29  ;;  %v1207_v34 = vand.u32 4294901760, %v1206_v4  ;;  %v938_v4 = vld [vmem:[%s5938_s3 + $0x50] sm:$0xff]  ;;  %v4382_v18 = vand.u32 4294901760, %v939_v42  ;;  %v4386_v19 = vand.u32 4294901760, %v937_v16 }
  0x82   :  { %1184 = vmatpush1.msra.mxu1 %v1183_v50  ;;  %1031 = vmatpush1.msra.mxu0 %v4280_v47  ;;  %v1213_v50 = vand.u32 4294901760, %v1212_v5  ;;  %v1231_v1 = vand.u32 4294901760, %v1230_v17  ;;  %v4380_v17 = vsub.f32 %v943_v11, %v4361_v46  ;;  %v4396_v11 = vsub.f32 %v941_v25, %v4372_v32 }
  0x83   :  { %1190 = vmatprep.subr.mxu1 %v1189_v13  ;;  %v1219_v13 = vand.u32 4294901760, %v1218_v6  ;;  %1033 = vmatprep.subr.mxu0 %v4282_v49  ;;  %v4370_v6 = vand.u32 4294901760, %v942_v23  ;;  %v4404_v26 = vsub.f32 %v939_v42, %v4382_v18 }
  0x84   :  { %1196 = vmatpush1.msra.mxu1 %v1195_v39  ;;  %v6014_v39 = vand.u32 4294901760, %v4332_v10  ;;  %1035 = vmatpush1.msra.mxu0 %v4312_v36  ;;  %6403 = vst [vmem:[#allocation4_spill] sm:$0xff] %v4380_v17  ;;  %6405 = vst [vmem:[#allocation6_spill] sm:$0xff] %v4396_v11  ;;  %v6020_v41 = vand.u32 4294901760, %v4380_v17 }
  0x85   :  { %1202 = vmatprep.subr.mxu1 %v1201_v12  ;;  %v4374_v12 = vand.u32 4294901760, %v940_v31  ;;  %1037 = vmatprep.subr.mxu0 %v4361_v46  ;;  %v4393_v8 = vsub.f32 %v942_v23, %v4370_v6  ;;  %6407 = vst [vmem:[#allocation8_spill] sm:$0xff] %v4404_v26  ;;  %v4410_v23 = vsub.f32 %v937_v16, %v4386_v19 }
  0x86   :  { %1208 = vmatpush1.msra.mxu1 %v1207_v34  ;;  %v1242_v5 = vsub.f32 %v4332_v10, %v6014_v39  ;;  %v4384_v34 = vand.u32 4294901760, %v938_v4  ;;  %v936_v39 = vld [vmem:[%s5938_s3 + $0x40] sm:$0xff]  ;;  %1039 = vmatpush1.msra.mxu0 %v4370_v6  ;;  %v1248_v42 = vsub.f32 %v4380_v17, %v6020_v41 }
  0x87   :  { %1214 = vmatprep.subr.mxu1 %v1213_v50  ;;  %6404 = vst [vmem:[#allocation5_spill] sm:$0xff] %v4393_v8  ;;  %v4399_v50 = vsub.f32 %v940_v31, %v4374_v12  ;;  %6409 = vst [vmem:[#allocation10_spill] sm:$0xff] %v4410_v23  ;;  %1041 = vmatprep.subr.mxu0 %v4372_v32  ;;  %v6023_v25 = vand.u32 4294901760, %v4393_v8  ;;  %v6024_v31 = vand.u32 4294901760, %v4396_v11 }
  0x88   :  { %1220 = vmatpush1.msra.mxu1 %v1219_v13  ;;  %v1243_v62 = vand.u32 4294901760, %v1242_v5  ;;  %v4407_v13 = vsub.f32 %v938_v4, %v4384_v34  ;;  %v4416_v5 = vand.u32 4294901760, %v936_v39  ;;  %1043 = vmatpush1.msra.mxu0 %v4374_v12  ;;  %v6027_v4 = vand.u32 4294901760, %v4404_v26 }
  0x89   :  { %6406 = vst [vmem:[#allocation7_spill] sm:$0xff] %v4399_v50  ;;  %1226 = vmatprep.subr.mxu1 %v1225_v20  ;;  %v6025_v20 = vand.u32 4294901760, %v4399_v50  ;;  %1045 = vmatprep.subr.mxu0 %v4382_v18  ;;  %v1254_v24 = vsub.f32 %v4393_v8, %v6023_v25  ;;  %v1249_v25 = vand.u32 4294901760, %v1248_v42  ;;  %v932_v42 = vld [vmem:[%s5938_s3 + $0x20] sm:$0xff]  ;;  %v4471_v8 = vand.u32 4294901760, %v935_v38 }
  0x8a   :  { %6408 = vst [vmem:[#allocation9_spill] sm:$0xff] %v4407_v13  ;;  %1232 = vmatpush1.msra.mxu1 %v1231_v1  ;;  %6410 = vst [vmem:[#allocation14_spill] sm:$0xff] %v4416_v5  ;;  %v6029_v16 = vand.u32 4294901760, %v4407_v13  ;;  %v6033_v1 = vand.u32 4294901760, %v4410_v23  ;;  %v4436_v58 = vsub.f32 %v936_v39, %v4416_v5  ;;  %1047 = vmatpush1.msra.mxu0 %v4384_v34  ;;  %v4481_v17 = vand.u32 4294901760, %v932_v42 }
  0x8b   :  { %1238 = vmatprep.subr.mxu1 %v1237_v60  ;;  %v1260_v60 = vsub.f32 %v4396_v11, %v6024_v31  ;;  %v1266_v41 = vsub.f32 %v4399_v50, %v6025_v20  ;;  %v1272_v31 = vsub.f32 %v4404_v26, %v6027_v4  ;;  %v931_v4 = vld [vmem:[%s5938_s3 + $0x18] sm:$0xff]  ;;  %v1255_v45 = vand.u32 4294901760, %v1254_v24  ;;  %1049 = vmatprep.subr.mxu0 %v4386_v19 }
  0x8c   :  { %1244 = vmatpush1.msra.mxu1 %v1243_v62  ;;  %6411 = vst [vmem:[#allocation15_spill] sm:$0xff] %v4436_v58  ;;  %v934_v62 = vld [vmem:[%s5938_s3 + $0x30] sm:$0xff]  ;;  %v1278_v20 = vsub.f32 %v4407_v13, %v6029_v16  ;;  %v1284_v39 = vsub.f32 %v4410_v23, %v6033_v1  ;;  %v6046_v13 = vand.u32 4294901760, %v4436_v58  ;;  %v929_v23 = vld [vmem:[%s5938_s3 + $0x8] sm:$0xff]  ;;  %6412 = vst [vmem:[#allocation16_spill] sm:$0xff] %v4471_v8  ;;  %1051 = vmatpush1.msra.mxu0 %v4416_v5 }
  0x8d   :  { %v1261_v16 = vand.u32 4294901760, %v1260_v60  ;;  %v1267_v56 = vand.u32 4294901760, %v1266_v41  ;;  %v930_v1 = vld [vmem:[%s5938_s3 + $0x10] sm:$0xff]  ;;  %1250 = vmatprep.subr.mxu1 %v1249_v25  ;;  %v1273_v26 = vand.u32 4294901760, %v1272_v31  ;;  %v4477_v41 = vand.u32 4294901760, %v934_v62  ;;  %6415 = vst [vmem:[#allocation11_spill] sm:$0xff] %v4481_v17  ;;  %1053 = vmatprep.subr.mxu0 %v4471_v8 }
  0x8e   :  { %v1279_v50 = vand.u32 4294901760, %v1278_v20  ;;  %v1285_v11 = vand.u32 4294901760, %v1284_v39  ;;  %1256 = vmatpush1.msra.mxu1 %v1255_v45  ;;  %v1290_v24 = vsub.f32 %v4436_v58, %v6046_v13  ;;  %v4479_v60 = vand.u32 4294901760, %v933_v3  ;;  %v928_v45 = vld [vmem:[%s5938_s3] sm:$0xff] }
  0x8f   :  { %6413 = vst [vmem:[#allocation18_spill] sm:$0xff] %v4477_v41  ;;  %1262 = vmatprep.subr.mxu1 %v1261_v16  ;;  %v4484_v25 = vsub.f32 %v935_v38, %v4471_v8  ;;  %v4486_v31 = vand.u32 4294901760, %v931_v4  ;;  %v4488_v20 = vand.u32 4294901760, %v930_v1  ;;  %v4490_v39 = vand.u32 4294901760, %v929_v23  ;;  %1055 = vmatpush1.msra.mxu0 %v4477_v41 }
  0x90   :  { %6414 = vst [vmem:[#allocation20_spill] sm:$0xff] %v4479_v60  ;;  %1268 = vmatpush1.msra.mxu1 %v1267_v56  ;;  %v1291_v13 = vand.u32 4294901760, %v1290_v24  ;;  %v4497_v58 = vsub.f32 %v934_v62, %v4477_v41  ;;  %v4500_v38 = vsub.f32 %v933_v3, %v4479_v60  ;;  %v4503_v16 = vsub.f32 %v932_v42, %v4481_v17 }
  0x91   :  { %6416 = vst [vmem:[#allocation12_spill] sm:$0xff] %v4484_v25  ;;  %6417 = vst [vmem:[#allocation21_spill] sm:$0xff] %v4486_v31  ;;  %1274 = vmatprep.subr.mxu1 %v1273_v26  ;;  %v6055_v5 = vand.u32 4294901760, %v4484_v25  ;;  %v4508_v10 = vsub.f32 %v931_v4, %v4486_v31  ;;  %v4511_v56 = vsub.f32 %v930_v1, %v4488_v20  ;;  %1057 = vmatprep.subr.mxu0 %v4479_v60 }
  0x92   :  { %6418 = vst [vmem:[#allocation13_spill] sm:$0xff] %v4488_v20  ;;  %6419 = vst [vmem:[#allocation19_spill] sm:$0xff] %v4490_v39  ;;  %v4514_v62 = vsub.f32 %v929_v23, %v4490_v39  ;;  %1280 = vmatpush1.msra.mxu1 %v1279_v50  ;;  %v6056_v3 = vand.u32 4294901760, %v4497_v58  ;;  %v6057_v42 = vand.u32 4294901760, %v4500_v38  ;;  %v4520_v24 = vand.u32 4294901760, %v928_v45  ;;  %1059 = vmatpush1.msra.mxu0 %v4481_v17  ;;  %v991_v50 = vld [vmem:[%s5938_s3 + $0x1f8] sm:$0xff] }
  0x93   :  { %6420 = vst [vmem:[#allocation22_spill] sm:$0xff] %v4497_v58  ;;  %6421 = vst [vmem:[#allocation23_spill] sm:$0xff] %v4500_v38  ;;  %1286 = vmatprep.subr.mxu1 %v1285_v11  ;;  %v1296_v4 = vsub.f32 %v4484_v25, %v6055_v5  ;;  %1061 = vmatprep.subr.mxu0 %v4486_v31  ;;  %v6427_v17 = vand.u32 4294901760, %v4503_v16  ;;  %v6429_v1 = vand.u32 4294901760, %v4508_v10 }
  0x94   :  { %6422 = vst [vmem:[#allocation24_spill] sm:$0xff] %v4503_v16  ;;  %6423 = vst [vmem:[#allocation25_spill] sm:$0xff] %v4508_v10  ;;  %1292 = vmatpush1.msra.mxu1 %v1291_v13  ;;  %v1302_v26 = vsub.f32 %v4497_v58, %v6056_v3  ;;  %v1308_v11 = vsub.f32 %v4500_v38, %v6057_v42  ;;  %v4540_v23 = vsub.f32 %v928_v45, %v4520_v24  ;;  %v990_v13 = vld [vmem:[%s5938_s3 + $0x1f0] sm:$0xff]  ;;  %v989_v58 = vld [vmem:[%s5938_s3 + $0x1e8] sm:$0xff] }
  0x95   :  { %6424 = vst [vmem:[#allocation26_spill] sm:$0xff] %v4511_v56  ;;  %6425 = vst [vmem:[#allocation27_spill] sm:$0xff] %v4514_v62  ;;  %v1314_v5 = vsub.f32 %v4503_v16, %v6427_v17  ;;  %v1297_v3 = vand.u32 4294901760, %v1296_v4  ;;  %v1320_v42 = vsub.f32 %v4508_v10, %v6429_v1  ;;  %v6430_v38 = vand.u32 4294901760, %v4511_v56  ;;  %v988_v4 = vld [vmem:[%s5938_s3 + $0x1e0] sm:$0xff]  ;;  %v987_v1 = vld [vmem:[%s5938_s3 + $0x1d8] sm:$0xff]  ;;  %1063 = vmatpush1.msra.mxu0 %v4488_v20 }
  0x96   :  { %6426 = vst [vmem:[#allocation28_spill] sm:$0xff] %v4520_v24  ;;  %6428 = vst [vmem:[#allocation29_spill] sm:$0xff] %v4540_v23  ;;  %v6431_v45 = vand.u32 4294901760, %v4514_v62  ;;  %v1303_v10 = vand.u32 4294901760, %v1302_v26  ;;  %v6082_v25 = vand.u32 4294901760, %v4540_v23  ;;  %1065 = vmatprep.subr.mxu0 %v4490_v39  ;;  %v4575_v20 = vand.u32 4294901760, %v991_v50 }
  0x97   :  { %v1326_v17 = vsub.f32 %v4511_v56, %v6430_v38  ;;  %v1309_v38 = vand.u32 4294901760, %v1308_v11  ;;  %v1315_v56 = vand.u32 4294901760, %v1314_v5  ;;  %1298 = vmatprep.subr.mxu1 %v1297_v3  ;;  %v1321_v31 = vand.u32 4294901760, %v1320_v42  ;;  %1067 = vmatpush1.msra.mxu0 %v4520_v24 }
  0x98   :  { %v1332_v16 = vsub.f32 %v4514_v62, %v6431_v45  ;;  %v986_v45 = vld [vmem:[%s5938_s3 + $0x1d0] sm:$0xff]  ;;  %v985_v62 = vld [vmem:[%s5938_s3 + $0x1c8] sm:$0xff]  ;;  %6432 = vst [vmem:[#allocation30_spill] sm:$0xff] %v4575_v20  ;;  %1304 = vmatpush1.msra.mxu1 %v1303_v10  ;;  %v1338_v5 = vsub.f32 %v4540_v23, %v6082_v25  ;;  %v4581_v26 = vand.u32 4294901760, %v990_v13  ;;  %v4583_v11 = vand.u32 4294901760, %v989_v58  ;;  %v984_v10 = vld [vmem:[%s5938_s3 + $0x1c0] sm:$0xff]  ;;  %1069 = vmatprep.subr.mxu0 %v4575_v20 }
  0x99   :  { %v1327_v60 = vand.u32 4294901760, %v1326_v17  ;;  %v4585_v39 = vand.u32 4294901760, %v988_v4  ;;  %1310 = vmatprep.subr.mxu1 %v1309_v38  ;;  %v4588_v3 = vsub.f32 %v991_v50, %v4575_v20  ;;  %v4592_v42 = vand.u32 4294901760, %v986_v45 }
  0x9a   :  { %v1333_v41 = vand.u32 4294901760, %v1332_v16  ;;  %6433 = vst [vmem:[#allocation31_spill] sm:$0xff] %v4581_v26  ;;  %6434 = vst [vmem:[#allocation32_spill] sm:$0xff] %v4583_v11  ;;  %v4590_v16 = vand.u32 4294901760, %v987_v1  ;;  %v4594_v17 = vand.u32 4294901760, %v985_v62  ;;  %1316 = vmatpush1.msra.mxu1 %v1315_v56  ;;  %v1339_v25 = vand.u32 4294901760, %v1338_v5  ;;  %1071 = vmatpush2.msra.mxu0 %v4581_v26 }
  0x9b   :  { %6435 = vst [vmem:[#allocation33_spill] sm:$0xff] %v4585_v39  ;;  %6436 = vst [vmem:[#allocation34_spill] sm:$0xff] %v4588_v3  ;;  %v4601_v23 = vsub.f32 %v990_v13, %v4581_v26  ;;  %v4604_v50 = vsub.f32 %v989_v58, %v4583_v11  ;;  %v4607_v38 = vsub.f32 %v988_v4, %v4585_v39  ;;  %1322 = vmatprep.subr.mxu1 %v1321_v31 }
  0x9c   :  { %6437 = vst [vmem:[#allocation35_spill] sm:$0xff] %v4590_v16  ;;  %6438 = vst [vmem:[#allocation36_spill] sm:$0xff] %v4592_v42  ;;  %v6091_v24 = vand.u32 4294901760, %v4588_v3  ;;  %v4612_v8 = vsub.f32 %v987_v1, %v4590_v16  ;;  %v4615_v56 = vsub.f32 %v986_v45, %v4592_v42  ;;  %v4618_v13 = vsub.f32 %v985_v62, %v4594_v17 }
  0x9d   :  { %6439 = vst [vmem:[#allocation37_spill] sm:$0xff] %v4594_v17  ;;  %6440 = vst [vmem:[#allocation38_spill] sm:$0xff] %v4601_v23  ;;  %1073 = vmatprep.subr.mxu0 %v4583_v11  ;;  %1328 = vmatpush1.msra.mxu1 %v1327_v60  ;;  %v6092_v58 = vand.u32 4294901760, %v4601_v23  ;;  %v6093_v4 = vand.u32 4294901760, %v4604_v50  ;;  %v4624_v5 = vand.u32 4294901760, %v984_v10  ;;  %v983_v60 = vld [vmem:[%s5938_s3 + $0x1b8] sm:$0xff] }
  0x9e   :  { %6441 = vst [vmem:[#allocation39_spill] sm:$0xff] %v4604_v50  ;;  %6442 = vst [vmem:[#allocation40_spill] sm:$0xff] %v4607_v38  ;;  %1075 = vmatpush2.msra.mxu0 %v4585_v39  ;;  %1334 = vmatprep.subr.mxu1 %v1333_v41  ;;  %v1344_v1 = vsub.f32 %v4588_v3, %v6091_v24  ;;  %v6447_v39 = vand.u32 4294901760, %v4607_v38  ;;  %v6449_v45 = vand.u32 4294901760, %v4612_v8 }
  0x9f   :  { %6443 = vst [vmem:[#allocation41_spill] sm:$0xff] %v4612_v8  ;;  %6444 = vst [vmem:[#allocation42_spill] sm:$0xff] %v4615_v56  ;;  %1077 = vmatprep.subr.mxu0 %v4590_v16  ;;  %1340 = vmatpush1.msra.mxu1 %v1339_v25  ;;  %v1350_v31 = vsub.f32 %v4601_v23, %v6092_v58  ;;  %v1356_v41 = vsub.f32 %v4604_v50, %v6093_v4  ;;  %v982_v25 = vld [vmem:[%s5938_s3 + $0x1b0] sm:$0xff]  ;;  %v6450_v50 = vand.u32 4294901760, %v4615_v56  ;;  %v981_v23 = vld [vmem:[%s5938_s3 + $0x1a8] sm:$0xff] }
  0xa0   :  { %6445 = vst [vmem:[#allocation43_spill] sm:$0xff] %v4618_v13  ;;  %6446 = vst [vmem:[#allocation44_spill] sm:$0xff] %v4624_v5  ;;  %v1362_v24 = vsub.f32 %v4607_v38, %v6447_v39  ;;  %v4644_v62 = vsub.f32 %v984_v10, %v4624_v5  ;;  %v1345_v58 = vand.u32 4294901760, %v1344_v1  ;;  %v1368_v4 = vsub.f32 %v4612_v8, %v6449_v45  ;;  %v980_v1 = vld [vmem:[%s5938_s3 + $0x1a0] sm:$0xff]  ;;  %v979_v45 = vld [vmem:[%s5938_s3 + $0x198] sm:$0xff] }
  0xa1   :  { %v1374_v39 = vsub.f32 %v4615_v56, %v6450_v50  ;;  %v6451_v10 = vand.u32 4294901760, %v4618_v13  ;;  %1079 = vmatpush2.msra.mxu0 %v4592_v42  ;;  %v1351_v8 = vand.u32 4294901760, %v1350_v31  ;;  %v1357_v50 = vand.u32 4294901760, %v1356_v41 }
  0xa2   :  { %6448 = vst [vmem:[#allocation45_spill] sm:$0xff] %v4644_v62  ;;  %v1363_v56 = vand.u32 4294901760, %v1362_v24  ;;  %v6118_v3 = vand.u32 4294901760, %v4644_v62  ;;  %1081 = vmatprep.subr.mxu0 %v4594_v17  ;;  %1346 = vmatprep.subr.mxu1 %v1345_v58  ;;  %v1369_v16 = vand.u32 4294901760, %v1368_v4  ;;  %v4679_v42 = vand.u32 4294901760, %v983_v60 }
  0xa3   :  { %v1380_v38 = vsub.f32 %v4618_v13, %v6451_v10  ;;  %v978_v10 = vld [vmem:[%s5938_s3 + $0x190] sm:$0xff]  ;;  %v977_v13 = vld [vmem:[%s5938_s3 + $0x188] sm:$0xff]  ;;  %v1375_v11 = vand.u32 4294901760, %v1374_v39  ;;  %1083 = vmatpush2.msra.mxu0 %v4624_v5  ;;  %1352 = vmatpush2.msra.mxu1 %v1351_v8  ;;  %v4685_v31 = vand.u32 4294901760, %v982_v25  ;;  %v4687_v41 = vand.u32 4294901760, %v981_v23  ;;  %v976_v8 = vld [vmem:[%s5938_s3 + $0x180] sm:$0xff] }
  0xa4   :  { %6452 = vst [vmem:[#allocation46_spill] sm:$0xff] %v4679_v42  ;;  %v1386_v24 = vsub.f32 %v4644_v62, %v6118_v3  ;;  %v4689_v17 = vand.u32 4294901760, %v980_v1  ;;  %1358 = vmatprep.subr.mxu1 %v1357_v50  ;;  %v4692_v58 = vsub.f32 %v983_v60, %v4679_v42  ;;  %v4696_v4 = vand.u32 4294901760, %v978_v10  ;;  %1085 = vmatprep.subr.mxu0 %v4679_v42 }
  0xa5   :  { %v1381_v26 = vand.u32 4294901760, %v1380_v38  ;;  %6453 = vst [vmem:[#allocation47_spill] sm:$0xff] %v4685_v31  ;;  %6454 = vst [vmem:[#allocation48_spill] sm:$0xff] %v4687_v41  ;;  %v4694_v38 = vand.u32 4294901760, %v979_v45  ;;  %v4698_v39 = vand.u32 4294901760, %v977_v13  ;;  %1364 = vmatpush2.msra.mxu1 %v1363_v56  ;;  %v4705_v62 = vsub.f32 %v982_v25, %v4685_v31  ;;  %1087 = vmatpush2.msra.mxu0 %v4685_v31 }
  0xa6   :  { %6455 = vst [vmem:[#allocation49_spill] sm:$0xff] %v4689_v17  ;;  %6456 = vst [vmem:[#allocation50_spill] sm:$0xff] %v4692_v58  ;;  %v1387_v3 = vand.u32 4294901760, %v1386_v24  ;;  %v4708_v60 = vsub.f32 %v981_v23, %v4687_v41  ;;  %v4711_v50 = vsub.f32 %v980_v1, %v4689_v17  ;;  %1370 = vmatprep.subr.mxu1 %v1369_v16  ;;  %v6127_v5 = vand.u32 4294901760, %v4692_v58 }
  0xa7   :  { %6457 = vst [vmem:[#allocation51_spill] sm:$0xff] %v4694_v38  ;;  %6458 = vst [vmem:[#allocation52_spill] sm:$0xff] %v4696_v4  ;;  %v4716_v20 = vsub.f32 %v979_v45, %v4694_v38  ;;  %v4719_v56 = vsub.f32 %v978_v10, %v4696_v4  ;;  %v4722_v25 = vsub.f32 %v977_v13, %v4698_v39  ;;  %1089 = vmatprep.subr.mxu0 %v4687_v41 }
  0xa8   :  { %6459 = vst [vmem:[#allocation53_spill] sm:$0xff] %v4698_v39  ;;  %6460 = vst [vmem:[#allocation54_spill] sm:$0xff] %v4705_v62  ;;  %1376 = vmatpush2.msra.mxu1 %v1375_v11  ;;  %v6128_v23 = vand.u32 4294901760, %v4705_v62  ;;  %v6129_v1 = vand.u32 4294901760, %v4708_v60  ;;  %v4728_v24 = vand.u32 4294901760, %v976_v8  ;;  %1091 = vmatpush2.msra.mxu0 %v4689_v17  ;;  %v1392_v45 = vsub.f32 %v4692_v58, %v6127_v5  ;;  %v975_v11 = vld [vmem:[%s5938_s3 + $0x178] sm:$0xff] }
  0xa9   :  { %6461 = vst [vmem:[#allocation55_spill] sm:$0xff] %v4708_v60  ;;  %6462 = vst [vmem:[#allocation56_spill] sm:$0xff] %v4711_v50  ;;  %1382 = vmatprep.subr.mxu1 %v1381_v26  ;;  %1093 = vmatprep.subr.mxu0 %v4694_v38  ;;  %v6467_v17 = vand.u32 4294901760, %v4711_v50  ;;  %v6469_v10 = vand.u32 4294901760, %v4716_v20 }
  0xaa   :  { %6463 = vst [vmem:[#allocation57_spill] sm:$0xff] %v4716_v20  ;;  %6464 = vst [vmem:[#allocation58_spill] sm:$0xff] %v4719_v56  ;;  %1388 = vmatpush2.msra.mxu1 %v1387_v3  ;;  %v1398_v16 = vsub.f32 %v4705_v62, %v6128_v23  ;;  %v1404_v26 = vsub.f32 %v4708_v60, %v6129_v1  ;;  %v4748_v13 = vsub.f32 %v976_v8, %v4728_v24  ;;  %v974_v3 = vld [vmem:[%s5938_s3 + $0x170] sm:$0xff]  ;;  %v973_v62 = vld [vmem:[%s5938_s3 + $0x168] sm:$0xff] }
  0xab   :  { %6465 = vst [vmem:[#allocation59_spill] sm:$0xff] %v4722_v25  ;;  %6466 = vst [vmem:[#allocation60_spill] sm:$0xff] %v4728_v24  ;;  %v1410_v5 = vsub.f32 %v4711_v50, %v6467_v17  ;;  %v1393_v23 = vand.u32 4294901760, %v1392_v45  ;;  %v1416_v1 = vsub.f32 %v4716_v20, %v6469_v10  ;;  %v6470_v60 = vand.u32 4294901760, %v4719_v56  ;;  %v972_v45 = vld [vmem:[%s5938_s3 + $0x160] sm:$0xff]  ;;  %v971_v10 = vld [vmem:[%s5938_s3 + $0x158] sm:$0xff]  ;;  %1095 = vmatpush2.msra.mxu0 %v4696_v4 }
  0xac   :  { %6468 = vst [vmem:[#allocation61_spill] sm:$0xff] %v4748_v13  ;;  %v6471_v8 = vand.u32 4294901760, %v4722_v25  ;;  %v1399_v20 = vand.u32 4294901760, %v1398_v16  ;;  %v6154_v58 = vand.u32 4294901760, %v4748_v13  ;;  %1097 = vmatprep.subr.mxu0 %v4698_v39  ;;  %v4783_v4 = vand.u32 4294901760, %v975_v11 }
  0xad   :  { %v1422_v17 = vsub.f32 %v4719_v56, %v6470_v60  ;;  %v1405_v60 = vand.u32 4294901760, %v1404_v26  ;;  %v1411_v56 = vand.u32 4294901760, %v1410_v5  ;;  %1394 = vmatprep.subr.mxu1 %v1393_v23  ;;  %v1417_v38 = vand.u32 4294901760, %v1416_v1  ;;  %1099 = vmatpush2.msra.mxu0 %v4728_v24 }
  0xae   :  { %v1428_v50 = vsub.f32 %v4722_v25, %v6471_v8  ;;  %v970_v8 = vld [vmem:[%s5938_s3 + $0x150] sm:$0xff]  ;;  %v969_v25 = vld [vmem:[%s5938_s3 + $0x148] sm:$0xff]  ;;  %6472 = vst [vmem:[#allocation62_spill] sm:$0xff] %v4783_v4  ;;  %1400 = vmatpush2.msra.mxu1 %v1399_v20  ;;  %v1434_v5 = vsub.f32 %v4748_v13, %v6154_v58  ;;  %v4789_v16 = vand.u32 4294901760, %v974_v3  ;;  %v4791_v26 = vand.u32 4294901760, %v973_v62  ;;  %v968_v20 = vld [vmem:[%s5938_s3 + $0x140] sm:$0xff]  ;;  %1101 = vmatprep.subr.mxu0 %v4783_v4 }
  0xaf   :  { %v1423_v41 = vand.u32 4294901760, %v1422_v17  ;;  %v4793_v39 = vand.u32 4294901760, %v972_v45  ;;  %1406 = vmatprep.subr.mxu1 %v1405_v60  ;;  %v4796_v23 = vsub.f32 %v975_v11, %v4783_v4  ;;  %v4800_v1 = vand.u32 4294901760, %v970_v8 }
  0xb0   :  { %v1429_v31 = vand.u32 4294901760, %v1428_v50  ;;  %6473 = vst [vmem:[#allocation63_spill] sm:$0xff] %v4789_v16  ;;  %6474 = vst [vmem:[#allocation64_spill] sm:$0xff] %v4791_v26  ;;  %v4798_v50 = vand.u32 4294901760, %v971_v10  ;;  %v4802_v17 = vand.u32 4294901760, %v969_v25  ;;  %1412 = vmatpush2.msra.mxu1 %v1411_v56  ;;  %v1435_v58 = vand.u32 4294901760, %v1434_v5  ;;  %1103 = vmatpush2.msra.mxu0 %v4789_v16 }
  0xb1   :  { %6475 = vst [vmem:[#allocation65_spill] sm:$0xff] %v4793_v39  ;;  %6476 = vst [vmem:[#allocation66_spill] sm:$0xff] %v4796_v23  ;;  %v4809_v13 = vsub.f32 %v974_v3, %v4789_v16  ;;  %v4812_v11 = vsub.f32 %v973_v62, %v4791_v26  ;;  %v4815_v60 = vsub.f32 %v972_v45, %v4793_v39  ;;  %1418 = vmatprep.subr.mxu1 %v1417_v38 }
  0xb2   :  { %6477 = vst [vmem:[#allocation67_spill] sm:$0xff] %v4798_v50  ;;  %6478 = vst [vmem:[#allocation68_spill] sm:$0xff] %v4800_v1  ;;  %v6163_v24 = vand.u32 4294901760, %v4796_v23  ;;  %v4820_v42 = vsub.f32 %v971_v10, %v4798_v50  ;;  %v4823_v56 = vsub.f32 %v970_v8, %v4800_v1  ;;  %v4826_v3 = vsub.f32 %v969_v25, %v4802_v17 }
  0xb3   :  { %6479 = vst [vmem:[#allocation69_spill] sm:$0xff] %v4802_v17  ;;  %6480 = vst [vmem:[#allocation70_spill] sm:$0xff] %v4809_v13  ;;  %1105 = vmatprep.subr.mxu0 %v4791_v26  ;;  %1424 = vmatpush2.msra.mxu1 %v1423_v41  ;;  %v6164_v62 = vand.u32 4294901760, %v4809_v13  ;;  %v6165_v45 = vand.u32 4294901760, %v4812_v11  ;;  %v4832_v5 = vand.u32 4294901760, %v968_v20  ;;  %v967_v41 = vld [vmem:[%s5938_s3 + $0x138] sm:$0xff] }
  0xb4   :  { %6481 = vst [vmem:[#allocation71_spill] sm:$0xff] %v4812_v11  ;;  %6482 = vst [vmem:[#allocation72_spill] sm:$0xff] %v4815_v60  ;;  %1107 = vmatpush2.msra.mxu0 %v4793_v39  ;;  %1430 = vmatprep.subr.mxu1 %v1429_v31  ;;  %v1440_v10 = vsub.f32 %v4796_v23, %v6163_v24  ;;  %v6487_v39 = vand.u32 4294901760, %v4815_v60  ;;  %v6489_v8 = vand.u32 4294901760, %v4820_v42 }
  0xb5   :  { %6483 = vst [vmem:[#allocation73_spill] sm:$0xff] %v4820_v42  ;;  %6484 = vst [vmem:[#allocation74_spill] sm:$0xff] %v4823_v56  ;;  %1109 = vmatprep.subr.mxu0 %v4798_v50  ;;  %1436 = vmatpush2.msra.mxu1 %v1435_v58  ;;  %v1446_v38 = vsub.f32 %v4809_v13, %v6164_v62  ;;  %v1452_v31 = vsub.f32 %v4812_v11, %v6165_v45  ;;  %v966_v58 = vld [vmem:[%s5938_s3 + $0x130] sm:$0xff]  ;;  %v6490_v11 = vand.u32 4294901760, %v4823_v56  ;;  %v965_v13 = vld [vmem:[%s5938_s3 + $0x128] sm:$0xff] }
  0xb6   :  { %6485 = vst [vmem:[#allocation75_spill] sm:$0xff] %v4826_v3  ;;  %6486 = vst [vmem:[#allocation76_spill] sm:$0xff] %v4832_v5  ;;  %v1458_v24 = vsub.f32 %v4815_v60, %v6487_v39  ;;  %v4852_v25 = vsub.f32 %v968_v20, %v4832_v5  ;;  %v1441_v62 = vand.u32 4294901760, %v1440_v10  ;;  %v1464_v45 = vsub.f32 %v4820_v42, %v6489_v8  ;;  %v964_v10 = vld [vmem:[%s5938_s3 + $0x120] sm:$0xff]  ;;  %v963_v8 = vld [vmem:[%s5938_s3 + $0x118] sm:$0xff] }
  0xb7   :  { %v1470_v39 = vsub.f32 %v4823_v56, %v6490_v11  ;;  %v6491_v20 = vand.u32 4294901760, %v4826_v3  ;;  %1111 = vmatpush2.msra.mxu0 %v4800_v1  ;;  %v1447_v42 = vand.u32 4294901760, %v1446_v38  ;;  %v1453_v11 = vand.u32 4294901760, %v1452_v31 }
  0xb8   :  { %6488 = vst [vmem:[#allocation77_spill] sm:$0xff] %v4852_v25  ;;  %v1459_v56 = vand.u32 4294901760, %v1458_v24  ;;  %v6190_v23 = vand.u32 4294901760, %v4852_v25  ;;  %1113 = vmatprep.subr.mxu0 %v4802_v17  ;;  %1442 = vmatprep.subr.mxu1 %v1441_v62  ;;  %v1465_v50 = vand.u32 4294901760, %v1464_v45  ;;  %v4887_v1 = vand.u32 4294901760, %v967_v41 }
  0xb9   :  { %v1476_v60 = vsub.f32 %v4826_v3, %v6491_v20  ;;  %v962_v20 = vld [vmem:[%s5938_s3 + $0x110] sm:$0xff]  ;;  %v961_v3 = vld [vmem:[%s5938_s3 + $0x108] sm:$0xff]  ;;  %v1471_v26 = vand.u32 4294901760, %v1470_v39  ;;  %1115 = vmatpush2.msra.mxu0 %v4832_v5  ;;  %1448 = vmatpush2.msra.mxu1 %v1447_v42  ;;  %v4893_v38 = vand.u32 4294901760, %v966_v58  ;;  %v4895_v31 = vand.u32 4294901760, %v965_v13  ;;  %v960_v42 = vld [vmem:[%s5938_s3 + $0x100] sm:$0xff] }
  0xba   :  { %6492 = vst [vmem:[#allocation78_spill] sm:$0xff] %v4887_v1  ;;  %v1482_v24 = vsub.f32 %v4852_v25, %v6190_v23  ;;  %v4897_v17 = vand.u32 4294901760, %v964_v10  ;;  %1454 = vmatprep.subr.mxu1 %v1453_v11  ;;  %v4900_v62 = vsub.f32 %v967_v41, %v4887_v1  ;;  %v4904_v45 = vand.u32 4294901760, %v962_v20  ;;  %1117 = vmatprep.subr.mxu0 %v4887_v1 }
  0xbb   :  { %v1477_v16 = vand.u32 4294901760, %v1476_v60  ;;  %6493 = vst [vmem:[#allocation79_spill] sm:$0xff] %v4893_v38  ;;  %6494 = vst [vmem:[#allocation80_spill] sm:$0xff] %v4895_v31  ;;  %v4902_v60 = vand.u32 4294901760, %v963_v8  ;;  %v4906_v39 = vand.u32 4294901760, %v961_v3  ;;  %1460 = vmatpush2.msra.mxu1 %v1459_v56  ;;  %v4913_v25 = vsub.f32 %v966_v58, %v4893_v38  ;;  %1119 = vmatpush2.msra.mxu0 %v4893_v38 }
  0xbc   :  { %6495 = vst [vmem:[#allocation81_spill] sm:$0xff] %v4897_v17  ;;  %6496 = vst [vmem:[#allocation82_spill] sm:$0xff] %v4900_v62  ;;  %v1483_v23 = vand.u32 4294901760, %v1482_v24  ;;  %v4916_v41 = vsub.f32 %v965_v13, %v4895_v31  ;;  %v4919_v11 = vsub.f32 %v964_v10, %v4897_v17  ;;  %1466 = vmatprep.subr.mxu1 %v1465_v50  ;;  %v6199_v5 = vand.u32 4294901760, %v4900_v62 }
  0xbd   :  { %6497 = vst [vmem:[#allocation83_spill] sm:$0xff] %v4902_v60  ;;  %6498 = vst [vmem:[#allocation84_spill] sm:$0xff] %v4904_v45  ;;  %v4924_v4 = vsub.f32 %v963_v8, %v4902_v60  ;;  %v4927_v56 = vsub.f32 %v962_v20, %v4904_v45  ;;  %v4930_v58 = vsub.f32 %v961_v3, %v4906_v39  ;;  %1121 = vmatprep.subr.mxu0 %v4895_v31 }
  0xbe   :  { %6499 = vst [vmem:[#allocation85_spill] sm:$0xff] %v4906_v39  ;;  %6500 = vst [vmem:[#allocation86_spill] sm:$0xff] %v4913_v25  ;;  %1472 = vmatpush2.msra.mxu1 %v1471_v26  ;;  %v6202_v13 = vand.u32 4294901760, %v4913_v25  ;;  %v6205_v10 = vand.u32 4294901760, %v4916_v41  ;;  %v4936_v24 = vand.u32 4294901760, %v960_v42  ;;  %1123 = vmatpush2.msra.mxu0 %v4897_v17  ;;  %v1488_v8 = vsub.f32 %v4900_v62, %v6199_v5 }
  0xbf   :  { %6501 = vst [vmem:[#allocation87_spill] sm:$0xff] %v4916_v41  ;;  %6502 = vst [vmem:[#allocation88_spill] sm:$0xff] %v4919_v11  ;;  %1478 = vmatprep.subr.mxu1 %v1477_v16  ;;  %1125 = vmatprep.subr.mxu0 %v4902_v60  ;;  %v6507_v17 = vand.u32 4294901760, %v4919_v11  ;;  %v6509_v26 = vand.u32 4294901760, %v4924_v4  ;;  %v6510_v62 = vand.u32 4294901760, %v4927_v56 }
  0xc0   :  { %6503 = vst [vmem:[#allocation89_spill] sm:$0xff] %v4924_v4  ;;  %6504 = vst [vmem:[#allocation90_spill] sm:$0xff] %v4927_v56  ;;  %1484 = vmatpush2.msra.mxu1 %v1483_v23  ;;  %v1494_v50 = vsub.f32 %v4913_v25, %v6202_v13  ;;  %v1500_v16 = vsub.f32 %v4916_v41, %v6205_v10  ;;  %v4956_v3 = vsub.f32 %v960_v42, %v4936_v24 }
  0xc1   :  { %6505 = vst [vmem:[#allocation91_spill] sm:$0xff] %v4930_v58  ;;  %6506 = vst [vmem:[#allocation92_spill] sm:$0xff] %v4936_v24  ;;  %v1506_v5 = vsub.f32 %v4919_v11, %v6507_v17  ;;  %v1489_v20 = vand.u32 4294901760, %v1488_v8  ;;  %v1512_v23 = vsub.f32 %v4924_v4, %v6509_v26  ;;  %v1518_v13 = vsub.f32 %v4927_v56, %v6510_v62 }
  0xc2   :  { %6508 = vst [vmem:[#allocation93_spill] sm:$0xff] %v4956_v3  ;;  %v6511_v25 = vand.u32 4294901760, %v4930_v58  ;;  %1127 = vmatpush2.msra.mxu0 %v4904_v45  ;;  %v1495_v41 = vand.u32 4294901760, %v1494_v50  ;;  %v1501_v17 = vand.u32 4294901760, %v1500_v16  ;;  %v6210_v42 = vand.u32 4294901760, %v4956_v3 }
  0xc3   :  { %v1507_v11 = vand.u32 4294901760, %v1506_v5  ;;  %1129 = vmatprep.subr.mxu0 %v4906_v39  ;;  %1490 = vmatprep.subr.mxu1 %v1489_v20  ;;  %v1513_v8 = vand.u32 4294901760, %v1512_v23  ;;  %v1519_v26 = vand.u32 4294901760, %v1518_v13  ;;  %v61_v50 = vlaneseq  ;;  %v59_v13 = vld [vmem:[%s5939_s2] sm:$0x3] }
  0xc4   :  { %v1524_v10 = vsub.f32 %v4930_v58, %v6511_v25  ;;  %1131 = vmatpush2.msra.mxu0 %v4936_v24  ;;  %1496 = vmatpush2.msra.mxu1 %v1495_v41  ;;  %v1530_v62 = vsub.f32 %v4956_v3, %v6210_v42 }
  0xc5   :  { %1544 = vmatprep.subr.mxu0 %v4172_v21  ;;  %1502 = vmatprep.subr.mxu1 %v1501_v17  ;;  %v4976_v20 = vshrl.u32 %v61_v50, 7 }
  0xc6   :  { %v1525_v25 = vand.u32 4294901760, %v1524_v10  ;;  %1508 = vmatpush2.msra.mxu1 %v1507_v11  ;;  %v1531_v5 = vand.u32 4294901760, %v1530_v62 }
  0xc7   :  { %1514 = vmatprep.subr.mxu1 %v1513_v8  ;;  %6512 = vst [vmem:[#allocation94_spill] sm:$0xff] %v4976_v20  ;;  %v6225_v41 = vsub.s32 0, %v4976_v20  ;;  %v6234_v10 = vsub.s32 1, %v4976_v20 }
  0xc8   :  { %1520 = vmatpush2.msra.mxu1 %v1519_v26 }
  0xc9   :  { %1526 = vmatprep.subr.mxu1 %v1525_v25  ;;  %v64_v11 = vrot.slane %v59_v13, %v6225_v41  ;;  %v68_v8 = vrot.slane %v59_v13, %v6234_v10 }
  0xca   :  { %1532 = vmatpush2.msra.mxu1 %v1531_v5 }
  0xcb   :  { %1746 = vmatprep.subr.mxu1 %v4144_v35 }
  0xec   :  { %v174_v16 = vpop.f32.mrf.mxu0 }
  0xed   :  { %v175_v62 = vadd.f32 %v174_v16, %v64_v11 }
  0xee   :  { %v176_v23 = vpop.f32.mrf.mxu0 }
  0xef   :  { %v177_v5 = vadd.f32 %v176_v23, %v68_v8 }
  0xf3   :  { %v406_v17 = vpop.f32.mrf.mxu1 }
  0xf4   :  { %v407_v21 = vadd.f32 %v406_v17, %v175_v62  ;;  %v6523_v62 = vld [vmem:[#allocation11_spill] sm:$0xff] }
  0xf5   :  { %v408_v25 = vpop.f32.mrf.mxu1 }
  0xf6   :  { %v409_v58 = vadd.f32 %v408_v25, %v177_v5  ;;  %v6524_v25 = vld [vmem:[#allocation8_spill] sm:$0xff]  ;;  %v6525_v5 = vld [vmem:[#allocation21_spill] sm:$0xff] }
 0x10d   :  { %v543_v26 = vpop.f32.mrf.mxu0 }
 0x10e   :  { %v544_v56 = vadd.f32 %v543_v26, %v407_v21  ;;  %v6522_v26 = vld [vmem:[#allocation7_spill] sm:$0xff] }
 0x10f   :  { %v545_v50 = vpop.f32.mrf.mxu0 }
 0x110   :  { %v546_v35 = vadd.f32 %v545_v50, %v409_v58  ;;  %v6515_v58 = vld [vmem:[#allocation14_spill] sm:$0xff]  ;;  %v6526_v50 = vld [vmem:[#allocation9_spill] sm:$0xff] }
 0x115   :  { %v649_v42 = vpop.f32.mrf.mxu1 }
 0x116   :  { %v650_v24 = vadd.f32 %v649_v42, %v544_v56  ;;  %v6518_v42 = vld [vmem:[#allocation5_spill] sm:$0xff] }
 0x117   :  { %v651_v4 = vpop.f32.mrf.mxu1 }
 0x118   :  { %v652_v41 = vadd.f32 %v651_v4, %v546_v35 }
 0x12e   :  { %v817_v3 = vpop.f32.mrf.mxu0 }
 0x12f   :  { %v818_v45 = vadd.f32 %v817_v3, %v650_v24  ;;  %v6516_v24 = vld [vmem:[#allocation4_spill] sm:$0xff] }
 0x130   :  { %v819_v39 = vpop.f32.mrf.mxu0  ;;  %v6517_v3 = vld [vmem:[#allocation16_spill] sm:$0xff] }
 0x131   :  { %v820_v31 = vadd.f32 %v819_v39, %v652_v41  ;;  %v6514_v39 = vld [vmem:[#allocation3_spill] sm:$0xff]  ;;  %v6520_v41 = vld [vmem:[#allocation6_spill] sm:$0xff] }
 0x137   :  { %v921_v60 = vpop.f32.mrf.mxu1 }
 0x138   :  { %v922_v20 = vadd.f32 %v921_v60, %v818_v45 }
 0x139   :  { %v923_v13 = vpop.f32.mrf.mxu1 }
 0x13a   :  { %v926_v10 = vmax.f32 %v922_v20, 0.0  ;;  %v924_v16 = vadd.f32 %v923_v13, %v820_v31  ;;  %v6519_v20 = vld [vmem:[#allocation18_spill] sm:$0xff]  ;;  %v6527_v13 = vld [vmem:[#allocation13_spill] sm:$0xff] }
 0x13c   :  { %v4987_v11 = vand.u32 4294901760, %v926_v10  ;;  %v927_v23 = vmax.f32 %v924_v16, 0.0  ;;  %v6528_v16 = vld [vmem:[#allocation10_spill] sm:$0xff] }
 0x13e   :  { %6513 = vst [vmem:[#allocation95_spill] sm:$0xff] %v4987_v11  ;;  %v4990_v17 = vsub.f32 %v926_v10, %v4987_v11  ;;  %v4992_v8 = vand.u32 4294901760, %v927_v23  ;;  %v6521_v10 = vld [vmem:[#allocation20_spill] sm:$0xff] }
 0x140   :  { %v6235_v21 = vand.u32 4294901760, %v4990_v17  ;;  %v1133_v56 = vsub.f32 %v927_v23, %v4992_v8  ;;  %1534 = vmatprep.mubr.f32.mxu1 %v4992_v8  ;;  %v6529_v23 = vld [vmem:[#allocation19_spill] sm:$0xff] }
 0x141   :  { %1536 = vmatmul.mubr.f32.vlgmr.msra.gmra.mxu1 %v4987_v11  ;;  %v6537_v11 = vld [vmem:[#allocation32_spill] sm:$0xff] }
 0x142   :  { %1748 = vmatpush1.msra.mxu1 %v4156_v57  ;;  %v1134_v35 = vand.u32 4294901760, %v1133_v56  ;;  %v1141_v4 = vsub.f32 %v4990_v17, %v6235_v21  ;;  %v6536_v21 = vld [vmem:[#allocation23_spill] sm:$0xff] }
 0x143   :  { %1750 = vmatprep.subr.mxu1 %v4158_v51 }
 0x144   :  { %1752 = vmatpush1.msra.mxu1 %v4160_v59  ;;  %1876 = vmatprep.mubr.f32.mxu1 %v1134_v35  ;;  %v1135_v31 = vsub.f32 %v1133_v56, %v1134_v35  ;;  %v1142_v45 = vand.u32 4294901760, %v1141_v4  ;;  %v6531_v35 = vld [vmem:[#allocation28_spill] sm:$0xff] }
 0x145   :  { %1754 = vmatprep.subr.mxu1 %v4174_v55  ;;  %v6532_v4 = vld [vmem:[#allocation12_spill] sm:$0xff] }
 0x146   :  { %1756 = vmatpush1.msra.mxu1 %v4176_v28  ;;  %v1136_v60 = vand.u32 4294901760, %v1135_v31  ;;  %v6533_v31 = vld [vmem:[#allocation30_spill] sm:$0xff] }
 0x147   :  { %1758 = vmatprep.subr.mxu1 %v4178_v30 }
 0x148   :  { %1760 = vmatpush1.msra.mxu1 %v4193_v52  ;;  %1137 = vmatprep.mubr.f32.mxu0 %v1136_v60  ;;  %v6534_v60 = vld [vmem:[#allocation22_spill] sm:$0xff] }
 0x149   :  { %1762 = vmatprep.subr.mxu1 %v4267_v61  ;;  %1143 = vmatmul.mubr.f32.vlgmr.msra.gmra.mxu0 %v1142_v45  ;;  %v6535_v45 = vld [vmem:[#allocation31_spill] sm:$0xff] }
 0x14a   :  { %1547 = vmatpush1.msra.mxu0 %v4185_v27  ;;  %1764 = vmatpush1.msra.mxu1 %v4269_v43 }
 0x14b   :  { %1550 = vmatprep.subr.mxu0 %v4188_v40  ;;  %1736 = vmatprep.mubr.f32.mxu0 %v1133_v56  ;;  %v6530_v56 = vld [vmem:[#allocation15_spill] sm:$0xff] }
 0x14c   :  { %1766 = vmatprep.subr.mxu1 %v4271_v44  ;;  %1553 = vmatpush1.msra.mxu0 %v4191_v33 }
 0x14d   :  { %1768 = vmatpush1.msra.mxu1 %v4273_v53  ;;  %1556 = vmatprep.subr.mxu0 %v4198_v14 }
 0x14e   :  { %1770 = vmatprep.subr.mxu1 %v4278_v29  ;;  %1559 = vmatpush1.msra.mxu0 %v4201_v48 }
 0x14f   :  { %1772 = vmatpush1.msra.mxu1 %v4280_v47  ;;  %1562 = vmatprep.subr.mxu0 %v4204_v7 }
 0x150   :  { %1774 = vmatprep.subr.mxu1 %v4282_v49  ;;  %1565 = vmatpush1.msra.mxu0 %v4211_v9 }
 0x151   :  { %1776 = vmatpush1.msra.mxu1 %v4312_v36  ;;  %1568 = vmatprep.subr.mxu0 %v4276_v22 }
 0x152   :  { %1778 = vmatprep.subr.mxu1 %v4361_v46  ;;  %1571 = vmatpush1.msra.mxu0 %v4286_v2 }
 0x153   :  { %1780 = vmatpush1.msra.mxu1 %v4370_v6  ;;  %1574 = vmatprep.subr.mxu0 %v4289_v63 }
 0x154   :  { %1782 = vmatprep.subr.mxu1 %v4372_v32  ;;  %1577 = vmatpush1.msra.mxu0 %v4292_v0 }
 0x155   :  { %1784 = vmatpush1.msra.mxu1 %v4374_v12  ;;  %1580 = vmatprep.subr.mxu0 %v4297_v54 }
 0x156   :  { %1786 = vmatprep.subr.mxu1 %v4382_v18  ;;  %1583 = vmatpush1.msra.mxu0 %v4300_v15 }
 0x157   :  { %1788 = vmatpush1.msra.mxu1 %v4384_v34  ;;  %1586 = vmatprep.subr.mxu0 %v4303_v37 }
 0x158   :  { %1790 = vmatprep.subr.mxu1 %v4386_v19  ;;  %1589 = vmatpush1.msra.mxu0 %v6514_v39 }
 0x159   :  { %1792 = vmatpush1.msra.mxu1 %v6515_v58  ;;  %1592 = vmatprep.subr.mxu0 %v6516_v24 }
 0x15a   :  { %1794 = vmatprep.subr.mxu1 %v6517_v3  ;;  %1595 = vmatpush1.msra.mxu0 %v6518_v42 }
 0x15b   :  { %1796 = vmatpush1.msra.mxu1 %v6519_v20  ;;  %1598 = vmatprep.subr.mxu0 %v6520_v41 }
 0x15c   :  { %1798 = vmatprep.subr.mxu1 %v6521_v10  ;;  %1601 = vmatpush1.msra.mxu0 %v6522_v26 }
 0x15d   :  { %1800 = vmatpush1.msra.mxu1 %v6523_v62  ;;  %1604 = vmatprep.subr.mxu0 %v6524_v25 }
 0x15e   :  { %1802 = vmatprep.subr.mxu1 %v6525_v5  ;;  %1607 = vmatpush1.msra.mxu0 %v6526_v50 }
 0x15f   :  { %1804 = vmatpush1.msra.mxu1 %v6527_v13  ;;  %1610 = vmatprep.subr.mxu0 %v6528_v16  ;;  %v6538_v13 = vld [vmem:[#allocation24_spill] sm:$0xff]  ;;  %v6539_v16 = vld [vmem:[#allocation33_spill] sm:$0xff] }
 0x160   :  { %1806 = vmatprep.subr.mxu1 %v6529_v23  ;;  %1613 = vmatpush1.msra.mxu0 %v6530_v56  ;;  %v6540_v23 = vld [vmem:[#allocation25_spill] sm:$0xff]  ;;  %v6541_v56 = vld [vmem:[#allocation35_spill] sm:$0xff] }
 0x161   :  { %1808 = vmatpush1.msra.mxu1 %v6531_v35  ;;  %1616 = vmatprep.subr.mxu0 %v6532_v4  ;;  %v6542_v35 = vld [vmem:[#allocation26_spill] sm:$0xff]  ;;  %v6543_v4 = vld [vmem:[#allocation36_spill] sm:$0xff] }
 0x162   :  { %1810 = vmatprep.subr.mxu1 %v6533_v31  ;;  %1619 = vmatpush1.msra.mxu0 %v6534_v60  ;;  %v6544_v31 = vld [vmem:[#allocation27_spill] sm:$0xff]  ;;  %v6545_v60 = vld [vmem:[#allocation37_spill] sm:$0xff] }
 0x163   :  { %1812 = vmatpush2.msra.mxu1 %v6535_v45  ;;  %1622 = vmatprep.subr.mxu0 %v6536_v21  ;;  %v6546_v45 = vld [vmem:[#allocation29_spill] sm:$0xff]  ;;  %v6547_v21 = vld [vmem:[#allocation44_spill] sm:$0xff] }
 0x164   :  { %1814 = vmatprep.subr.mxu1 %v6537_v11  ;;  %1625 = vmatpush1.msra.mxu0 %v6538_v13  ;;  %v6548_v11 = vld [vmem:[#allocation34_spill] sm:$0xff] }
 0x165   :  { %1816 = vmatpush2.msra.mxu1 %v6539_v16  ;;  %1628 = vmatprep.subr.mxu0 %v6540_v23  ;;  %v6549_v13 = vld [vmem:[#allocation46_spill] sm:$0xff]  ;;  %v6551_v23 = vld [vmem:[#allocation47_spill] sm:$0xff] }
 0x166   :  { %1818 = vmatprep.subr.mxu1 %v6541_v56  ;;  %1631 = vmatpush1.msra.mxu0 %v6542_v35  ;;  %v6550_v16 = vld [vmem:[#allocation38_spill] sm:$0xff]  ;;  %v6552_v56 = vld [vmem:[#allocation39_spill] sm:$0xff]  ;;  %v6553_v35 = vld [vmem:[#allocation48_spill] sm:$0xff] }
 0x167   :  { %1820 = vmatpush2.msra.mxu1 %v6543_v4  ;;  %1634 = vmatprep.subr.mxu0 %v6544_v31  ;;  %v6554_v4 = vld [vmem:[#allocation40_spill] sm:$0xff]  ;;  %v6555_v31 = vld [vmem:[#allocation49_spill] sm:$0xff] }
 0x168   :  { %1822 = vmatprep.subr.mxu1 %v6545_v60  ;;  %1637 = vmatpush1.msra.mxu0 %v6546_v45  ;;  %v6556_v60 = vld [vmem:[#allocation41_spill] sm:$0xff]  ;;  %v6557_v45 = vld [vmem:[#allocation51_spill] sm:$0xff] }
 0x169   :  { %1824 = vmatpush2.msra.mxu1 %v6547_v21  ;;  %1640 = vmatprep.subr.mxu0 %v6548_v11  ;;  %v6558_v21 = vld [vmem:[#allocation42_spill] sm:$0xff]  ;;  %v6559_v11 = vld [vmem:[#allocation52_spill] sm:$0xff] }
 0x16a   :  { %1826 = vmatprep.subr.mxu1 %v6549_v13  ;;  %1643 = vmatpush2.msra.mxu0 %v6550_v16  ;;  %v6560_v13 = vld [vmem:[#allocation43_spill] sm:$0xff]  ;;  %v6561_v16 = vld [vmem:[#allocation53_spill] sm:$0xff] }
 0x16b   :  { %1828 = vmatpush2.msra.mxu1 %v6551_v23  ;;  %1646 = vmatprep.subr.mxu0 %v6552_v56  ;;  %v6562_v23 = vld [vmem:[#allocation45_spill] sm:$0xff]  ;;  %v6563_v56 = vld [vmem:[#allocation60_spill] sm:$0xff] }
 0x16c   :  { %1830 = vmatprep.subr.mxu1 %v6553_v35  ;;  %1649 = vmatpush2.msra.mxu0 %v6554_v4  ;;  %v6564_v35 = vld [vmem:[#allocation50_spill] sm:$0xff] }
 0x16d   :  { %1832 = vmatpush2.msra.mxu1 %v6555_v31  ;;  %1652 = vmatprep.subr.mxu0 %v6556_v60  ;;  %v6565_v4 = vld [vmem:[#allocation62_spill] sm:$0xff]  ;;  %v6567_v60 = vld [vmem:[#allocation63_spill] sm:$0xff] }
 0x16e   :  { %1834 = vmatprep.subr.mxu1 %v6557_v45  ;;  %1655 = vmatpush2.msra.mxu0 %v6558_v21  ;;  %v6566_v31 = vld [vmem:[#allocation54_spill] sm:$0xff]  ;;  %v6568_v45 = vld [vmem:[#allocation55_spill] sm:$0xff]  ;;  %v6569_v21 = vld [vmem:[#allocation64_spill] sm:$0xff] }
 0x16f   :  { %1836 = vmatpush2.msra.mxu1 %v6559_v11  ;;  %1658 = vmatprep.subr.mxu0 %v6560_v13  ;;  %v6570_v11 = vld [vmem:[#allocation56_spill] sm:$0xff]  ;;  %v6571_v13 = vld [vmem:[#allocation65_spill] sm:$0xff] }
 0x170   :  { %1838 = vmatprep.subr.mxu1 %v6561_v16  ;;  %1661 = vmatpush2.msra.mxu0 %v6562_v23  ;;  %v6572_v16 = vld [vmem:[#allocation57_spill] sm:$0xff]  ;;  %v6573_v23 = vld [vmem:[#allocation67_spill] sm:$0xff] }
 0x171   :  { %1840 = vmatpush2.msra.mxu1 %v6563_v56  ;;  %1664 = vmatprep.subr.mxu0 %v6564_v35  ;;  %v6574_v56 = vld [vmem:[#allocation58_spill] sm:$0xff]  ;;  %v6575_v35 = vld [vmem:[#allocation68_spill] sm:$0xff] }
 0x172   :  { %1842 = vmatprep.subr.mxu1 %v6565_v4  ;;  %1667 = vmatpush2.msra.mxu0 %v6566_v31  ;;  %v6576_v4 = vld [vmem:[#allocation59_spill] sm:$0xff]  ;;  %v6577_v31 = vld [vmem:[#allocation69_spill] sm:$0xff] }
 0x173   :  { %1844 = vmatpush2.msra.mxu1 %v6567_v60  ;;  %1670 = vmatprep.subr.mxu0 %v6568_v45  ;;  %v6578_v60 = vld [vmem:[#allocation61_spill] sm:$0xff]  ;;  %v6579_v45 = vld [vmem:[#allocation76_spill] sm:$0xff] }
 0x174   :  { %1846 = vmatprep.subr.mxu1 %v6569_v21  ;;  %1673 = vmatpush2.msra.mxu0 %v6570_v11  ;;  %v6580_v21 = vld [vmem:[#allocation66_spill] sm:$0xff] }
 0x175   :  { %1848 = vmatpush2.msra.mxu1 %v6571_v13  ;;  %1676 = vmatprep.subr.mxu0 %v6572_v16  ;;  %v6581_v13 = vld [vmem:[#allocation70_spill] sm:$0xff] }
 0x176   :  { %1850 = vmatprep.subr.mxu1 %v6573_v23  ;;  %1679 = vmatpush2.msra.mxu0 %v6574_v56  ;;  %v6582_v23 = vld [vmem:[#allocation71_spill] sm:$0xff]  ;;  %v6583_v56 = vld [vmem:[#allocation80_spill] sm:$0xff] }
 0x177   :  { %1852 = vmatpush2.msra.mxu1 %v6575_v35  ;;  %1682 = vmatprep.subr.mxu0 %v6576_v4  ;;  %v6584_v35 = vld [vmem:[#allocation72_spill] sm:$0xff]  ;;  %v6585_v4 = vld [vmem:[#allocation81_spill] sm:$0xff] }
 0x178   :  { %1854 = vmatprep.subr.mxu1 %v6577_v31  ;;  %1685 = vmatpush2.msra.mxu0 %v6578_v60  ;;  %v6586_v31 = vld [vmem:[#allocation73_spill] sm:$0xff]  ;;  %v6587_v60 = vld [vmem:[#allocation83_spill] sm:$0xff] }
 0x179   :  { %1856 = vmatpush2.msra.mxu1 %v6579_v45  ;;  %1688 = vmatprep.subr.mxu0 %v6580_v21  ;;  %v6588_v45 = vld [vmem:[#allocation74_spill] sm:$0xff]  ;;  %v6589_v21 = vld [vmem:[#allocation84_spill] sm:$0xff] }
 0x17a   :  { %1858 = vmatprep.subr.mxu1 %v4887_v1  ;;  %1691 = vmatpush2.msra.mxu0 %v6581_v13  ;;  %v6590_v1 = vld [vmem:[#allocation75_spill] sm:$0xff]  ;;  %v6591_v13 = vld [vmem:[#allocation85_spill] sm:$0xff] }
 0x17b   :  { %1860 = vmatpush2.msra.mxu1 %v4893_v38  ;;  %1694 = vmatprep.subr.mxu0 %v6582_v23  ;;  %v6592_v38 = vld [vmem:[#allocation77_spill] sm:$0xff]  ;;  %v6593_v23 = vld [vmem:[#allocation92_spill] sm:$0xff] }
 0x17c   :  { %1862 = vmatprep.subr.mxu1 %v6583_v56  ;;  %1697 = vmatpush2.msra.mxu0 %v6584_v35  ;;  %v6594_v56 = vld [vmem:[#allocation82_spill] sm:$0xff] }
 0x17d   :  { %1864 = vmatpush2.msra.mxu1 %v6585_v4  ;;  %1700 = vmatprep.subr.mxu0 %v6586_v31  ;;  %v6595_v4 = vand.u32 4294901760, %v4990_v17  ;;  %v6596_v31 = vld [vmem:[#allocation2_spill] sm:$0xff] }
 0x17e   :  { %1866 = vmatprep.subr.mxu1 %v6587_v60  ;;  %1703 = vmatpush2.msra.mxu0 %v6588_v45  ;;  %v6597_v60 = vld [vmem:[#allocation86_spill] sm:$0xff] }
 0x17f   :  { %1868 = vmatpush2.msra.mxu1 %v6589_v21  ;;  %1706 = vmatprep.subr.mxu0 %v6590_v1  ;;  %v6598_v1 = vld [vmem:[#allocation87_spill] sm:$0xff] }
 0x180   :  { %1870 = vmatprep.subr.mxu1 %v6591_v13  ;;  %1709 = vmatpush2.msra.mxu0 %v6592_v38  ;;  %v6599_v38 = vld [vmem:[#allocation88_spill] sm:$0xff] }
 0x181   :  { %1872 = vmatpush2.msra.mxu1 %v6593_v23  ;;  %1712 = vmatprep.subr.mxu0 %v6594_v56  ;;  %v6600_v56 = vld [vmem:[#allocation89_spill] sm:$0xff] }
 0x182   :  { %1880 = vmatmul.mubr.f32.vlgmr.msra.gmra.mxu1 %v6595_v4  ;;  %2152 = vmatprep.subr.mxu1 %v6596_v31  ;;  %v6601_v4 = vld [vmem:[#allocation90_spill] sm:$0xff]  ;;  %v6602_v31 = vld [vmem:[#allocation91_spill] sm:$0xff] }
 0x183   :  { %1715 = vmatpush2.msra.mxu0 %v6597_v60  ;;  %2154 = vmatpush1.msra.mxu1 %v4156_v57  ;;  %v6603_v57 = vld [vmem:[#allocation93_spill] sm:$0xff] }
 0x184   :  { %2280 = vmatprep.mubr.f32.mxu1 %v4992_v8  ;;  %1718 = vmatprep.subr.mxu0 %v6598_v1 }
 0x185   :  { %2156 = vmatprep.subr.mxu1 %v4158_v51  ;;  %1721 = vmatpush2.msra.mxu0 %v6599_v38  ;;  %v6604_v51 = vld [vmem:[#allocation17_spill] sm:$0xff] }
 0x186   :  { %2158 = vmatpush1.msra.mxu1 %v4160_v59  ;;  %1724 = vmatprep.subr.mxu0 %v6600_v56  ;;  %v6605_v59 = vand.u32 4294901760, %v6604_v51  ;;  %v6654_v51 = vld [vmem:[#allocation37_spill] sm:$0xff] }
 0x187   :  { %2160 = vmatprep.subr.mxu1 %v4174_v55  ;;  %1727 = vmatpush2.msra.mxu0 %v6601_v4  ;;  %v6606_v55 = vand.u32 4294901760, %v4185_v27  ;;  %v6610_v27 = vand.u32 4294901760, %v4201_v48  ;;  %v6614_v48 = vand.u32 4294901760, %v4286_v2  ;;  %v6625_v2 = vand.u32 4294901760, %v6524_v25  ;;  %v6651_v25 = vld [vmem:[#allocation36_spill] sm:$0xff] }
 0x188   :  { %2162 = vmatpush1.msra.mxu1 %v4176_v28  ;;  %1730 = vmatprep.subr.mxu0 %v6602_v31  ;;  %v6607_v28 = vand.u32 4294901760, %v4188_v40  ;;  %v6611_v40 = vand.u32 4294901760, %v4204_v7  ;;  %v6615_v7 = vand.u32 4294901760, %v4289_v63  ;;  %v6626_v63 = vand.u32 4294901760, %v6526_v50 }
 0x189   :  { %2164 = vmatprep.subr.mxu1 %v4178_v30  ;;  %1733 = vmatpush2.msra.mxu0 %v6603_v57  ;;  %v6608_v30 = vand.u32 4294901760, %v4191_v33  ;;  %v6612_v33 = vand.u32 4294901760, %v4211_v9  ;;  %v6616_v9 = vand.u32 4294901760, %v4292_v0  ;;  %v6627_v0 = vld [vmem:[#allocation13_spill] sm:$0xff] }
 0x18a   :  { %2166 = vmatpush1.msra.mxu1 %v4193_v52  ;;  %1739 = vmatmul.mubr.f32.vlgmr.msra.gmra.mxu0 %v4990_v17  ;;  %v6609_v52 = vand.u32 4294901760, %v4198_v14  ;;  %v6613_v14 = vand.u32 4294901760, %v4276_v22  ;;  %v6621_v22 = vand.u32 4294901760, %v6516_v24  ;;  %v6639_v17 = vld [vmem:[#allocation31_spill] sm:$0xff]  ;;  %v6643_v24 = vld [vmem:[#allocation24_spill] sm:$0xff] }
 0x18b   :  { %1889 = vmatprep.subr.mxu0 %v6605_v59  ;;  %2168 = vmatprep.subr.mxu1 %v4267_v61  ;;  %v6617_v61 = vand.u32 4294901760, %v4297_v54  ;;  %v6628_v54 = vld [vmem:[#allocation10_spill] sm:$0xff]  ;;  %v6655_v59 = vld [vmem:[#allocation29_spill] sm:$0xff] }
 0x18c   :  { %1893 = vmatpush1.msra.mxu0 %v6606_v55  ;;  %2143 = vmatprep.mubr.f32.mxu0 %v4992_v8  ;;  %v6640_v8 = vld [vmem:[#allocation23_spill] sm:$0xff]  ;;  %v6656_v55 = vand.u32 4294901760, %v6655_v59  ;;  %v6707_v59 = vld [vmem:[#allocation70_spill] sm:$0xff] }
 0x18d   :  { %2170 = vmatpush1.msra.mxu1 %v4269_v43  ;;  %1897 = vmatprep.subr.mxu0 %v6607_v28  ;;  %v6618_v43 = vand.u32 4294901760, %v4300_v15  ;;  %v6629_v15 = vand.u32 4294901760, %v6628_v54  ;;  %v6657_v28 = vld [vmem:[#allocation44_spill] sm:$0xff]  ;;  %v6678_v54 = vld [vmem:[#allocation53_spill] sm:$0xff] }
 0x18e   :  { %2172 = vmatprep.subr.mxu1 %v4271_v44  ;;  %1901 = vmatpush1.msra.mxu0 %v6608_v30  ;;  %v6619_v44 = vand.u32 4294901760, %v4303_v37  ;;  %v6630_v37 = vld [vmem:[#allocation19_spill] sm:$0xff]  ;;  %v6658_v30 = vld [vmem:[#allocation34_spill] sm:$0xff] }
 0x18f   :  { %2174 = vmatpush1.msra.mxu1 %v4273_v53  ;;  %1905 = vmatprep.subr.mxu0 %v6609_v52  ;;  %v6620_v53 = vand.u32 4294901760, %v6514_v39  ;;  %v6641_v39 = vand.u32 4294901760, %v6640_v8  ;;  %v6659_v52 = vand.u32 4294901760, %v6658_v30  ;;  %v6690_v8 = vld [vmem:[#allocation64_spill] sm:$0xff]  ;;  %v6710_v30 = vld [vmem:[#allocation71_spill] sm:$0xff] }
 0x190   :  { %2176 = vmatprep.subr.mxu1 %v4278_v29  ;;  %1909 = vmatpush1.msra.mxu0 %v6610_v27  ;;  %v6622_v29 = vand.u32 4294901760, %v6518_v42  ;;  %v6645_v42 = vld [vmem:[#allocation33_spill] sm:$0xff]  ;;  %v6660_v27 = vld [vmem:[#allocation46_spill] sm:$0xff] }
 0x191   :  { %2178 = vmatpush1.msra.mxu1 %v4280_v47  ;;  %1913 = vmatprep.subr.mxu0 %v6611_v40  ;;  %v6623_v47 = vand.u32 4294901760, %v6520_v41  ;;  %v6661_v40 = vld [vmem:[#allocation38_spill] sm:$0xff] }
 0x192   :  { %2180 = vmatprep.subr.mxu1 %v4282_v49  ;;  %1917 = vmatpush1.msra.mxu0 %v6612_v33  ;;  %v6624_v49 = vand.u32 4294901760, %v6522_v26  ;;  %v6649_v26 = vld [vmem:[#allocation26_spill] sm:$0xff]  ;;  %v6662_v33 = vand.u32 4294901760, %v6661_v40  ;;  %v6713_v40 = vand.u32 4294901760, %v6584_v35 }
 0x193   :  { %2182 = vmatpush1.msra.mxu1 %v4312_v36  ;;  %1921 = vmatprep.subr.mxu0 %v6613_v14  ;;  %v6633_v36 = vld [vmem:[#allocation28_spill] sm:$0xff]  ;;  %v6663_v14 = vld [vmem:[#allocation47_spill] sm:$0xff] }
 0x194   :  { %2184 = vmatprep.subr.mxu1 %v4361_v46  ;;  %1925 = vmatpush1.msra.mxu0 %v6614_v48  ;;  %v6634_v46 = vld [vmem:[#allocation12_spill] sm:$0xff]  ;;  %v6664_v48 = vld [vmem:[#allocation39_spill] sm:$0xff] }
 0x195   :  { %2186 = vmatpush1.msra.mxu1 %v4370_v6  ;;  %1929 = vmatprep.subr.mxu0 %v6615_v7  ;;  %v6635_v6 = vand.u32 4294901760, %v6634_v46  ;;  %v6665_v7 = vand.u32 4294901760, %v6664_v48  ;;  %v6684_v46 = vld [vmem:[#allocation62_spill] sm:$0xff] }
 0x196   :  { %2188 = vmatprep.subr.mxu1 %v4372_v32  ;;  %1933 = vmatpush1.msra.mxu0 %v6616_v9  ;;  %v6666_v9 = vld [vmem:[#allocation48_spill] sm:$0xff] }
 0x197   :  { %2190 = vmatpush1.msra.mxu1 %v4374_v12  ;;  %1937 = vmatprep.subr.mxu0 %v6617_v61  ;;  %v6636_v12 = vld [vmem:[#allocation30_spill] sm:$0xff]  ;;  %v6667_v61 = vld [vmem:[#allocation40_spill] sm:$0xff] }
 0x198   :  { %2192 = vmatprep.subr.mxu1 %v4382_v18  ;;  %1941 = vmatpush1.msra.mxu0 %v6618_v43  ;;  %v6637_v18 = vld [vmem:[#allocation22_spill] sm:$0xff]  ;;  %v6668_v43 = vand.u32 4294901760, %v6667_v61  ;;  %v6719_v61 = vld [vmem:[#allocation75_spill] sm:$0xff] }
 0x199   :  { %2194 = vmatpush1.msra.mxu1 %v4384_v34  ;;  %1945 = vmatprep.subr.mxu0 %v6619_v44  ;;  %v6638_v34 = vand.u32 4294901760, %v6637_v18  ;;  %v6669_v44 = vld [vmem:[#allocation49_spill] sm:$0xff]  ;;  %v6687_v18 = vld [vmem:[#allocation63_spill] sm:$0xff] }
 0x19a   :  { %2196 = vmatprep.subr.mxu1 %v4386_v19  ;;  %1949 = vmatpush1.msra.mxu0 %v6620_v53  ;;  %v6631_v19 = vld [vmem:[#allocation15_spill] sm:$0xff]  ;;  %v6670_v53 = vld [vmem:[#allocation41_spill] sm:$0xff] }
 0x19b   :  { %2198 = vmatpush1.msra.mxu1 %v6515_v58  ;;  %1953 = vmatprep.subr.mxu0 %v6621_v22  ;;  %v6632_v32 = vand.u32 4294901760, %v6631_v19  ;;  %v6642_v58 = vld [vmem:[#allocation32_spill] sm:$0xff]  ;;  %v6671_v22 = vand.u32 4294901760, %v6670_v53  ;;  %v6723_v53 = vld [vmem:[#allocation82_spill] sm:$0xff] }
 0x19c   :  { %2200 = vmatprep.subr.mxu1 %v6517_v3  ;;  %1957 = vmatpush1.msra.mxu0 %v6622_v29  ;;  %v6644_v3 = vand.u32 4294901760, %v6643_v24  ;;  %v6672_v29 = vld [vmem:[#allocation51_spill] sm:$0xff]  ;;  %v6681_v19 = vld [vmem:[#allocation60_spill] sm:$0xff]  ;;  %v6693_v24 = vand.u32 4294901760, %v6572_v16 }
 0x19d   :  { %2202 = vmatpush1.msra.mxu1 %v6519_v20  ;;  %1961 = vmatprep.subr.mxu0 %v6623_v47  ;;  %v6646_v20 = vld [vmem:[#allocation25_spill] sm:$0xff]  ;;  %v6673_v47 = vld [vmem:[#allocation42_spill] sm:$0xff] }
 0x19e   :  { %2204 = vmatprep.subr.mxu1 %v6521_v10  ;;  %1965 = vmatpush1.msra.mxu0 %v6624_v49  ;;  %v6647_v41 = vand.u32 4294901760, %v6646_v20  ;;  %v6648_v10 = vld [vmem:[#allocation35_spill] sm:$0xff]  ;;  %v6674_v49 = vand.u32 4294901760, %v6673_v47  ;;  %v6728_v47 = vand.u32 4294901760, %v6599_v38  ;;  %v2305_v38 = vld [vmem:[%s5940_s5 + $0x78] sm:$0xff] }
 0x19f   :  { %2206 = vmatpush1.msra.mxu1 %v6523_v62  ;;  %1969 = vmatprep.subr.mxu0 %v6625_v2  ;;  %v6650_v62 = vand.u32 4294901760, %v6649_v26  ;;  %v6675_v2 = vld [vmem:[#allocation52_spill] sm:$0xff] }
 0x1a0   :  { %2208 = vmatprep.subr.mxu1 %v6525_v5  ;;  %1973 = vmatpush1.msra.mxu0 %v6626_v63  ;;  %v6652_v5 = vld [vmem:[#allocation27_spill] sm:$0xff] }
 0x1a1   :  { %2210 = vmatpush1.msra.mxu1 %v6627_v0  ;;  %1977 = vmatprep.subr.mxu0 %v6629_v15  ;;  %v6653_v50 = vand.u32 4294901760, %v6652_v5  ;;  %v6676_v63 = vld [vmem:[#allocation43_spill] sm:$0xff]  ;;  %v6679_v15 = vld [vmem:[#allocation45_spill] sm:$0xff]  ;;  %v6703_v5 = vld [vmem:[#allocation76_spill] sm:$0xff] }
 0x1a2   :  { %2212 = vmatprep.subr.mxu1 %v6630_v37  ;;  %1981 = vmatpush1.msra.mxu0 %v6632_v32  ;;  %v6677_v0 = vand.u32 4294901760, %v6676_v63  ;;  %v6680_v37 = vand.u32 4294901760, %v6679_v15  ;;  %v6682_v32 = vld [vmem:[#allocation50_spill] sm:$0xff]  ;;  %v2319_v63 = vld [vmem:[%s5940_s5 + $0xe8] sm:$0xff] }
 0x1a3   :  { %2214 = vmatpush1.msra.mxu1 %v6633_v36  ;;  %1985 = vmatprep.subr.mxu0 %v6635_v6  ;;  %v6683_v36 = vand.u32 4294901760, %v6682_v32  ;;  %v6685_v6 = vld [vmem:[#allocation54_spill] sm:$0xff]  ;;  %v5352_v15 = vand.u32 4294901760, %v2319_v63 }
 0x1a4   :  { %2216 = vmatprep.subr.mxu1 %v6636_v12  ;;  %1989 = vmatpush1.msra.mxu0 %v6638_v34  ;;  %v6686_v12 = vand.u32 4294901760, %v6685_v6  ;;  %v6688_v34 = vld [vmem:[#allocation55_spill] sm:$0xff]  ;;  %v2302_v32 = vld [vmem:[%s5940_s5 + $0x60] sm:$0xff] }
 0x1a5   :  { %2218 = vmatpush2.msra.mxu1 %v6639_v17  ;;  %1993 = vmatprep.subr.mxu0 %v6641_v39  ;;  %v6689_v17 = vand.u32 4294901760, %v6688_v34  ;;  %v6691_v39 = vand.u32 4294901760, %v6570_v11  ;;  %v5378_v34 = vsub.f32 %v2319_v63, %v5352_v15 }
 0x1a6   :  { %2220 = vmatprep.subr.mxu1 %v6642_v58  ;;  %1997 = vmatpush1.msra.mxu0 %v6644_v3  ;;  %v6692_v58 = vld [vmem:[#allocation65_spill] sm:$0xff]  ;;  %v6694_v3 = vld [vmem:[#allocation67_spill] sm:$0xff] }
 0x1a7   :  { %2222 = vmatpush2.msra.mxu1 %v6645_v42  ;;  %2001 = vmatprep.subr.mxu0 %v6647_v41  ;;  %v6695_v42 = vld [vmem:[#allocation58_spill] sm:$0xff]  ;;  %v6697_v41 = vld [vmem:[#allocation68_spill] sm:$0xff] }
 0x1a8   :  { %2224 = vmatprep.subr.mxu1 %v6648_v10  ;;  %2005 = vmatpush1.msra.mxu0 %v6650_v62  ;;  %v6696_v20 = vand.u32 4294901760, %v6695_v42  ;;  %v6698_v10 = vld [vmem:[#allocation59_spill] sm:$0xff]  ;;  %v6700_v62 = vld [vmem:[#allocation69_spill] sm:$0xff] }
 0x1a9   :  { %2226 = vmatpush2.msra.mxu1 %v6651_v25  ;;  %2009 = vmatprep.subr.mxu0 %v6653_v50  ;;  %v6699_v26 = vand.u32 4294901760, %v6698_v10  ;;  %v6701_v25 = vld [vmem:[#allocation61_spill] sm:$0xff]  ;;  %v6704_v50 = vld [vmem:[#allocation66_spill] sm:$0xff] }
 0x1aa   :  { %2228 = vmatprep.subr.mxu1 %v6654_v51  ;;  %2013 = vmatpush1.msra.mxu0 %v6656_v55  ;;  %v6702_v11 = vand.u32 4294901760, %v6701_v25  ;;  %v6705_v16 = vand.u32 4294901760, %v6704_v50  ;;  %v6706_v51 = vld [vmem:[#allocation78_spill] sm:$0xff]  ;;  %v6708_v55 = vand.u32 4294901760, %v6707_v59  ;;  %v2317_v59 = vld [vmem:[%s5940_s5 + $0xd8] sm:$0xff] }
 0x1ab   :  { %2230 = vmatpush2.msra.mxu1 %v6657_v28  ;;  %2017 = vmatprep.subr.mxu0 %v6659_v52  ;;  %v6709_v28 = vld [vmem:[#allocation79_spill] sm:$0xff]  ;;  %v6711_v52 = vand.u32 4294901760, %v6710_v30 }
 0x1ac   :  { %2232 = vmatprep.subr.mxu1 %v6660_v27  ;;  %2021 = vmatpush2.msra.mxu0 %v6662_v33  ;;  %v6712_v27 = vld [vmem:[#allocation80_spill] sm:$0xff]  ;;  %v6714_v33 = vld [vmem:[#allocation81_spill] sm:$0xff] }
 0x1ad   :  { %2234 = vmatpush2.msra.mxu1 %v6663_v14  ;;  %2025 = vmatprep.subr.mxu0 %v6665_v7  ;;  %v6715_v14 = vld [vmem:[#allocation73_spill] sm:$0xff]  ;;  %v6717_v7 = vld [vmem:[#allocation83_spill] sm:$0xff] }
 0x1ae   :  { %2236 = vmatprep.subr.mxu1 %v6666_v9  ;;  %2029 = vmatpush2.msra.mxu0 %v6668_v43  ;;  %v6716_v48 = vand.u32 4294901760, %v6715_v14  ;;  %v6718_v9 = vand.u32 4294901760, %v6588_v45  ;;  %v6720_v43 = vand.u32 4294901760, %v6719_v61  ;;  %v6726_v45 = vand.u32 4294901760, %v6597_v60  ;;  %v2315_v14 = vld [vmem:[%s5940_s5 + $0xc8] sm:$0xff] }
 0x1af   :  { %2238 = vmatpush2.msra.mxu1 %v6669_v44  ;;  %2033 = vmatprep.subr.mxu0 %v6671_v22  ;;  %v6721_v44 = vld [vmem:[#allocation77_spill] sm:$0xff]  ;;  %v6724_v22 = vand.u32 4294901760, %v6723_v53  ;;  %v5445_v61 = vand.u32 4294901760, %v2317_v59 }
 0x1b0   :  { %2240 = vmatprep.subr.mxu1 %v6672_v29  ;;  %2037 = vmatpush2.msra.mxu0 %v6674_v49  ;;  %v6722_v35 = vand.u32 4294901760, %v6721_v44  ;;  %v6725_v29 = vld [vmem:[#allocation95_spill] sm:$0xff]  ;;  %v6730_v49 = vand.u32 4294901760, %v6601_v4  ;;  %v5337_v4 = vand.u32 4294901760, %v2305_v38 }
 0x1b1   :  { %2242 = vmatpush2.msra.mxu1 %v6675_v2  ;;  %2041 = vmatprep.subr.mxu0 %v6677_v0  ;;  %v6732_v2 = vand.u32 4294901760, %v6603_v57  ;;  %v2304_v57 = vld [vmem:[%s5940_s5 + $0x70] sm:$0xff]  ;;  %v2303_v0 = vld [vmem:[%s5940_s5 + $0x68] sm:$0xff] }
 0x1b2   :  { %2244 = vmatprep.subr.mxu1 %v6678_v54  ;;  %2045 = vmatpush2.msra.mxu0 %v6680_v37  ;;  %v5350_v54 = vand.u32 4294901760, %v2304_v57  ;;  %v5354_v37 = vand.u32 4294901760, %v2303_v0 }
 0x1b3   :  { %2246 = vmatpush2.msra.mxu1 %v6681_v19  ;;  %2049 = vmatprep.subr.mxu0 %v6683_v36  ;;  %v2318_v19 = vld [vmem:[%s5940_s5 + $0xe0] sm:$0xff] }
 0x1b4   :  { %2248 = vmatprep.subr.mxu1 %v6684_v46  ;;  %2053 = vmatpush2.msra.mxu0 %v6686_v12  ;;  %v5366_v46 = vsub.f32 %v2305_v38, %v5337_v4  ;;  %v5371_v12 = vand.u32 4294901760, %v2318_v19 }
 0x1b5   :  { %2250 = vmatpush2.msra.mxu1 %v6687_v18  ;;  %2057 = vmatprep.subr.mxu0 %v6689_v17  ;;  %v5375_v18 = vsub.f32 %v2304_v57, %v5350_v54  ;;  %v5381_v17 = vsub.f32 %v2303_v0, %v5354_v37 }
 0x1b6   :  { %2252 = vmatprep.subr.mxu1 %v6690_v8  ;;  %2061 = vmatpush2.msra.mxu0 %v6691_v39  ;;  %v5383_v8 = vand.u32 4294901760, %v2302_v32 }
 0x1b7   :  { %2254 = vmatpush2.msra.mxu1 %v6692_v58  ;;  %2065 = vmatprep.subr.mxu0 %v6693_v24  ;;  %v6258_v58 = vand.u32 4294901760, %v5366_v46  ;;  %v6255_v42 = vand.u32 4294901760, %v5375_v18 }
 0x1b8   :  { %2256 = vmatprep.subr.mxu1 %v6694_v3  ;;  %2069 = vmatpush2.msra.mxu0 %v6696_v20  ;;  %v5390_v3 = vsub.f32 %v2318_v19, %v5371_v12  ;;  %v6253_v20 = vand.u32 4294901760, %v5378_v34  ;;  %v5397_v10 = vsub.f32 %v2302_v32, %v5383_v8 }
 0x1b9   :  { %2258 = vmatpush2.msra.mxu1 %v6697_v41  ;;  %2073 = vmatprep.subr.mxu0 %v6699_v26  ;;  %v6252_v41 = vand.u32 4294901760, %v5381_v17 }
 0x1ba   :  { %2260 = vmatprep.subr.mxu1 %v6700_v62  ;;  %2077 = vmatpush2.msra.mxu0 %v6702_v11  ;;  %v2445_v62 = vsub.f32 %v5366_v46, %v6258_v58  ;;  %v6250_v11 = vand.u32 4294901760, %v5390_v3  ;;  %v2571_v50 = vsub.f32 %v5378_v34, %v6253_v20 }
 0x1bb   :  { %2262 = vmatpush2.msra.mxu1 %v6703_v5  ;;  %2081 = vmatprep.subr.mxu0 %v6705_v16  ;;  %v2452_v5 = vsub.f32 %v5375_v18, %v6255_v42  ;;  %v2459_v16 = vsub.f32 %v5381_v17, %v6252_v41 }
 0x1bc   :  { %2264 = vmatprep.subr.mxu1 %v6706_v51  ;;  %2085 = vmatpush2.msra.mxu0 %v6708_v55  ;;  %v6249_v51 = vand.u32 4294901760, %v5397_v10  ;;  %v2301_v55 = vld [vmem:[%s5940_s5 + $0x58] sm:$0xff] }
 0x1bd   :  { %2266 = vmatpush2.msra.mxu1 %v6709_v28  ;;  %2089 = vmatprep.subr.mxu0 %v6711_v52  ;;  %v2316_v28 = vld [vmem:[%s5940_s5 + $0xd0] sm:$0xff]  ;;  %v2446_v52 = vand.u32 4294901760, %v2445_v62 }
 0x1be   :  { %2268 = vmatprep.subr.mxu1 %v6712_v27  ;;  %2093 = vmatpush2.msra.mxu0 %v6713_v40  ;;  %v2578_v40 = vsub.f32 %v5390_v3, %v6250_v11  ;;  %v5449_v44 = vand.u32 4294901760, %v2316_v28 }
 0x1bf   :  { %2270 = vmatpush2.msra.mxu1 %v6714_v33  ;;  %2097 = vmatprep.subr.mxu0 %v6716_v48  ;;  %v2300_v33 = vld [vmem:[%s5940_s5 + $0x50] sm:$0xff]  ;;  %v2453_v48 = vand.u32 4294901760, %v2452_v5 }
 0x1c0   :  { %2272 = vmatprep.subr.mxu1 %v6717_v7  ;;  %2101 = vmatpush2.msra.mxu0 %v6718_v9  ;;  %v2466_v7 = vsub.f32 %v5397_v10, %v6249_v51  ;;  %v2572_v9 = vand.u32 4294901760, %v2571_v50  ;;  %v5451_v53 = vand.u32 4294901760, %v2300_v33 }
 0x1c1   :  { %2274 = vmatpush2.msra.mxu1 %v6589_v21  ;;  %2105 = vmatprep.subr.mxu0 %v6720_v43  ;;  %v6727_v21 = vand.u32 4294901760, %v6598_v1  ;;  %v2321_v1 = vld [vmem:[%s5940_s5 + $0xf8] sm:$0xff]  ;;  %v5447_v43 = vand.u32 4294901760, %v2301_v55 }
 0x1c2   :  { %2276 = vmatprep.subr.mxu1 %v6591_v13  ;;  %2109 = vmatpush2.msra.mxu0 %v6722_v35  ;;  %v6729_v13 = vand.u32 4294901760, %v6600_v56  ;;  %v2320_v56 = vld [vmem:[%s5940_s5 + $0xf0] sm:$0xff]  ;;  %v5335_v60 = vand.u32 4294901760, %v2321_v1  ;;  %v2460_v35 = vand.u32 4294901760, %v2459_v16 }
 0x1c3   :  { %2278 = vmatpush2.msra.mxu1 %v6593_v23  ;;  %2113 = vmatprep.subr.mxu0 %v6724_v22  ;;  %v6731_v23 = vand.u32 4294901760, %v6602_v31  ;;  %v5339_v31 = vand.u32 4294901760, %v2320_v56  ;;  %v5453_v22 = vand.u32 4294901760, %v2315_v14 }
 0x1c4   :  { %2282 = vmatmul.mubr.f32.vlgmr.msra.gmra.mxu1 %v6725_v29  ;;  %2117 = vmatpush2.msra.mxu0 %v6726_v45  ;;  %6733 = vst [vmem:[#allocation3_spill] sm:$0xff] %v5335_v60  ;;  %v5363_v36 = vsub.f32 %v2321_v1, %v5335_v60  ;;  %v5456_v45 = vsub.f32 %v2317_v59, %v5445_v61  ;;  %v2299_v59 = vld [vmem:[%s5940_s5 + $0x48] sm:$0xff] }
 0x1c5   :  { %2121 = vmatprep.subr.mxu0 %v6727_v21  ;;  %v5369_v6 = vsub.f32 %v2320_v56, %v5339_v31  ;;  %v5459_v21 = vsub.f32 %v2301_v55, %v5447_v43  ;;  %v5498_v55 = vand.u32 4294901760, %v2299_v59 }
 0x1c6   :  { %2125 = vmatpush2.msra.mxu0 %v6728_v47  ;;  %6734 = vst [vmem:[#allocation14_spill] sm:$0xff] %v5363_v36  ;;  %v6260_v39 = vand.u32 4294901760, %v5363_v36  ;;  %v5462_v47 = vsub.f32 %v2316_v28, %v5449_v44  ;;  %v2314_v28 = vld [vmem:[%s5940_s5 + $0xc0] sm:$0xff] }
 0x1c7   :  { %2129 = vmatprep.subr.mxu0 %v6729_v13  ;;  %v6257_v24 = vand.u32 4294901760, %v5369_v6  ;;  %v2467_v13 = vand.u32 4294901760, %v2466_v7  ;;  %v6246_v1 = vand.u32 4294901760, %v5459_v21  ;;  %v2297_v7 = vld [vmem:[%s5940_s5 + $0x38] sm:$0xff] }
 0x1c8   :  { %2133 = vmatpush2.msra.mxu0 %v6730_v49  ;;  %v2557_v26 = vsub.f32 %v5363_v36, %v6260_v39  ;;  %v5466_v49 = vsub.f32 %v2300_v33, %v5451_v53  ;;  %v6244_v38 = vand.u32 4294901760, %v5462_v47  ;;  %v2313_v33 = vld [vmem:[%s5940_s5 + $0xb8] sm:$0xff] }
 0x1c9   :  { %2137 = vmatprep.subr.mxu0 %v6731_v23  ;;  %v2564_v25 = vsub.f32 %v5369_v6, %v6257_v24  ;;  %v5469_v23 = vsub.f32 %v2315_v14, %v5453_v22  ;;  %v2473_v0 = vsub.f32 %v5459_v21, %v6246_v1 }
 0x1ca   :  { %2141 = vmatpush2.msra.mxu0 %v6732_v2  ;;  %v2558_v30 = vand.u32 4294901760, %v2557_v26  ;;  %v6247_v2 = vand.u32 4294901760, %v5456_v45  ;;  %v6243_v56 = vand.u32 4294901760, %v5466_v49  ;;  %v2592_v19 = vsub.f32 %v5462_v47, %v6244_v38 }
 0x1cb   :  { %2145 = vmatmul.mubr.f32.vlgmr.msra.gmra.mxu0 %v6725_v29  ;;  %3198 = vmatprep.subr.mxu0 %v5335_v60  ;;  %v2565_v27 = vand.u32 4294901760, %v2564_v25  ;;  %v2579_v29 = vand.u32 4294901760, %v2578_v40  ;;  %v6242_v57 = vand.u32 4294901760, %v5469_v23  ;;  %v2474_v25 = vand.u32 4294901760, %v2473_v0 }
 0x1cc   :  { %3199 = vmatpush3.msra.mxu0 %v5337_v4  ;;  %3233 = vmatprep.subr.mxu1 %v2558_v30  ;;  %v2585_v63 = vsub.f32 %v5456_v45, %v6247_v2  ;;  %v2480_v32 = vsub.f32 %v5466_v49, %v6243_v56  ;;  %v2593_v5 = vand.u32 4294901760, %v2592_v19  ;;  %v5503_v30 = vand.u32 4294901760, %v2314_v28 }
 0x1cd   :  { %3200 = vmatprep.subr.mxu0 %v5339_v31  ;;  %3234 = vmatpush3.msra.mxu1 %v2446_v52  ;;  %v2599_v26 = vsub.f32 %v5469_v23, %v6242_v57  ;;  %v2298_v52 = vld [vmem:[%s5940_s5 + $0x40] sm:$0xff] }
 0x1ce   :  { %3201 = vmatpush3.msra.mxu0 %v5350_v54  ;;  %3235 = vmatprep.subr.mxu1 %v2565_v27  ;;  %v2586_v62 = vand.u32 4294901760, %v2585_v63  ;;  %v2481_v50 = vand.u32 4294901760, %v2480_v32  ;;  %v5509_v27 = vsub.f32 %v2299_v59, %v5498_v55  ;;  %v5511_v40 = vand.u32 4294901760, %v2298_v52  ;;  %v2296_v32 = vld [vmem:[%s5940_s5 + $0x30] sm:$0xff] }
 0x1cf   :  { %3202 = vmatprep.subr.mxu0 %v5352_v15  ;;  %3236 = vmatpush3.msra.mxu1 %v2453_v48  ;;  %v2600_v16 = vand.u32 4294901760, %v2599_v26  ;;  %v5518_v14 = vsub.f32 %v2314_v28, %v5503_v30  ;;  %v5520_v48 = vand.u32 4294901760, %v2313_v33 }
 0x1d0   :  { %3203 = vmatpush3.msra.mxu0 %v5354_v37  ;;  %3237 = vmatprep.subr.mxu1 %v2572_v9  ;;  %v6240_v9 = vand.u32 4294901760, %v5509_v27 }
 0x1d1   :  { %3204 = vmatprep.subr.mxu0 %v5371_v12  ;;  %3238 = vmatpush3.msra.mxu1 %v2460_v35  ;;  %v5528_v35 = vsub.f32 %v2298_v52, %v5511_v40  ;;  %v6241_v63 = vand.u32 4294901760, %v5518_v14  ;;  %v5538_v0 = vsub.f32 %v2313_v33, %v5520_v48  ;;  %v2295_v33 = vld [vmem:[%s5940_s5 + $0x28] sm:$0xff] }
 0x1d2   :  { %3205 = vmatpush3.msra.mxu0 %v5383_v8  ;;  %3239 = vmatprep.subr.mxu1 %v2579_v29  ;;  %v5530_v29 = vand.u32 4294901760, %v2297_v7  ;;  %v2487_v26 = vsub.f32 %v5509_v27, %v6240_v9 }
 0x1d3   :  { %3206 = vmatprep.subr.mxu0 %v5445_v61  ;;  %3240 = vmatpush3.msra.mxu1 %v2467_v13  ;;  %v2312_v13 = vld [vmem:[%s5940_s5 + $0xb0] sm:$0xff]  ;;  %v6248_v59 = vand.u32 4294901760, %v5538_v0 }
 0x1d4   :  { %3207 = vmatpush3.msra.mxu0 %v5447_v43  ;;  %3241 = vmatprep.subr.mxu1 %v2586_v62  ;;  %v5540_v19 = vand.u32 4294901760, %v2312_v13  ;;  %v6245_v62 = vand.u32 4294901760, %v5528_v35 }
 0x1d5   :  { %3208 = vmatprep.subr.mxu0 %v5449_v44  ;;  %3242 = vmatpush3.msra.mxu1 %v2474_v25  ;;  %v5551_v25 = vsub.f32 %v2297_v7, %v5530_v29  ;;  %v2488_v7 = vand.u32 4294901760, %v2487_v26  ;;  %v2613_v26 = vsub.f32 %v5538_v0, %v6248_v59  ;;  %v5598_v59 = vand.u32 4294901760, %v2295_v33 }
 0x1d6   :  { %3209 = vmatpush3.msra.mxu0 %v5451_v53  ;;  %3243 = vmatprep.subr.mxu1 %v2593_v5  ;;  %v5553_v5 = vand.u32 4294901760, %v2296_v32  ;;  %v5564_v28 = vsub.f32 %v2312_v13, %v5540_v19  ;;  %v2494_v9 = vsub.f32 %v5528_v35, %v6245_v62  ;;  %v2310_v13 = vld [vmem:[%s5940_s5 + $0xa0] sm:$0xff] }
 0x1d7   :  { %3210 = vmatprep.subr.mxu0 %v5453_v22  ;;  %3244 = vmatpush3.msra.mxu1 %v2481_v50  ;;  %6735 = vst [vmem:[#allocation4_spill] sm:$0xff] %v5551_v25  ;;  %v2311_v50 = vld [vmem:[%s5940_s5 + $0xa8] sm:$0xff]  ;;  %v2614_v51 = vand.u32 4294901760, %v2613_v26 }
 0x1d8   :  { %3245 = vmatprep.subr.mxu1 %v2600_v16  ;;  %3211 = vmatpush3.msra.mxu0 %v5498_v55  ;;  %v2606_v16 = vsub.f32 %v5518_v14, %v6241_v63  ;;  %6736 = vst [vmem:[#allocation16_spill] sm:$0xff] %v5564_v28  ;;  %v5566_v52 = vand.u32 4294901760, %v2311_v50  ;;  %v6251_v63 = vand.u32 4294901760, %v5551_v25  ;;  %v5577_v57 = vsub.f32 %v2296_v32, %v5553_v5  ;;  %v2294_v32 = vld [vmem:[%s5940_s5 + $0x20] sm:$0xff] }
 0x1d9   :  { %3212 = vmatprep.subr.mxu0 %v5503_v30  ;;  %v6254_v38 = vand.u32 4294901760, %v5564_v28  ;;  %3246 = vmatpush3.msra.mxu1 %v2488_v7  ;;  %v2495_v1 = vand.u32 4294901760, %v2494_v9  ;;  %v5607_v7 = vand.u32 4294901760, %v2310_v13  ;;  %v5618_v26 = vand.u32 4294901760, %v2294_v32 }
 0x1da   :  { %3213 = vmatpush3.msra.mxu0 %v5511_v40  ;;  %6737 = vst [vmem:[#allocation5_spill] sm:$0xff] %v5577_v57  ;;  %v2607_v56 = vand.u32 4294901760, %v2606_v16  ;;  %v5588_v62 = vsub.f32 %v2311_v50, %v5566_v52  ;;  %v2501_v16 = vsub.f32 %v5551_v25, %v6251_v63  ;;  %v6256_v2 = vand.u32 4294901760, %v5577_v57  ;;  %v2309_v50 = vld [vmem:[%s5940_s5 + $0x98] sm:$0xff] }
 0x1db   :  { %3214 = vmatprep.subr.mxu0 %v5520_v48  ;;  %v2620_v11 = vsub.f32 %v5564_v28, %v6254_v38  ;;  %v2293_v63 = vld [vmem:[%s5940_s5 + $0x18] sm:$0xff]  ;;  %v2308_v38 = vld [vmem:[%s5940_s5 + $0x90] sm:$0xff]  ;;  %v5635_v58 = vsub.f32 %v2294_v32, %v5618_v26 }
 0x1dc   :  { %3215 = vmatpush3.msra.mxu0 %v5530_v29  ;;  %6738 = vst [vmem:[#allocation18_spill] sm:$0xff] %v5588_v62  ;;  %3247 = vmatprep.subr.mxu1 %v2607_v56  ;;  %v6259_v9 = vand.u32 4294901760, %v5588_v62  ;;  %v2502_v41 = vand.u32 4294901760, %v2501_v16  ;;  %v2508_v20 = vsub.f32 %v5577_v57, %v6256_v2  ;;  %v5616_v56 = vsub.f32 %v2295_v33, %v5598_v59 }
 0x1dd   :  { %3216 = vmatprep.subr.mxu0 %v5540_v19  ;;  %3248 = vmatpush3.msra.mxu1 %v2495_v1  ;;  %v2621_v42 = vand.u32 4294901760, %v2620_v11  ;;  %v5628_v16 = vsub.f32 %v2310_v13, %v5607_v7  ;;  %v5630_v2 = vand.u32 4294901760, %v2309_v50  ;;  %6742 = vst [vmem:[#allocation11_spill] sm:$0xff] %v5635_v58  ;;  %v2292_v11 = vld [vmem:[%s5940_s5 + $0x10] sm:$0xff]  ;;  %v6271_v39 = vand.u32 4294901760, %v5635_v58 }
 0x1de   :  { %3217 = vmatpush3.msra.mxu0 %v5553_v5  ;;  %6739 = vst [vmem:[#allocation6_spill] sm:$0xff] %v5616_v56  ;;  %3249 = vmatprep.subr.mxu1 %v2614_v51  ;;  %v2627_v1 = vsub.f32 %v5588_v62, %v6259_v9  ;;  %v2509_v33 = vand.u32 4294901760, %v2508_v20  ;;  %v6263_v24 = vand.u32 4294901760, %v5616_v56  ;;  %v5637_v51 = vand.u32 4294901760, %v2293_v63 }
 0x1df   :  { %3218 = vmatprep.subr.mxu0 %v5566_v52  ;;  %6740 = vst [vmem:[#allocation20_spill] sm:$0xff] %v5628_v16  ;;  %6741 = vst [vmem:[#allocation7_spill] sm:$0xff] %v5630_v2  ;;  %3250 = vmatpush3.msra.mxu1 %v2502_v41  ;;  %v6264_v9 = vand.u32 4294901760, %v5628_v16  ;;  %v5645_v41 = vsub.f32 %v2309_v50, %v5630_v2  ;;  %v5647_v20 = vand.u32 4294901760, %v2308_v38 }
 0x1e0   :  { %3219 = vmatpush3.msra.mxu0 %v5598_v59  ;;  %6743 = vst [vmem:[#allocation8_spill] sm:$0xff] %v5637_v51  ;;  %3251 = vmatprep.subr.mxu1 %v2621_v42  ;;  %v2628_v13 = vand.u32 4294901760, %v2627_v1  ;;  %v2515_v32 = vsub.f32 %v5616_v56, %v6263_v24  ;;  %v5655_v62 = vsub.f32 %v2293_v63, %v5637_v51  ;;  %v2307_v24 = vld [vmem:[%s5940_s5 + $0x88] sm:$0xff] }
 0x1e1   :  { %3220 = vmatprep.subr.mxu0 %v5607_v7  ;;  %6744 = vst [vmem:[#allocation21_spill] sm:$0xff] %v5645_v41  ;;  %6745 = vst [vmem:[#allocation9_spill] sm:$0xff] %v5647_v20  ;;  %3252 = vmatpush3.msra.mxu1 %v2509_v33  ;;  %v2634_v42 = vsub.f32 %v5628_v16, %v6264_v9  ;;  %v5663_v1 = vsub.f32 %v2308_v38, %v5647_v20  ;;  %v5665_v33 = vand.u32 4294901760, %v2292_v11  ;;  %v2291_v9 = vld [vmem:[%s5940_s5 + $0x8] sm:$0xff] }
 0x1e2   :  { %3221 = vmatpush3.msra.mxu0 %v5618_v26  ;;  %6746 = vst [vmem:[#allocation56_spill] sm:$0xff] %v5655_v62  ;;  %3253 = vmatprep.subr.mxu1 %v2628_v13  ;;  %v2516_v63 = vand.u32 4294901760, %v2515_v32  ;;  %v2522_v13 = vsub.f32 %v5635_v58, %v6271_v39  ;;  %v6749_v38 = vand.u32 4294901760, %v5645_v41  ;;  %v2306_v32 = vld [vmem:[%s5940_s5 + $0x80] sm:$0xff]  ;;  %v6752_v57 = vand.u32 4294901760, %v5655_v62 }
 0x1e3   :  { %3222 = vmatprep.subr.mxu0 %v5630_v2  ;;  %6747 = vst [vmem:[#allocation57_spill] sm:$0xff] %v5663_v1  ;;  %6748 = vst [vmem:[#allocation72_spill] sm:$0xff] %v5665_v33  ;;  %v2635_v50 = vand.u32 4294901760, %v2634_v42  ;;  %v2290_v39 = vld [vmem:[%s5940_s5] sm:$0xff]  ;;  %v5690_v58 = vsub.f32 %v2292_v11, %v5665_v33 }
 0x1e4   :  { %3223 = vmatpush3.msra.mxu0 %v5637_v51  ;;  %v2641_v16 = vsub.f32 %v5645_v41, %v6749_v38  ;;  %3254 = vmatpush3.msra.mxu1 %v2516_v63  ;;  %v2523_v42 = vand.u32 4294901760, %v2522_v13  ;;  %v5692_v38 = vand.u32 4294901760, %v2307_v24  ;;  %v2529_v41 = vsub.f32 %v5655_v62, %v6752_v57 }
 0x1e5   :  { %3224 = vmatprep.subr.mxu0 %v5647_v20  ;;  %6750 = vst [vmem:[#allocation74_spill] sm:$0xff] %v5690_v58  ;;  %3255 = vmatprep.subr.mxu1 %v2635_v50  ;;  %v6753_v20 = vand.u32 4294901760, %v5663_v1  ;;  %v5700_v51 = vand.u32 4294901760, %v2291_v9  ;;  %v6287_v63 = vand.u32 4294901760, %v5690_v58  ;;  %v5706_v13 = vand.u32 4294901760, %v2306_v32 }
 0x1e6   :  { %3225 = vmatpush3.msra.mxu0 %v5665_v33  ;;  %6751 = vst [vmem:[#allocation84_spill] sm:$0xff] %v5692_v38  ;;  %v2642_v56 = vand.u32 4294901760, %v2641_v16  ;;  %3256 = vmatpush3.msra.mxu1 %v2523_v42  ;;  %v5704_v11 = vsub.f32 %v2307_v24, %v5692_v38  ;;  %v5708_v50 = vand.u32 4294901760, %v2290_v39  ;;  %v2530_v57 = vand.u32 4294901760, %v2529_v41 }
 0x1e7   :  { %v2648_v28 = vsub.f32 %v5663_v1, %v6753_v20  ;;  %6754 = vst [vmem:[#allocation85_spill] sm:$0xff] %v5700_v51  ;;  %6756 = vst [vmem:[#allocation2_spill] sm:$0xff] %v5706_v13  ;;  %3226 = vmatprep.subr.mxu0 %v5692_v38  ;;  %v5712_v62 = vsub.f32 %v2291_v9, %v5700_v51  ;;  %v2536_v20 = vsub.f32 %v5690_v58, %v6287_v63 }
 0x1e8   :  { %6755 = vst [vmem:[#allocation92_spill] sm:$0xff] %v5704_v11  ;;  %6757 = vst [vmem:[#allocation86_spill] sm:$0xff] %v5708_v50  ;;  %3257 = vmatprep.subr.mxu1 %v2642_v56  ;;  %3227 = vmatpush3.msra.mxu0 %v5700_v51  ;;  %v6286_v24 = vand.u32 4294901760, %v5704_v11  ;;  %v5720_v42 = vsub.f32 %v2306_v32, %v5706_v13  ;;  %v5723_v1 = vsub.f32 %v2290_v39, %v5708_v50 }
 0x1e9   :  { %v2649_v16 = vand.u32 4294901760, %v2648_v28  ;;  %6758 = vst [vmem:[#allocation87_spill] sm:$0xff] %v5712_v62  ;;  %3228 = vmatprep.subr.mxu0 %v5706_v13  ;;  %3258 = vmatpush3.msra.mxu1 %v2530_v57  ;;  %v6290_v28 = vand.u32 4294901760, %v5712_v62  ;;  %v2537_v9 = vand.u32 4294901760, %v2536_v20 }
 0x1ea   :  { %6759 = vst [vmem:[#allocation88_spill] sm:$0xff] %v5720_v42  ;;  %6760 = vst [vmem:[#allocation89_spill] sm:$0xff] %v5723_v1  ;;  %3229 = vmatpush3.msra.mxu0 %v5708_v50  ;;  %v2655_v56 = vsub.f32 %v5704_v11, %v6286_v24  ;;  %v6291_v41 = vand.u32 4294901760, %v5720_v42  ;;  %v6295_v32 = vand.u32 4294901760, %v5723_v1 }
 0x1eb   :  { %3259 = vmatprep.subr.mxu1 %v2649_v16  ;;  %3268 = vmatprep.subr.mxu0 %v5363_v36  ;;  %v2543_v39 = vsub.f32 %v5712_v62, %v6290_v28  ;;  %v6761_v28 = vld [vmem:[#allocation94_spill] sm:$0xff] }
 0x1ec   :  { %3260 = vmatpush3.msra.mxu1 %v2537_v9  ;;  %v2656_v57 = vand.u32 4294901760, %v2655_v56  ;;  %v2662_v16 = vsub.f32 %v5720_v42, %v6291_v41  ;;  %v2550_v20 = vsub.f32 %v5723_v1, %v6295_v32  ;;  %v992_v9 = vld [vmem:[%s5941_s4] sm:$0x3]  ;;  %v6762_v41 = vsub.s32 0, %v6761_v28 }
 0x1ed   :  { %v2544_v24 = vand.u32 4294901760, %v2543_v39  ;;  %v6763_v42 = vsub.s32 1, %v6761_v28 }
 0x1ee   :  { %3261 = vmatprep.subr.mxu1 %v2656_v57  ;;  %v2663_v63 = vand.u32 4294901760, %v2662_v16  ;;  %v2551_v11 = vand.u32 4294901760, %v2550_v20  ;;  %v997_v36 = vrot.slane %v992_v9, %v6762_v41 }
 0x1ef   :  { %3262 = vmatpush3.msra.mxu1 %v2544_v24  ;;  %v1001_v32 = vrot.slane %v992_v9, %v6763_v42 }
 0x1f0   :  { %3263 = vmatprep.subr.mxu1 %v2663_v63 }
 0x1f1   :  { %3264 = vmatpush3.msra.mxu1 %v2551_v11 }
 0x1f2   :  { %3303 = vmatprep.subr.mxu1 %v5335_v60 }
 0x201   :  { %v1537_v39 = vpop.f32.mrf.mxu1 }
 0x203   :  { %v1539_v63 = vpop.f32.mrf.mxu1 }
 0x209   :  { %v1144_v56 = vpop.f32.mrf.mxu0 }
 0x20a   :  { %v1145_v16 = vadd.f32 %v1144_v56, %v997_v36 }
 0x20b   :  { %v1146_v57 = vpop.f32.mrf.mxu0 }
 0x20c   :  { %v1147_v24 = vadd.f32 %v1146_v57, %v1001_v32  ;;  %v1538_v11 = vadd.f32 %v1537_v39, %v1145_v16 }
 0x20e   :  { %v1540_v60 = vadd.f32 %v1539_v63, %v1147_v24  ;;  %v6769_v24 = vld [vmem:[#allocation5_spill] sm:$0xff]  ;;  %v6770_v63 = vld [vmem:[#allocation72_spill] sm:$0xff] }
 0x242   :  { %v1881_v1 = vpop.f32.mrf.mxu1 }
 0x244   :  { %v1883_v13 = vpop.f32.mrf.mxu1 }
 0x24a   :  { %v1740_v20 = vpop.f32.mrf.mxu0 }
 0x24b   :  { %v1741_v58 = vadd.f32 %v1740_v20, %v1538_v11  ;;  %v6768_v20 = vld [vmem:[#allocation9_spill] sm:$0xff]  ;;  %v6771_v11 = vld [vmem:[#allocation18_spill] sm:$0xff] }
 0x24c   :  { %v1742_v62 = vpop.f32.mrf.mxu0 }
 0x24d   :  { %v1743_v50 = vadd.f32 %v1742_v62, %v1540_v60  ;;  %v1882_v51 = vadd.f32 %v1881_v1, %v1741_v58 }
 0x24f   :  { %v1884_v25 = vadd.f32 %v1883_v13, %v1743_v50  ;;  %v6766_v13 = vld [vmem:[#allocation8_spill] sm:$0xff] }
 0x250   :  { %v6767_v50 = vld [vmem:[#allocation16_spill] sm:$0xff] }
 0x284   :  { %v2283_v38 = vpop.f32.mrf.mxu1 }
 0x286   :  { %v2285_v2 = vpop.f32.mrf.mxu1 }
 0x28b   :  { %v2146_v33 = vpop.f32.mrf.mxu0 }
 0x28c   :  { %v2147_v41 = vadd.f32 %v2146_v33, %v1882_v51  ;;  %v6764_v33 = vld [vmem:[#allocation7_spill] sm:$0xff] }
 0x28d   :  { %v2148_v28 = vpop.f32.mrf.mxu0 }
 0x28e   :  { %v2284_v42 = vadd.f32 %v2283_v38, %v2147_v41  ;;  %v2149_v9 = vadd.f32 %v2148_v28, %v1884_v25  ;;  %v6765_v38 = vld [vmem:[#allocation4_spill] sm:$0xff]  ;;  %v6773_v28 = vld [vmem:[#allocation6_spill] sm:$0xff] }
 0x28f   :  { %v6772_v41 = vld [vmem:[#allocation84_spill] sm:$0xff] }
 0x290   :  { %v2288_v36 = vmax.f32 %v2284_v42, 0.0  ;;  %v2286_v56 = vadd.f32 %v2285_v2, %v2149_v9  ;;  %v6774_v42 = vld [vmem:[#allocation85_spill] sm:$0xff]  ;;  %v6775_v9 = vld [vmem:[#allocation20_spill] sm:$0xff] }
 0x292   :  { %v5751_v32 = vand.u32 4294901760, %v2288_v36  ;;  %v2289_v39 = vmax.f32 %v2286_v56, 0.0  ;;  %v6777_v56 = vld [vmem:[#allocation11_spill] sm:$0xff] }
 0x294   :  { %v5754_v57 = vsub.f32 %v2288_v36, %v5751_v32  ;;  %v5756_v16 = vand.u32 4294901760, %v2289_v39  ;;  %v6776_v36 = vld [vmem:[#allocation2_spill] sm:$0xff] }
 0x296   :  { %v2433_v60 = vand.u32 4294901760, %v5754_v57  ;;  %v2426_v58 = vsub.f32 %v2289_v39, %v5756_v16  ;;  %2666 = vmatprep.mubr.f32.mxu1 %v5756_v16  ;;  %v6778_v39 = vld [vmem:[#allocation86_spill] sm:$0xff] }
 0x297   :  { %2668 = vmatmul.mubr.f32.vlgmr.msra.gmra.mxu1 %v5751_v32 }
 0x298   :  { %3304 = vmatpush3.msra.mxu1 %v5337_v4  ;;  %v2427_v62 = vand.u32 4294901760, %v2426_v58  ;;  %v2434_v2 = vsub.f32 %v5754_v57, %v2433_v60 }
 0x299   :  { %3305 = vmatprep.subr.mxu1 %v5339_v31 }
 0x29a   :  { %3306 = vmatpush3.msra.mxu1 %v5350_v54  ;;  %2910 = vmatprep.mubr.f32.mxu1 %v2427_v62  ;;  %v2428_v25 = vsub.f32 %v2426_v58, %v2427_v62  ;;  %v2435_v1 = vand.u32 4294901760, %v2434_v2  ;;  %v6780_v62 = vld [vmem:[#allocation3_spill] sm:$0xff]  ;;  %v6781_v2 = vld [vmem:[#allocation56_spill] sm:$0xff] }
 0x29b   :  { %3307 = vmatprep.subr.mxu1 %v5352_v15 }
 0x29c   :  { %3308 = vmatpush3.msra.mxu1 %v5354_v37  ;;  %v2429_v51 = vand.u32 4294901760, %v2428_v25  ;;  %v6782_v25 = vld [vmem:[#allocation57_spill] sm:$0xff] }
 0x29d   :  { %3309 = vmatprep.subr.mxu1 %v5371_v12 }
 0x29e   :  { %3310 = vmatpush3.msra.mxu1 %v5383_v8  ;;  %2430 = vmatprep.mubr.f32.mxu0 %v2429_v51  ;;  %v6783_v51 = vld [vmem:[#allocation74_spill] sm:$0xff] }
 0x29f   :  { %3311 = vmatprep.subr.mxu1 %v5445_v61  ;;  %2436 = vmatmul.mubr.f32.vlgmr.msra.gmra.mxu0 %v2435_v1  ;;  %v6784_v1 = vld [vmem:[#allocation92_spill] sm:$0xff] }
 0x2a0   :  { %3269 = vmatpush3.msra.mxu0 %v5366_v46  ;;  %3312 = vmatpush3.msra.mxu1 %v5447_v43 }
 0x2a1   :  { %3270 = vmatprep.subr.mxu0 %v5369_v6  ;;  %2803 = vmatprep.mubr.f32.mxu0 %v2426_v58  ;;  %v6779_v58 = vld [vmem:[#allocation21_spill] sm:$0xff] }
 0x2a2   :  { %3313 = vmatprep.subr.mxu1 %v5449_v44  ;;  %3271 = vmatpush3.msra.mxu0 %v5375_v18 }
 0x2a3   :  { %3314 = vmatpush3.msra.mxu1 %v5451_v53  ;;  %3272 = vmatprep.subr.mxu0 %v5378_v34 }
 0x2a4   :  { %3315 = vmatprep.subr.mxu1 %v5453_v22  ;;  %3273 = vmatpush3.msra.mxu0 %v5381_v17 }
 0x2a5   :  { %3316 = vmatpush3.msra.mxu1 %v5498_v55  ;;  %3274 = vmatprep.subr.mxu0 %v5390_v3 }
 0x2a6   :  { %3317 = vmatprep.subr.mxu1 %v5503_v30  ;;  %3275 = vmatpush3.msra.mxu0 %v5397_v10 }
 0x2a7   :  { %3318 = vmatpush3.msra.mxu1 %v5511_v40  ;;  %3276 = vmatprep.subr.mxu0 %v5456_v45 }
 0x2a8   :  { %3319 = vmatprep.subr.mxu1 %v5520_v48  ;;  %3277 = vmatpush3.msra.mxu0 %v5459_v21 }
 0x2a9   :  { %3320 = vmatpush3.msra.mxu1 %v5530_v29  ;;  %3278 = vmatprep.subr.mxu0 %v5462_v47 }
 0x2aa   :  { %3321 = vmatprep.subr.mxu1 %v5540_v19  ;;  %3279 = vmatpush3.msra.mxu0 %v5466_v49 }
 0x2ab   :  { %3322 = vmatpush3.msra.mxu1 %v5553_v5  ;;  %3280 = vmatprep.subr.mxu0 %v5469_v23 }
 0x2ac   :  { %3323 = vmatprep.subr.mxu1 %v5566_v52  ;;  %3281 = vmatpush3.msra.mxu0 %v5509_v27 }
 0x2ad   :  { %3324 = vmatpush3.msra.mxu1 %v5598_v59  ;;  %3282 = vmatprep.subr.mxu0 %v5518_v14 }
 0x2ae   :  { %3325 = vmatprep.subr.mxu1 %v5607_v7  ;;  %3283 = vmatpush3.msra.mxu0 %v5528_v35 }
 0x2af   :  { %3326 = vmatpush3.msra.mxu1 %v5618_v26  ;;  %3284 = vmatprep.subr.mxu0 %v5538_v0 }
 0x2b0   :  { %3327 = vmatprep.subr.mxu1 %v6764_v33  ;;  %3285 = vmatpush3.msra.mxu0 %v6765_v38 }
 0x2b1   :  { %3328 = vmatpush3.msra.mxu1 %v6766_v13  ;;  %3286 = vmatprep.subr.mxu0 %v6767_v50 }
 0x2b2   :  { %3329 = vmatprep.subr.mxu1 %v6768_v20  ;;  %3287 = vmatpush3.msra.mxu0 %v6769_v24 }
 0x2b3   :  { %3330 = vmatpush3.msra.mxu1 %v6770_v63  ;;  %3288 = vmatprep.subr.mxu0 %v6771_v11 }
 0x2b4   :  { %3331 = vmatprep.subr.mxu1 %v6772_v41  ;;  %3289 = vmatpush3.msra.mxu0 %v6773_v28 }
 0x2b5   :  { %3332 = vmatpush3.msra.mxu1 %v6774_v42  ;;  %3290 = vmatprep.subr.mxu0 %v6775_v9 }
 0x2b6   :  { %3333 = vmatprep.subr.mxu1 %v6776_v36  ;;  %3291 = vmatpush3.msra.mxu0 %v6777_v56 }
 0x2b7   :  { %3334 = vmatpush3.msra.mxu1 %v6778_v39  ;;  %3292 = vmatprep.subr.mxu0 %v6779_v58 }
 0x2b8   :  { %2914 = vmatmul.mubr.f32.vlgmr.msra.gmra.mxu1 %v2433_v60  ;;  %3373 = vmatprep.subr.mxu1 %v6780_v62  ;;  %v6785_v60 = vld [vmem:[#allocation87_spill] sm:$0xff]  ;;  %v6786_v62 = vld [vmem:[#allocation88_spill] sm:$0xff] }
 0x2b9   :  { %3293 = vmatpush3.msra.mxu0 %v6781_v2  ;;  %3374 = vmatpush3.msra.mxu1 %v5337_v4  ;;  %v6787_v4 = vld [vmem:[#allocation89_spill] sm:$0xff] }
 0x2ba   :  { %3184 = vmatprep.mubr.f32.mxu1 %v5756_v16  ;;  %3294 = vmatprep.subr.mxu0 %v6782_v25 }
 0x2bb   :  { %3375 = vmatprep.subr.mxu1 %v5339_v31  ;;  %3295 = vmatpush3.msra.mxu0 %v6783_v51  ;;  %v6788_v31 = vld [vmem:[#allocation14_spill] sm:$0xff] }
 0x2bc   :  { %3376 = vmatpush3.msra.mxu1 %v5350_v54  ;;  %3296 = vmatprep.subr.mxu0 %v6784_v1  ;;  %v6789_v54 = vand.u32 4294901760, %v6788_v31 }
 0x2bd   :  { %3377 = vmatprep.subr.mxu1 %v5352_v15  ;;  %3297 = vmatpush3.msra.mxu0 %v6785_v60  ;;  %v6790_v15 = vand.u32 4294901760, %v5366_v46  ;;  %v6794_v46 = vand.u32 4294901760, %v5381_v17  ;;  %v6798_v17 = vand.u32 4294901760, %v5459_v21  ;;  %v6807_v21 = vand.u32 4294901760, %v6767_v50 }
 0x2be   :  { %3378 = vmatpush3.msra.mxu1 %v5354_v37  ;;  %3298 = vmatprep.subr.mxu0 %v6786_v62  ;;  %v6791_v37 = vand.u32 4294901760, %v5369_v6  ;;  %v6795_v6 = vand.u32 4294901760, %v5390_v3  ;;  %v6799_v3 = vand.u32 4294901760, %v5462_v47  ;;  %v6808_v47 = vand.u32 4294901760, %v6769_v24 }
 0x2bf   :  { %3379 = vmatprep.subr.mxu1 %v5371_v12  ;;  %3299 = vmatpush3.msra.mxu0 %v6787_v4  ;;  %v6792_v12 = vand.u32 4294901760, %v5375_v18  ;;  %v6796_v18 = vand.u32 4294901760, %v5397_v10  ;;  %v6800_v10 = vand.u32 4294901760, %v5466_v49  ;;  %v6809_v49 = vand.u32 4294901760, %v6771_v11 }
 0x2c0   :  { %3380 = vmatpush3.msra.mxu1 %v5383_v8  ;;  %2806 = vmatmul.mubr.f32.vlgmr.msra.gmra.mxu0 %v5754_v57  ;;  %v6793_v8 = vand.u32 4294901760, %v5378_v34  ;;  %v6797_v34 = vand.u32 4294901760, %v5456_v45  ;;  %v6806_v45 = vand.u32 4294901760, %v6765_v38 }
 0x2c1   :  { %3338 = vmatprep.subr.mxu0 %v6789_v54  ;;  %3381 = vmatprep.subr.mxu1 %v5445_v61  ;;  %v6801_v61 = vand.u32 4294901760, %v5469_v23  ;;  %v6810_v23 = vand.u32 4294901760, %v6773_v28 }
 0x2c2   :  { %3339 = vmatpush3.msra.mxu0 %v6790_v15  ;;  %3080 = vmatprep.mubr.f32.mxu0 %v5756_v16  ;;  %v3197_v16 = vld [vmem:[%s5942_s6] ss:$0 sm:$0xff] }
 0x2c3   :  { %3382 = vmatpush3.msra.mxu1 %v5447_v43  ;;  %3340 = vmatprep.subr.mxu0 %v6791_v37  ;;  %v6802_v43 = vand.u32 4294901760, %v5509_v27  ;;  %v6813_v27 = vand.u32 4294901760, %v6779_v58 }
 0x2c4   :  { %3383 = vmatprep.subr.mxu1 %v5449_v44  ;;  %3341 = vmatpush3.msra.mxu0 %v6792_v12  ;;  %v6803_v44 = vand.u32 4294901760, %v5518_v14  ;;  %v6815_v14 = vand.u32 4294901760, %v6782_v25 }
 0x2c5   :  { %3384 = vmatpush3.msra.mxu1 %v5451_v53  ;;  %3342 = vmatprep.subr.mxu0 %v6793_v8  ;;  %v6804_v53 = vand.u32 4294901760, %v5528_v35  ;;  %v6817_v35 = vand.u32 4294901760, %v6784_v1 }
 0x2c6   :  { %3385 = vmatprep.subr.mxu1 %v5453_v22  ;;  %3343 = vmatpush3.msra.mxu0 %v6794_v46  ;;  %v6805_v22 = vand.u32 4294901760, %v5538_v0  ;;  %v6819_v0 = vand.u32 4294901760, %v6786_v62 }
 0x2c7   :  { %3386 = vmatpush3.msra.mxu1 %v5498_v55  ;;  %3344 = vmatprep.subr.mxu0 %v6795_v6  ;;  %v6811_v55 = vand.u32 4294901760, %v6775_v9 }
 0x2c8   :  { %3387 = vmatprep.subr.mxu1 %v5503_v30  ;;  %3345 = vmatpush3.msra.mxu0 %v6796_v18  ;;  %v6812_v30 = vand.u32 4294901760, %v6777_v56 }
 0x2c9   :  { %3388 = vmatpush3.msra.mxu1 %v5511_v40  ;;  %3346 = vmatprep.subr.mxu0 %v6797_v34  ;;  %v6814_v40 = vand.u32 4294901760, %v6781_v2 }
 0x2ca   :  { %3389 = vmatprep.subr.mxu1 %v5520_v48  ;;  %3347 = vmatpush3.msra.mxu0 %v6798_v17  ;;  %v6816_v48 = vand.u32 4294901760, %v6783_v51 }
 0x2cb   :  { %3390 = vmatpush3.msra.mxu1 %v5530_v29  ;;  %3348 = vmatprep.subr.mxu0 %v6799_v3  ;;  %v6818_v29 = vand.u32 4294901760, %v6785_v60 }
 0x2cc   :  { %3391 = vmatprep.subr.mxu1 %v5540_v19  ;;  %3349 = vmatpush3.msra.mxu0 %v6800_v10  ;;  %v6820_v19 = vand.u32 4294901760, %v6787_v4 }
 0x2cd   :  { %3392 = vmatpush3.msra.mxu1 %v5553_v5  ;;  %3350 = vmatprep.subr.mxu0 %v6801_v61 }
 0x2ce   :  { %3393 = vmatprep.subr.mxu1 %v5566_v52  ;;  %3351 = vmatpush3.msra.mxu0 %v6802_v43 }
 0x2cf   :  { %3394 = vmatpush3.msra.mxu1 %v5598_v59  ;;  %3352 = vmatprep.subr.mxu0 %v6803_v44 }
 0x2d0   :  { %3395 = vmatprep.subr.mxu1 %v5607_v7  ;;  %3353 = vmatpush3.msra.mxu0 %v6804_v53 }
 0x2d1   :  { %3396 = vmatpush3.msra.mxu1 %v5618_v26  ;;  %3354 = vmatprep.subr.mxu0 %v6805_v22 }
 0x2d2   :  { %3397 = vmatprep.subr.mxu1 %v6764_v33  ;;  %3355 = vmatpush3.msra.mxu0 %v6806_v45 }
 0x2d3   :  { %3398 = vmatpush3.msra.mxu1 %v6766_v13  ;;  %3356 = vmatprep.subr.mxu0 %v6807_v21 }
 0x2d4   :  { %3399 = vmatprep.subr.mxu1 %v6768_v20  ;;  %3357 = vmatpush3.msra.mxu0 %v6808_v47 }
 0x2d5   :  { %3400 = vmatpush3.msra.mxu1 %v6770_v63  ;;  %3358 = vmatprep.subr.mxu0 %v6809_v49 }
 0x2d6   :  { %3401 = vmatprep.subr.mxu1 %v6772_v41  ;;  %3359 = vmatpush3.msra.mxu0 %v6810_v23 }
 0x2d7   :  { %3402 = vmatpush3.msra.mxu1 %v6774_v42  ;;  %3360 = vmatprep.subr.mxu0 %v6811_v55 }
 0x2d8   :  { %3403 = vmatprep.subr.mxu1 %v6776_v36  ;;  %3361 = vmatpush3.msra.mxu0 %v6812_v30 }
 0x2d9   :  { %3404 = vmatpush3.msra.mxu1 %v6778_v39  ;;  %3362 = vmatprep.subr.mxu0 %v6813_v27 }
 0x2da   :  { %3186 = vmatmul.mubr.f32.vlgmr.msra.gmra.mxu1 %v5751_v32  ;;  %3363 = vmatpush3.msra.mxu0 %v6814_v40 }
 0x2db   :  { %3364 = vmatprep.subr.mxu0 %v6815_v14 }
 0x2dc   :  { %3365 = vmatpush3.msra.mxu0 %v6816_v48 }
 0x2dd   :  { %3366 = vmatprep.subr.mxu0 %v6817_v35 }
 0x2de   :  { %3367 = vmatpush3.msra.mxu0 %v6818_v29 }
 0x2df   :  { %3368 = vmatprep.subr.mxu0 %v6819_v0 }
 0x2e0   :  { %3369 = vmatpush3.msra.mxu0 %v6820_v19 }
 0x2e1   :  { %3082 = vmatmul.mubr.f32.vlgmr.msra.gmra.mxu0 %v5751_v32 }
 0x357   :  { %v3265_v59 = vpop.f32.mrf.mxu1 }
 0x359   :  { %v3266_v57 = vpop.f32.mrf.mxu1 }
 0x35a   :  { %v3267_v50 = vadd.f32 %v3266_v57, %v3265_v59 }
 0x35f   :  { %v3230_v5 = vpop.f32.mrf.mxu0 }
 0x361   :  { %v3231_v52 = vpop.f32.mrf.mxu0 }
 0x362   :  { %v3232_v26 = vadd.f32 %v3231_v52, %v3230_v5 }
 0x364   :  { %v2438_v13 = vadd.f32 %v3232_v26, %v3197_v16 }
 0x366   :  { %v2670_v63 = vadd.f32 %v3267_v50, %v2438_v13 }
 0x378   :  { %v3335_v33 = vpop.f32.mrf.mxu1 }
 0x37a   :  { %v3336_v24 = vpop.f32.mrf.mxu1 }
 0x37b   :  { %v3337_v28 = vadd.f32 %v3336_v24, %v3335_v33 }
 0x380   :  { %v3300_v7 = vpop.f32.mrf.mxu0 }
 0x382   :  { %v3301_v38 = vpop.f32.mrf.mxu0 }
 0x383   :  { %v3302_v20 = vadd.f32 %v3301_v38, %v3300_v7 }
 0x385   :  { %v2808_v41 = vadd.f32 %v3302_v20, %v2670_v63 }
 0x387   :  { %v2916_v36 = vadd.f32 %v3337_v28, %v2808_v41 }
 0x39a   :  { %v3405_v11 = vpop.f32.mrf.mxu1 }
 0x39c   :  { %v3406_v42 = vpop.f32.mrf.mxu1 }
 0x39d   :  { %v3407_v39 = vadd.f32 %v3406_v42, %v3405_v11 }
 0x3a1   :  { %v3370_v32 = vpop.f32.mrf.mxu0 }
 0x3a3   :  { %v3371_v9 = vpop.f32.mrf.mxu0 }
 0x3a4   :  { %v3372_v56 = vadd.f32 %v3371_v9, %v3370_v32 }
 0x3a6   :  { %v3084_v58 = vadd.f32 %v3372_v56, %v2916_v36 }
 0x3a8   :  { %v3188_v2 = vadd.f32 %v3407_v39, %v3084_v58 }
 0x3aa   :  { %3192 = vst.msk [vmem:[%s5943_s7] sm:$0xff] %vm3191_vm0, %v3188_v2 }

</bundles_post_ra>
